<compile_context>
chip_gen: v7x
topology: tpu7x:2x2x1
jax: 0.10.0
libtpu: 0.0.40
codegen_flags: <defaults>
</compile_context>

<pallas_src>
import functools

import jax
import jax.numpy as jnp
from jax.experimental import pallas as pl
from jax.experimental.pallas import tpu as pltpu


def _round_up(x, m):
    return ((x + m - 1) // m) * m


def hero_embedder_kernel(idx_ref, table_ref, out_ref, *,
                         vocab_offsets, feature_vocabs, k_pad):
    """Fused embedding lookup for one batch tile.

    idx_ref:   (TB, F)        int32  per-feature row indices
    table_ref: (K_pad, D_pad) bf16   block-diagonal stack of all feature tables
    out_ref:   (TB, D_pad)    f32    concatenated embeddings (lane-dense)
    """
    tb = idx_ref.shape[0]
    idx = idx_ref[...]                                    # load tile once

    # One iota over the stacked-vocab (K) axis, reused by every feature.
    iota = jax.lax.broadcasted_iota(jnp.int32, (tb, k_pad), 1)

    onehot = None
    for f, (voff, vocab) in enumerate(zip(vocab_offsets, feature_vocabs)):
        col = idx[:, f:f + 1]                             # (TB, 1)
        valid = (col >= 0) & (col < vocab)                # OOB -> all-zero row
        match = (iota == (col + voff)) & valid            # (TB, K_pad)
        onehot = match if onehot is None else (onehot | match)

    # Single block-diagonal bf16 matmul on the MXU: the concatenated one-hot
    # selects every feature's row at once; one lane-dense output store.
    out_ref[...] = jnp.dot(onehot.astype(jnp.bfloat16), table_ref[...],
                           preferred_element_type=jnp.float32)


def hero_embedder(indices, tables, feature_table, *, tb=256):
    """indices: (B, F) int32; tables: list of (vocab_t, dim_t) float arrays;
    feature_table[f] = which table feature f uses (handles shared embeddings)."""
    B, F = indices.shape
    assert len(feature_table) == F

    feature_vocabs = tuple(int(tables[t].shape[0]) for t in feature_table)
    feature_dims = tuple(int(tables[t].shape[1]) for t in feature_table)
    total_dim = sum(feature_dims)

    # Block-diagonal stack of the per-feature tables (shared tables are
    # duplicated so every feature owns a disjoint row/column block).  Stored
    # in bf16: full MXU rate on all generations (the v5e MXU has no f32 path)
    # and half the VMEM footprint; row selection stays exact.
    sum_vocab = sum(feature_vocabs)
    k_pad = _round_up(sum_vocab, 8)          # sublane-friendly K
    d_pad = _round_up(total_dim, 128)        # lane-dense output width

    stacked = jnp.zeros((k_pad, d_pad), dtype=jnp.bfloat16)
    vocab_offsets = []
    voff = doff = 0
    for t in feature_table:
        tab = tables[t]
        v, d = int(tab.shape[0]), int(tab.shape[1])
        stacked = jax.lax.dynamic_update_slice(
            stacked, tab.astype(jnp.bfloat16), (voff, doff))
        vocab_offsets.append(voff)
        voff += v
        doff += d
    vocab_offsets = tuple(vocab_offsets)

    # Pad the batch to a multiple of the tile (padded rows use index 0 and
    # are sliced off below).
    b_pad = _round_up(max(B, 1), tb)
    if b_pad != B:
        indices = jnp.pad(indices, ((0, b_pad - B), (0, 0)))

    kernel = functools.partial(
        hero_embedder_kernel,
        vocab_offsets=vocab_offsets,
        feature_vocabs=feature_vocabs,
        k_pad=k_pad,
    )

    out = pl.pallas_call(
        kernel,
        out_shape=jax.ShapeDtypeStruct((b_pad, d_pad), jnp.float32),
        grid_spec=pltpu.PrefetchScalarGridSpec(
            num_scalar_prefetch=0,
            grid=(b_pad // tb,),
            in_specs=[
                pl.BlockSpec((tb, F), lambda i: (i, 0)),
                # Full stacked table, constant across the grid (block (0, 0)
                # is revisited every step, so it is DMA'd once).
                pl.BlockSpec((k_pad, d_pad), lambda i: (0, 0)),
            ],
            out_specs=pl.BlockSpec((tb, d_pad), lambda i: (i, 0)),
        ),
        compiler_params=pltpu.CompilerParams(
            dimension_semantics=("parallel",)),
    )(indices, stacked)

    return out[:B, :total_dim]


if __name__ == "__main__":
    # sizes = [(64, 32), (16, 16), 0]  -> feature 2 shares embedding table 0
    sizes = [(64, 32), (16, 16), 0]

    # Resolve the (possibly shared) table list exactly like the PyTorch __init__.
    key = jax.random.PRNGKey(0)
    tables = []          # unique table arrays
    feature_table = []   # feature -> table index
    for s in sizes:
        if isinstance(s, int):
            feature_table.append(feature_table[s])
        else:
            vocab, dim = s
            key, sub = jax.random.split(key)
            tables.append(jax.random.normal(sub, (vocab, dim), dtype=jnp.float32))
            feature_table.append(len(tables) - 1)

    B = 8
    F = len(sizes)
    # Deterministic integer indices, each feature within its table's vocab.
    idx_cols = []
    for f in range(F):
        vocab = tables[feature_table[f]].shape[0]
        key, sub = jax.random.split(key)
        idx_cols.append(jax.random.randint(sub, (B, 1), 0, vocab, dtype=jnp.int32))
    indices = jnp.concatenate(idx_cols, axis=-1)  # (B, F) int32

    out = hero_embedder(indices, tables, feature_table)
    out = jax.block_until_ready(out)

    # Reference 1: exact gather semantics against the bf16-cast tables
    # (kernel row selection is exact; only the table storage dtype differs).
    tables_bf16 = [t.astype(jnp.bfloat16).astype(jnp.float32) for t in tables]
    ref_exact = jnp.concatenate(
        [tables_bf16[feature_table[f]][indices[:, f]] for f in range(F)], axis=-1)
    # Reference 2: original f32 tables, loose tolerance (bf16 cast error).
    ref_f32 = jnp.concatenate(
        [tables[feature_table[f]][indices[:, f]] for f in range(F)], axis=-1)

    assert out.shape == ref_f32.shape, (out.shape, ref_f32.shape)
    assert jnp.allclose(out, ref_exact, atol=1e-6, rtol=1e-6)
    assert jnp.allclose(out, ref_f32, atol=5e-2, rtol=5e-2)
    print("KERNEL_OK")
</pallas_src>

<mosaic_0001>
module attributes {stable_mosaic.version = 11 : i64} {
  func.func @hero_embedder_kernel(%arg0: i32, %arg1: memref<256x3xi32, #tpu.memory_space<vmem>>, %arg2: memref<144x128xbf16, #tpu.memory_space<vmem>>, %arg3: memref<256x128xf32, #tpu.memory_space<vmem>>) attributes {dimension_semantics = [#tpu.dimension_semantics<parallel>], iteration_bounds = array<i64: 1>, scalar_prefetch = 0 : i64, scratch_operands = 0 : i64, tpu.core_type = #tpu.core_type<tc>, window_params = [{transform_indices = @transform_0, window_bounds = array<i64: 256, 3>}, {pipeline_mode = #tpu.pipeline_mode<synchronous>, transform_indices = @transform_1, window_bounds = array<i64: 144, 128>}, {transform_indices = @transform_2, window_bounds = array<i64: 256, 128>}]} {
    %c0 = arith.constant 0 : index
    %c0_0 = arith.constant 0 : index
    %0 = vector.load %arg1[%c0, %c0_0] : memref<256x3xi32, #tpu.memory_space<vmem>>, vector<256x3xi32>
    %1 = tpu.iota {dimensions = array<i32: 1>} : vector<256x144xi32>
    %2 = vector.extract_strided_slice %0 {offsets = [0, 0], sizes = [256, 1], strides = [1, 1]} : vector<256x3xi32> to vector<256x1xi32>
    %c0_i32 = arith.constant 0 : i32
    %3 = vector.broadcast %c0_i32 : i32 to vector<256x1xi32>
    %4 = arith.cmpi sge, %2, %3 : vector<256x1xi32>
    %c64_i32 = arith.constant 64 : i32
    %5 = vector.broadcast %c64_i32 : i32 to vector<256x1xi32>
    %6 = arith.cmpi slt, %2, %5 : vector<256x1xi32>
    %7 = arith.andi %4, %6 : vector<256x1xi1>
    %c0_i32_1 = arith.constant 0 : i32
    %8 = vector.broadcast %c0_i32_1 : i32 to vector<256x1xi32>
    %9 = arith.addi %2, %8 : vector<256x1xi32>
    %10 = vector.broadcast %9 : vector<256x1xi32> to vector<256x144xi32>
    %11 = arith.cmpi eq, %1, %10 : vector<256x144xi32>
    %12 = vector.broadcast %7 : vector<256x1xi1> to vector<256x144xi1>
    %13 = arith.andi %11, %12 : vector<256x144xi1>
    %14 = vector.extract_strided_slice %0 {offsets = [0, 1], sizes = [256, 1], strides = [1, 1]} : vector<256x3xi32> to vector<256x1xi32>
    %c0_i32_2 = arith.constant 0 : i32
    %15 = vector.broadcast %c0_i32_2 : i32 to vector<256x1xi32>
    %16 = arith.cmpi sge, %14, %15 : vector<256x1xi32>
    %c16_i32 = arith.constant 16 : i32
    %17 = vector.broadcast %c16_i32 : i32 to vector<256x1xi32>
    %18 = arith.cmpi slt, %14, %17 : vector<256x1xi32>
    %19 = arith.andi %16, %18 : vector<256x1xi1>
    %c64_i32_3 = arith.constant 64 : i32
    %20 = vector.broadcast %c64_i32_3 : i32 to vector<256x1xi32>
    %21 = arith.addi %14, %20 : vector<256x1xi32>
    %22 = vector.broadcast %21 : vector<256x1xi32> to vector<256x144xi32>
    %23 = arith.cmpi eq, %1, %22 : vector<256x144xi32>
    %24 = vector.broadcast %19 : vector<256x1xi1> to vector<256x144xi1>
    %25 = arith.andi %23, %24 : vector<256x144xi1>
    %26 = arith.ori %13, %25 : vector<256x144xi1>
    %27 = vector.extract_strided_slice %0 {offsets = [0, 2], sizes = [256, 1], strides = [1, 1]} : vector<256x3xi32> to vector<256x1xi32>
    %c0_i32_4 = arith.constant 0 : i32
    %28 = vector.broadcast %c0_i32_4 : i32 to vector<256x1xi32>
    %29 = arith.cmpi sge, %27, %28 : vector<256x1xi32>
    %c64_i32_5 = arith.constant 64 : i32
    %30 = vector.broadcast %c64_i32_5 : i32 to vector<256x1xi32>
    %31 = arith.cmpi slt, %27, %30 : vector<256x1xi32>
    %32 = arith.andi %29, %31 : vector<256x1xi1>
    %c80_i32 = arith.constant 80 : i32
    %33 = vector.broadcast %c80_i32 : i32 to vector<256x1xi32>
    %34 = arith.addi %27, %33 : vector<256x1xi32>
    %35 = vector.broadcast %34 : vector<256x1xi32> to vector<256x144xi32>
    %36 = arith.cmpi eq, %1, %35 : vector<256x144xi32>
    %37 = vector.broadcast %32 : vector<256x1xi1> to vector<256x144xi1>
    %38 = arith.andi %36, %37 : vector<256x144xi1>
    %39 = arith.ori %26, %38 : vector<256x144xi1>
    %40 = arith.extui %39 : vector<256x144xi1> to vector<256x144xi32>
    %41 = arith.sitofp %40 : vector<256x144xi32> to vector<256x144xf32>
    %42 = arith.truncf %41 : vector<256x144xf32> to vector<256x144xbf16>
    %c0_6 = arith.constant 0 : index
    %c0_7 = arith.constant 0 : index
    %43 = vector.load %arg2[%c0_6, %c0_7] : memref<144x128xbf16, #tpu.memory_space<vmem>>, vector<144x128xbf16>
    %cst = arith.constant dense<0.000000e+00> : vector<256x128xf32>
    %44 = tpu.matmul %42, %43, %cst {dimension_numbers = #tpu.dot_dimension_numbers<[1], [0], [0], [1], [0, 0, 1, 1], [], []>} : vector<256x144xbf16>, vector<144x128xbf16>, vector<256x128xf32> -> vector<256x128xf32>
    %c0_8 = arith.constant 0 : index
    %c0_9 = arith.constant 0 : index
    %45 = vector.load %arg3[%c0_8, %c0_9] : memref<256x128xf32, #tpu.memory_space<vmem>>, vector<256x128xf32>
    tpu.vector_store %arg3[%c0_8, %c0_9], %44 {strides = array<i32>} : memref<256x128xf32, #tpu.memory_space<vmem>>, vector<256x128xf32>,
    return
  }
  func.func @transform_0(%arg0: i32) -> (i32, i32) {
    %c0_i32 = arith.constant 0 : i32
    %c0_i32_0 = arith.constant 0 : i32
    return %arg0, %c0_i32 : i32, i32
  }
  func.func @transform_1(%arg0: i32) -> (i32, i32) {
    %c0_i32 = arith.constant 0 : i32
    %c0_i32_0 = arith.constant 0 : i32
    %c0_i32_1 = arith.constant 0 : i32
    return %c0_i32, %c0_i32_0 : i32, i32
  }
  func.func @transform_2(%arg0: i32) -> (i32, i32) {
    %c0_i32 = arith.constant 0 : i32
    %c0_i32_0 = arith.constant 0 : i32
    return %arg0, %c0_i32 : i32, i32
  }
}

</mosaic_0001>

<bundles_post_ra>
// kernel: tpu_custom_call.1
= control target key start
LH: loop header
LB: loop body
LE: loop exit
PB: predicated region body
PF: predicated region fallthrough
CT: control target
= control target key end

     0   :  { %v5591_v2 = vmov 0   ;;  %s5558_s0 = inlined_call_operand.vmem [shape: s32[256,3], index: 0, kind: input, shape index: {}]   ;;  %s5559_s1 = inlined_call_operand.vmem [shape: bf16[144,128], index: 1, kind: input, shape index: {}]   ;;  %s5560_s2 = inlined_call_operand.hbm [shape: f32[256,128], index: 2, kind: output, shape index: {}]  }
   0x1   :  { %v2258_v0 = vld [vmem:[%s5558_s0 + $0x10] sm:$0xff]  ;;  %v2263_v1 = vld [vmem:[%s5558_s0] sm:$0xff]  ;;  %2158 = vset.pattern.permute.xlu1 %v5591_v2  ;;  %2157 = vset.pattern.permute.xlu0 %v5591_v2  ;;  %v2272_v3 = vld [vmem:[%s5558_s0 + $0x18] sm:$0xff] }
   0x2   :  { %151 = vperm.xlu1 %2158, %v2258_v0   ;;  %145 = vperm.xlu0 %2157, %v2263_v1   ;;  %v2277_v4 = vld [vmem:[%s5558_s0 + $0x8] sm:$0xff]  ;;  %v2291_v6 = vld [vmem:[%s5558_s0 + $0x20] sm:$0xff]  ;;  %v2298_v7 = vld [vmem:[%s5558_s0 + $0x38] sm:$0xff] }
   0x3   :  { %1801 = vmatprep.subr.bf16.mxu0 %v5591_v2  ;;  %2131 = vmatprep.subr.bf16.mxu1 %v5591_v2  ;;  %v2286_v5 = vld [vmem:[%s5558_s0 + $0x28] sm:$0xff]  ;;  %v2303_v8 = vld [vmem:[%s5558_s0 + $0x30] sm:$0xff]  ;;  %v2315_v10 = vld [vmem:[%s5558_s0 + $0x40] sm:$0xff] }
   0x4   :  { %v2310_v9 = vld [vmem:[%s5558_s0 + $0x48] sm:$0xff]  ;;  %v2322_v11 = vld [vmem:[%s5558_s0 + $0x58] sm:$0xff]  ;;  %v2327_v12 = vld [vmem:[%s5558_s0 + $0x50] sm:$0xff] }
   0x5   :  { %v2334_v13 = vld [vmem:[%s5558_s0 + $0x68] sm:$0xff]  ;;  %v2339_v14 = vld [vmem:[%s5558_s0 + $0x60] sm:$0xff]  ;;  %v2346_v15 = vld [vmem:[%s5558_s0 + $0x78] sm:$0xff] }
   0x6   :  { %154 = vperm.xlu1 %2158, %v2272_v3   ;;  %148 = vperm.xlu0 %2157, %v2277_v4   ;;  %v2351_v16 = vld [vmem:[%s5558_s0 + $0x70] sm:$0xff]  ;;  %v2358_v17 = vld [vmem:[%s5558_s0 + $0x88] sm:$0xff]  ;;  %v2363_v18 = vld [vmem:[%s5558_s0 + $0x80] sm:$0xff] }
   0x7   :  { %v2370_v19 = vld [vmem:[%s5558_s0 + $0x98] sm:$0xff]  ;;  %v2375_v20 = vld [vmem:[%s5558_s0 + $0x90] sm:$0xff]  ;;  %v2382_v21 = vld [vmem:[%s5558_s0 + $0xa8] sm:$0xff] }
   0x8   :  { %v2387_v22 = vld [vmem:[%s5558_s0 + $0xa0] sm:$0xff] }
   0xa   :  { %160 = vperm.xlu1 %2158, %v2286_v5   ;;  %157 = vperm.xlu0 %2157, %v2291_v6  }
   0xe   :  { %166 = vperm.xlu1 %2158, %v2298_v7   ;;  %163 = vperm.xlu0 %2157, %v2303_v8  }
  0x12   :  { %172 = vperm.xlu1 %2158, %v2310_v9   ;;  %169 = vperm.xlu0 %2157, %v2315_v10  }
  0x16   :  { %178 = vperm.xlu1 %2158, %v2322_v11   ;;  %175 = vperm.xlu0 %2157, %v2327_v12  }
  0x1a   :  { %184 = vperm.xlu1 %2158, %v2334_v13   ;;  %181 = vperm.xlu0 %2157, %v2339_v14  }
  0x1e   :  { %190 = vperm.xlu1 %2158, %v2346_v15   ;;  %187 = vperm.xlu0 %2157, %v2351_v16  }
  0x22   :  { %196 = vperm.xlu1 %2158, %v2358_v17   ;;  %193 = vperm.xlu0 %2157, %v2363_v18  }
  0x26   :  { %202 = vperm.xlu1 %2158, %v2370_v19   ;;  %199 = vperm.xlu0 %2157, %v2375_v20  }
  0x2a   :  { %208 = vperm.xlu1 %2158, %v2382_v21   ;;  %205 = vperm.xlu0 %2157, %v2387_v22  }
  0x2b   :  { %7 = vsyncpa [#allocation3], 0  ;;  %v2394_v23 = vld [vmem:[%s5558_s0 + $0xb8] sm:$0xff]  ;;  %v2399_v24 = vld [vmem:[%s5558_s0 + $0xb0] sm:$0xff]  ;;  %vm49_vm0 = vcmp.ge.s32.totalorder %v2277_v4, 0  ;;  %vm81_vm1 = vcmp.lt.s32.totalorder %v2277_v4, 64 }
  0x2c   :  { %v2406_v25 = vld [vmem:[%s5558_s0 + $0xc8] sm:$0xff]  ;;  %v2411_v26 = vld [vmem:[%s5558_s0 + $0xc0] sm:$0xff]  ;;  %v2418_v27 = vld [vmem:[%s5558_s0 + $0xd8] sm:$0xff]  ;;  %vm48_vm2 = vcmp.ge.s32.totalorder %v2263_v1, 0  ;;  %vm80_vm3 = vcmp.lt.s32.totalorder %v2263_v1, 64  ;;  %vm51_vm6 = vcmp.ge.s32.totalorder %v2272_v3, 0 }
  0x2d   :  { %v2423_v28 = vld [vmem:[%s5558_s0 + $0xd0] sm:$0xff]  ;;  %v2430_v29 = vld [vmem:[%s5558_s0 + $0xe8] sm:$0xff]  ;;  %v2435_v30 = vld [vmem:[%s5558_s0 + $0xe0] sm:$0xff]  ;;  %vm83_vm7 = vcmp.lt.s32.totalorder %v2272_v3, 64  ;;  %vm50_vm8 = vcmp.ge.s32.totalorder %v2258_v0, 0  ;;  %vm82_vm9 = vcmp.lt.s32.totalorder %v2258_v0, 64 }
  0x2e   :  { %214 = vperm.xlu1 %2158, %v2394_v23   ;;  %211 = vperm.xlu0 %2157, %v2399_v24   ;;  %v2446_v31 = vld [vmem:[%s5558_s0 + $0xf8] sm:$0xff]  ;;  %v2451_v32 = vld [vmem:[%s5558_s0 + $0xf0] sm:$0xff]  ;;  %vm113_vm4 = vmand %vm49_vm0, %vm81_vm1  ;;  %vm5561_vm12 = vcmp.ge.s32.totalorder %v2286_v5, 0  ;;  %vm85_vm13 = vcmp.lt.s32.totalorder %v2286_v5, 64  ;;  %vm5562_vm14 = vcmp.ge.s32.totalorder %v2291_v6, 0  ;;  %vm84_vm15 = vcmp.lt.s32.totalorder %v2291_v6, 64 }
  0x2f   :  { %vm112_vm5 = vmand %vm48_vm2, %vm80_vm3  ;;  %v2464_v33 = vsel %vm113_vm4, 1, %v5591_v2  ;;  %vm5563_vm4 = vcmp.ge.s32.totalorder %v2298_v7, 0 }
  0x30   :  { %v2467_v34 = vsel %vm112_vm5, 1, %v5591_v2  ;;  %vm115_vm10 = vmand %vm51_vm6, %vm83_vm7  ;;  %vm87_vm5 = vcmp.lt.s32.totalorder %v2298_v7, 64  ;;  %vm5564_vm7 = vcmp.ge.s32.totalorder %v2303_v8, 0 }
  0x31   :  { %vm114_vm11 = vmand %vm50_vm8, %vm82_vm9  ;;  %v2480_v35 = vsel %vm115_vm10, 1, %v5591_v2  ;;  %vm86_vm9 = vcmp.lt.s32.totalorder %v2303_v8, 64 }
  0x32   :  { %220 = vperm.xlu1 %2158, %v2406_v25   ;;  %217 = vperm.xlu0 %2157, %v2411_v26   ;;  %v2483_v36 = vsel %vm114_vm11, 1, %v5591_v2  ;;  %vm117_vm1 = vmand %vm5561_vm12, %vm85_vm13  ;;  %vm5565_vm13 = vcmp.ge.s32.totalorder %v2310_v9, 0  ;;  %vm5566_vm12 = vcmp.ge.s32.totalorder %v2315_v10, 0 }
  0x33   :  { %vm116_vm3 = vmand %vm5562_vm14, %vm84_vm15  ;;  %v2496_v37 = vsel %vm117_vm1, 1, %v5591_v2  ;;  %vm89_vm15 = vcmp.lt.s32.totalorder %v2310_v9, 64  ;;  %vm88_vm14 = vcmp.lt.s32.totalorder %v2315_v10, 64 }
  0x34   :  { %v2499_v38 = vsel %vm116_vm3, 1, %v5591_v2  ;;  %vm119_vm10 = vmand %vm5563_vm4, %vm87_vm5  ;;  %vm5567_vm5 = vcmp.ge.s32.totalorder %v2322_v11, 0  ;;  %vm5568_vm4 = vcmp.ge.s32.totalorder %v2327_v12, 0 }
  0x35   :  { %vm118_vm11 = vmand %vm5564_vm7, %vm86_vm9  ;;  %v2512_v39 = vsel %vm119_vm10, 1, %v5591_v2  ;;  %vm91_vm9 = vcmp.lt.s32.totalorder %v2322_v11, 64  ;;  %vm90_vm7 = vcmp.lt.s32.totalorder %v2327_v12, 64 }
  0x36   :  { %226 = vperm.xlu1 %2158, %v2418_v27   ;;  %223 = vperm.xlu0 %2157, %v2423_v28   ;;  %v2515_v40 = vsel %vm118_vm11, 1, %v5591_v2  ;;  %vm121_vm1 = vmand %vm5565_vm13, %vm89_vm15  ;;  %vm5569_vm11 = vcmp.ge.s32.totalorder %v2334_v13, 0  ;;  %vm93_vm15 = vcmp.lt.s32.totalorder %v2334_v13, 64  ;;  %vm5570_vm13 = vcmp.ge.s32.totalorder %v2339_v14, 0 }
  0x37   :  { %vm120_vm3 = vmand %vm5566_vm12, %vm88_vm14  ;;  %v2528_v41 = vsel %vm121_vm1, 1, %v5591_v2  ;;  %vm92_vm12 = vcmp.lt.s32.totalorder %v2339_v14, 64 }
  0x38   :  { %v2531_v42 = vsel %vm120_vm3, 1, %v5591_v2  ;;  %vm123_vm14 = vmand %vm5567_vm5, %vm91_vm9  ;;  %vm5571_vm3 = vcmp.ge.s32.totalorder %v2346_v15, 0  ;;  %vm95_vm9 = vcmp.lt.s32.totalorder %v2346_v15, 64  ;;  %vm5572_vm5 = vcmp.ge.s32.totalorder %v2351_v16, 0 }
  0x39   :  { %vm122_vm10 = vmand %vm5568_vm4, %vm90_vm7  ;;  %v2544_v43 = vsel %vm123_vm14, 1, %v5591_v2  ;;  %vm94_vm4 = vcmp.lt.s32.totalorder %v2351_v16, 64 }
  0x3a   :  { %232 = vperm.xlu1 %2158, %v2430_v29   ;;  %229 = vperm.xlu0 %2157, %v2435_v30   ;;  %5818 = vst [vmem:[#allocation5_spill] sm:$0xff] %v2544_v43  ;;  %v2547_v44 = vsel %vm122_vm10, 1, %v5591_v2  ;;  %vm125_vm7 = vmand %vm5569_vm11, %vm93_vm15  ;;  %vm5573_vm10 = vcmp.ge.s32.totalorder %v2358_v17, 0  ;;  %vm97_vm15 = vcmp.lt.s32.totalorder %v2358_v17, 64  ;;  %vm5574_vm11 = vcmp.ge.s32.totalorder %v2363_v18, 0 }
  0x3b   :  { %vm124_vm1 = vmand %vm5570_vm13, %vm92_vm12  ;;  %v2560_v45 = vsel %vm125_vm7, 1, %v5591_v2  ;;  %vm96_vm13 = vcmp.lt.s32.totalorder %v2363_v18, 64 }
  0x3c   :  { %5819 = vst [vmem:[#allocation6_spill] sm:$0xff] %v2560_v45  ;;  %v2563_v46 = vsel %vm124_vm1, 1, %v5591_v2  ;;  %vm127_vm12 = vmand %vm5571_vm3, %vm95_vm9  ;;  %vm5575_vm1 = vcmp.ge.s32.totalorder %v2370_v19, 0  ;;  %vm99_vm9 = vcmp.lt.s32.totalorder %v2370_v19, 64  ;;  %vm5576_vm3 = vcmp.ge.s32.totalorder %v2375_v20, 0 }
  0x3d   :  { %5820 = vst [vmem:[#allocation7_spill] sm:$0xff] %v2563_v46  ;;  %vm126_vm14 = vmand %vm5572_vm5, %vm94_vm4  ;;  %v2576_v47 = vsel %vm127_vm12, 1, %v5591_v2  ;;  %vm98_vm5 = vcmp.lt.s32.totalorder %v2375_v20, 64 }
  0x3e   :  { %238 = vperm.xlu1 %2158, %v2446_v31   ;;  %235 = vperm.xlu0 %2157, %v2451_v32   ;;  %5821 = vst [vmem:[#allocation8_spill] sm:$0xff] %v2576_v47  ;;  %v2579_v48 = vsel %vm126_vm14, 1, %v5591_v2  ;;  %vm129_vm4 = vmand %vm5573_vm10, %vm97_vm15  ;;  %vm5577_vm14 = vcmp.ge.s32.totalorder %v2382_v21, 0  ;;  %vm101_vm15 = vcmp.lt.s32.totalorder %v2382_v21, 64  ;;  %vm5578_vm10 = vcmp.ge.s32.totalorder %v2387_v22, 0 }
  0x3f   :  { %5822 = vst [vmem:[#allocation9_spill] sm:$0xff] %v2579_v48  ;;  %vm128_vm7 = vmand %vm5574_vm11, %vm96_vm13  ;;  %v2592_v49 = vsel %vm129_vm4, 1, %v5591_v2  ;;  %vm100_vm11 = vcmp.lt.s32.totalorder %v2387_v22, 64 }
  0x40   :  { %v2595_v50 = vsel %vm128_vm7, 1, %v5591_v2  ;;  %vm131_vm13 = vmand %vm5575_vm1, %vm99_vm9  ;;  %vm5579_vm7 = vcmp.ge.s32.totalorder %v2394_v23, 0  ;;  %vm103_vm9 = vcmp.lt.s32.totalorder %v2394_v23, 64  ;;  %vm5580_vm1 = vcmp.ge.s32.totalorder %v2399_v24, 0 }
  0x41   :  { %vm130_vm12 = vmand %vm5576_vm3, %vm98_vm5  ;;  %v2608_v51 = vsel %vm131_vm13, 1, %v5591_v2  ;;  %vm102_vm3 = vcmp.lt.s32.totalorder %v2399_v24, 64 }
  0x42   :  { %340 = vperm.xlu1 %2158, %v2464_v33   ;;  %337 = vperm.xlu0 %2157, %v2467_v34   ;;  %v2611_v52 = vsel %vm130_vm12, 1, %v5591_v2  ;;  %vm133_vm5 = vmand %vm5577_vm14, %vm101_vm15  ;;  %vm5581_vm12 = vcmp.ge.s32.totalorder %v2406_v25, 0  ;;  %vm105_vm15 = vcmp.lt.s32.totalorder %v2406_v25, 64  ;;  %vm5582_vm14 = vcmp.ge.s32.totalorder %v2411_v26, 0 }
  0x43   :  { %vm132_vm4 = vmand %vm5578_vm10, %vm100_vm11  ;;  %v2624_v53 = vsel %vm133_vm5, 1, %v5591_v2  ;;  %vm104_vm10 = vcmp.lt.s32.totalorder %v2411_v26, 64 }
  0x44   :  { %v2627_v54 = vsel %vm132_vm4, 1, %v5591_v2  ;;  %vm135_vm11 = vmand %vm5579_vm7, %vm103_vm9  ;;  %vm5584_vm4 = vcmp.ge.s32.totalorder %v2418_v27, 0  ;;  %vm107_vm9 = vcmp.lt.s32.totalorder %v2418_v27, 64  ;;  %vm5583_vm7 = vcmp.ge.s32.totalorder %v2423_v28, 0 }
  0x45   :  { %vm134_vm13 = vmand %vm5580_vm1, %vm102_vm3  ;;  %v2640_v55 = vsel %vm135_vm11, 1, %v5591_v2  ;;  %vm106_vm1 = vcmp.lt.s32.totalorder %v2423_v28, 64 }
  0x46   :  { %346 = vperm.xlu1 %2158, %v2480_v35   ;;  %343 = vperm.xlu0 %2157, %v2483_v36   ;;  %v2643_v56 = vsel %vm134_vm13, 1, %v5591_v2  ;;  %vm137_vm3 = vmand %vm5581_vm12, %vm105_vm15  ;;  %vm77_vm13 = vcmp.ge.s32.totalorder %v2430_v29, 0  ;;  %vm109_vm15 = vcmp.lt.s32.totalorder %v2430_v29, 64  ;;  %vm76_vm12 = vcmp.ge.s32.totalorder %v2435_v30, 0 }
  0x47   :  { %vm136_vm5 = vmand %vm5582_vm14, %vm104_vm10  ;;  %v2656_v57 = vsel %vm137_vm3, 1, %v5591_v2  ;;  %vm108_vm14 = vcmp.lt.s32.totalorder %v2435_v30, 64 }
  0x48   :  { %5823 = vst [vmem:[#allocation10_spill] sm:$0xff] %v2656_v57  ;;  %v2659_v58 = vsel %vm136_vm5, 1, %v5591_v2  ;;  %vm139_vm10 = vmand %vm5584_vm4, %vm107_vm9  ;;  %vm79_vm5 = vcmp.ge.s32.totalorder %v2446_v31, 0  ;;  %vm111_vm9 = vcmp.lt.s32.totalorder %v2446_v31, 64  ;;  %vm110_vm4 = vcmp.lt.s32.totalorder %v2451_v32, 64 }
  0x49   :  { %vm138_vm11 = vmand %vm5583_vm7, %vm106_vm1  ;;  %v2672_v59 = vsel %vm139_vm10, 1, %v5591_v2  ;;  %vm5680_vm7 = vcmp.ge.s32.totalorder %v2451_v32, 0 }
  0x4a   :  { %352 = vperm.xlu1 %2158, %v2496_v37   ;;  %349 = vperm.xlu0 %2157, %v2499_v38   ;;  %5824 = vst [vmem:[#allocation11_spill] sm:$0xff] %v2672_v59  ;;  %v2675_v60 = vsel %vm138_vm11, 1, %v5591_v2  ;;  %vm141_vm1 = vmand %vm77_vm13, %vm109_vm15  ;;  %vm529_vm11 = vcmp.lt.s32.totalorder %v2277_v4, 16 }
  0x4b   :  { %vm140_vm3 = vmand %vm76_vm12, %vm108_vm14  ;;  %v2688_v61 = vsel %vm141_vm1, 1, %v5591_v2 }
  0x4c   :  { %5825 = vst [vmem:[#allocation12_spill] sm:$0xff] %v2688_v61  ;;  %v2691_v62 = vsel %vm140_vm3, 1, %v5591_v2  ;;  %vm143_vm14 = vmand %vm79_vm5, %vm111_vm9  ;;  %vm530_vm3 = vcmp.lt.s32.totalorder %v2258_v0, 16  ;;  %vm531_vm9 = vcmp.lt.s32.totalorder %v2272_v3, 16 }
  0x4d   :  { %5826 = vst [vmem:[#allocation13_spill] sm:$0xff] %v2691_v62  ;;  %vm142_vm10 = vmand %vm5680_vm7, %vm110_vm4  ;;  %v2700_v63 = vsel %vm143_vm14, 1, %v5591_v2  ;;  %vm528_vm4 = vcmp.lt.s32.totalorder %v2263_v1, 16  ;;  %vm532_vm14 = vcmp.lt.s32.totalorder %v2291_v6, 16 }
  0x4e   :  { %358 = vperm.xlu1 %2158, %v2512_v39   ;;  %355 = vperm.xlu0 %2157, %v2515_v40   ;;  %5827 = vst [vmem:[#allocation14_spill] sm:$0xff] %v2700_v63  ;;  %vm560_vm15 = vmand %vm48_vm2, %vm528_vm4  ;;  %vm5862_vm4 = vcmp.ge.s32.totalorder %v2291_v6, 0 }
  0x4f   :  { %vm561_vm1 = vmand %vm49_vm0, %vm529_vm11  ;;  %vm5863_vm11 = vcmp.ge.s32.totalorder %v2286_v5, 0 }
  0x50   :  { %vm562_vm2 = vmand %vm50_vm8, %vm530_vm3  ;;  %vm5864_vm3 = vcmp.ge.s32.totalorder %v2303_v8, 0 }
  0x51   :  { %vm563_vm0 = vmand %vm51_vm6, %vm531_vm9 }
  0x52   :  { %364 = vperm.xlu1 %2158, %v2528_v41   ;;  %361 = vperm.xlu0 %2157, %v2531_v42   ;;  %vm564_vm8 = vmand %vm5862_vm4, %vm532_vm14  ;;  %vm536_vm14 = vcmp.lt.s32.totalorder %v2315_v10, 16  ;;  %vm5868_vm4 = vcmp.ge.s32.totalorder %v2315_v10, 0 }
  0x56   :  { %370 = vperm.xlu1 %2158, %v2544_v43   ;;  %367 = vperm.xlu0 %2157, %v2547_v44  }
  0x5a   :  { %376 = vperm.xlu1 %2158, %v2560_v45   ;;  %373 = vperm.xlu0 %2157, %v2563_v46   ;;  %v593_v45 = vadd.s32 64, %v2277_v4 }
  0x5e   :  { %382 = vperm.xlu1 %2158, %v2576_v47   ;;  %379 = vperm.xlu0 %2157, %v2579_v48   ;;  %v2703_v47 = vsel %vm142_vm10, 1, %v5591_v2  ;;  %v594_v2 = vadd.s32 64, %v2258_v0  ;;  %vm533_vm10 = vcmp.lt.s32.totalorder %v2286_v5, 16 }
  0x5f   :  { %5828 = vst [vmem:[#allocation15_spill] sm:$0xff] %v2703_v47  ;;  %vm565_vm6 = vmand %vm5863_vm11, %vm533_vm10  ;;  %vm537_vm10 = vcmp.lt.s32.totalorder %v2310_v9, 16  ;;  %vm5869_vm11 = vcmp.ge.s32.totalorder %v2310_v9, 0 }
  0x62   :  { %388 = vperm.xlu1 %2158, %v2592_v49   ;;  %385 = vperm.xlu0 %2157, %v2595_v50  }
  0x66   :  { %394 = vperm.xlu1 %2158, %v2608_v51   ;;  %391 = vperm.xlu0 %2157, %v2611_v52  }
  0x6a   :  { %400 = vperm.xlu1 %2158, %v2624_v53   ;;  %397 = vperm.xlu0 %2157, %v2627_v54  }
  0x6e   :  { %406 = vperm.xlu1 %2158, %v2640_v55   ;;  %403 = vperm.xlu0 %2157, %v2643_v56  }
  0x72   :  { %412 = vperm.xlu1 %2158, %v2656_v57   ;;  %409 = vperm.xlu0 %2157, %v2659_v58  }
  0x76   :  { %418 = vperm.xlu1 %2158, %v2672_v59   ;;  %415 = vperm.xlu0 %2157, %v2675_v60   ;;  %v592_v59 = vadd.s32 64, %v2263_v1 }
  0x7a   :  { %424 = vperm.xlu1 %2158, %v2688_v61   ;;  %421 = vperm.xlu0 %2157, %v2691_v62   ;;  %v5600_v61 = vmov 1  }
  0x7e   :  { %430 = vperm.xlu1 %2158, %v2700_v63   ;;  %427 = vperm.xlu0 %2157, %v2703_v47   ;;  %v595_v63 = vadd.s32 64, %v2272_v3 }
  0x81   :  { %v2709_v43 = vpop.permute.xlu1 %151  ;;  %v2711_v48 = vpop.permute.xlu0 %145 }
  0x82   :  { %5829 = vst [vmem:[#allocation16_spill] sm:$0xff] %v2709_v43  ;;  %5830 = vst [vmem:[#allocation17_spill] sm:$0xff] %v2711_v48  ;;  %2160 = vset.pattern.permute.xlu1 %v5600_v61  ;;  %2159 = vset.pattern.permute.xlu0 %v5600_v61  ;;  %v596_v43 = vadd.s32 64, %v2291_v6  ;;  %v597_v48 = vadd.s32 64, %v2286_v5 }
  0x83   :  { %628 = vperm.xlu1 %2160, %v593_v45   ;;  %625 = vperm.xlu0 %2159, %v592_v59   ;;  %v598_v45 = vadd.s32 64, %v2303_v8  ;;  %v599_v59 = vadd.s32 64, %v2298_v7 }
  0x85   :  { %v2717_v47 = vpop.permute.xlu1 %154  ;;  %v2719_v62 = vpop.permute.xlu0 %148 }
  0x86   :  { %5831 = vst [vmem:[#allocation18_spill] sm:$0xff] %v2717_v47  ;;  %5832 = vst [vmem:[#allocation19_spill] sm:$0xff] %v2719_v62 }
  0x87   :  { %631 = vperm.xlu1 %2160, %v594_v2   ;;  %634 = vperm.xlu0 %2159, %v595_v63   ;;  %v600_v2 = vadd.s32 64, %v2315_v10  ;;  %v601_v63 = vadd.s32 64, %v2310_v9 }
  0x89   :  { %v2723_v57 = vpop.permute.xlu1 %160  ;;  %v2725_v46 = vpop.permute.xlu0 %157 }
  0x8a   :  { %5833 = vst [vmem:[#allocation20_spill] sm:$0xff] %v2723_v57  ;;  %5834 = vst [vmem:[#allocation21_spill] sm:$0xff] %v2725_v46 }
  0x8b   :  { %637 = vperm.xlu1 %2160, %v596_v43   ;;  %640 = vperm.xlu0 %2159, %v597_v48   ;;  %v602_v43 = vadd.s32 64, %v2327_v12  ;;  %v603_v48 = vadd.s32 64, %v2322_v11 }
  0x8d   :  { %v2729_v61 = vpop.permute.xlu1 %166  ;;  %v2731_v47 = vpop.permute.xlu0 %163 }
  0x8e   :  { %5835 = vst [vmem:[#allocation22_spill] sm:$0xff] %v2729_v61  ;;  %5836 = vst [vmem:[#allocation23_spill] sm:$0xff] %v2731_v47 }
  0x8f   :  { %643 = vperm.xlu1 %2160, %v598_v45   ;;  %646 = vperm.xlu0 %2159, %v599_v59   ;;  %v604_v45 = vadd.s32 64, %v2339_v14  ;;  %v605_v59 = vadd.s32 64, %v2334_v13 }
  0x91   :  { %v2735_v62 = vpop.permute.xlu1 %172  ;;  %v2737_v57 = vpop.permute.xlu0 %169 }
  0x92   :  { %5837 = vst [vmem:[#allocation24_spill] sm:$0xff] %v2735_v62  ;;  %5838 = vst [vmem:[#allocation25_spill] sm:$0xff] %v2737_v57 }
  0x93   :  { %649 = vperm.xlu1 %2160, %v600_v2   ;;  %652 = vperm.xlu0 %2159, %v601_v63   ;;  %v606_v2 = vadd.s32 64, %v2351_v16  ;;  %v607_v63 = vadd.s32 64, %v2346_v15 }
  0x95   :  { %v2741_v46 = vpop.permute.xlu1 %178  ;;  %v2743_v61 = vpop.permute.xlu0 %175 }
  0x96   :  { %5839 = vst [vmem:[#allocation26_spill] sm:$0xff] %v2741_v46  ;;  %5840 = vst [vmem:[#allocation27_spill] sm:$0xff] %v2743_v61 }
  0x97   :  { %655 = vperm.xlu1 %2160, %v602_v43   ;;  %658 = vperm.xlu0 %2159, %v603_v48   ;;  %v608_v43 = vadd.s32 64, %v2363_v18  ;;  %v609_v48 = vadd.s32 64, %v2358_v17 }
  0x99   :  { %v2747_v47 = vpop.permute.xlu1 %184  ;;  %v2749_v62 = vpop.permute.xlu0 %181 }
  0x9a   :  { %5841 = vst [vmem:[#allocation28_spill] sm:$0xff] %v2747_v47  ;;  %5842 = vst [vmem:[#allocation29_spill] sm:$0xff] %v2749_v62 }
  0x9b   :  { %661 = vperm.xlu1 %2160, %v604_v45   ;;  %664 = vperm.xlu0 %2159, %v605_v59   ;;  %v610_v45 = vadd.s32 64, %v2375_v20  ;;  %v611_v59 = vadd.s32 64, %v2370_v19 }
  0x9d   :  { %v2753_v57 = vpop.permute.xlu1 %190  ;;  %v2755_v46 = vpop.permute.xlu0 %187 }
  0x9e   :  { %5843 = vst [vmem:[#allocation30_spill] sm:$0xff] %v2753_v57  ;;  %5844 = vst [vmem:[#allocation31_spill] sm:$0xff] %v2755_v46 }
  0x9f   :  { %667 = vperm.xlu1 %2160, %v606_v2   ;;  %670 = vperm.xlu0 %2159, %v607_v63   ;;  %v612_v2 = vadd.s32 64, %v2387_v22  ;;  %v613_v63 = vadd.s32 64, %v2382_v21 }
  0xa1   :  { %v2759_v61 = vpop.permute.xlu1 %196  ;;  %v2761_v47 = vpop.permute.xlu0 %193 }
  0xa2   :  { %5845 = vst [vmem:[#allocation32_spill] sm:$0xff] %v2759_v61  ;;  %5846 = vst [vmem:[#allocation33_spill] sm:$0xff] %v2761_v47 }
  0xa3   :  { %673 = vperm.xlu1 %2160, %v608_v43   ;;  %676 = vperm.xlu0 %2159, %v609_v48   ;;  %v614_v43 = vadd.s32 64, %v2399_v24  ;;  %v615_v48 = vadd.s32 64, %v2394_v23 }
  0xa5   :  { %v2765_v62 = vpop.permute.xlu1 %202  ;;  %v2767_v57 = vpop.permute.xlu0 %199 }
  0xa6   :  { %5847 = vst [vmem:[#allocation34_spill] sm:$0xff] %v2765_v62  ;;  %5848 = vst [vmem:[#allocation35_spill] sm:$0xff] %v2767_v57 }
  0xa7   :  { %679 = vperm.xlu1 %2160, %v610_v45   ;;  %682 = vperm.xlu0 %2159, %v611_v59   ;;  %v616_v45 = vadd.s32 64, %v2411_v26  ;;  %v617_v59 = vadd.s32 64, %v2406_v25 }
  0xa9   :  { %v2771_v46 = vpop.permute.xlu1 %208  ;;  %v2773_v61 = vpop.permute.xlu0 %205 }
  0xaa   :  { %5849 = vst [vmem:[#allocation36_spill] sm:$0xff] %v2771_v46  ;;  %5850 = vst [vmem:[#allocation37_spill] sm:$0xff] %v2773_v61 }
  0xab   :  { %685 = vperm.xlu1 %2160, %v612_v2   ;;  %688 = vperm.xlu0 %2159, %v613_v63   ;;  %v618_v2 = vadd.s32 64, %v2423_v28  ;;  %v619_v63 = vadd.s32 64, %v2418_v27 }
  0xad   :  { %v2777_v47 = vpop.permute.xlu1 %214  ;;  %v2779_v62 = vpop.permute.xlu0 %211 }
  0xae   :  { %5851 = vst [vmem:[#allocation38_spill] sm:$0xff] %v2777_v47  ;;  %5852 = vst [vmem:[#allocation39_spill] sm:$0xff] %v2779_v62 }
  0xaf   :  { %691 = vperm.xlu1 %2160, %v614_v43   ;;  %694 = vperm.xlu0 %2159, %v615_v48   ;;  %v620_v43 = vadd.s32 64, %v2435_v30  ;;  %v621_v48 = vadd.s32 64, %v2430_v29 }
  0xb1   :  { %v2783_v57 = vpop.permute.xlu1 %220  ;;  %v2785_v46 = vpop.permute.xlu0 %217 }
  0xb2   :  { %5853 = vst [vmem:[#allocation40_spill] sm:$0xff] %v2783_v57  ;;  %5854 = vst [vmem:[#allocation41_spill] sm:$0xff] %v2785_v46 }
  0xb3   :  { %697 = vperm.xlu1 %2160, %v616_v45   ;;  %700 = vperm.xlu0 %2159, %v617_v59   ;;  %v622_v45 = vadd.s32 64, %v2451_v32  ;;  %v623_v59 = vadd.s32 64, %v2446_v31 }
  0xb5   :  { %v2789_v61 = vpop.permute.xlu1 %226  ;;  %v2791_v47 = vpop.permute.xlu0 %223 }
  0xb6   :  { %5855 = vst [vmem:[#allocation42_spill] sm:$0xff] %v2789_v61  ;;  %5856 = vst [vmem:[#allocation43_spill] sm:$0xff] %v2791_v47 }
  0xb7   :  { %703 = vperm.xlu1 %2160, %v618_v2   ;;  %706 = vperm.xlu0 %2159, %v619_v63   ;;  %v5861_v63 = vmov 0  }
  0xb8   :  { %v788_v3 = vsel %vm564_vm8, 1, %v5861_v63  ;;  %v789_v47 = vsel %vm565_vm6, 1, %v5861_v63  ;;  %vm568_vm8 = vmand %vm5868_vm4, %vm536_vm14  ;;  %vm546_vm14 = vcmp.lt.s32.totalorder %v2375_v20, 16 }
  0xb9   :  { %v2795_v62 = vpop.permute.xlu1 %232  ;;  %v2797_v57 = vpop.permute.xlu0 %229  ;;  %vm569_vm6 = vmand %vm5869_vm11, %vm537_vm10  ;;  %vm5876_vm10 = vcmp.ge.s32.totalorder %v2375_v20, 0  ;;  %vm5879_vm11 = vcmp.ge.s32.totalorder %v2387_v22, 0 }
  0xba   :  { %5857 = vst [vmem:[#allocation44_spill] sm:$0xff] %v2795_v62  ;;  %5858 = vst [vmem:[#allocation45_spill] sm:$0xff] %v2797_v57  ;;  %v787_v57 = vsel %vm563_vm0, 1, %v5861_v63 }
  0xbb   :  { %709 = vperm.xlu1 %2160, %v620_v43   ;;  %712 = vperm.xlu0 %2159, %v621_v48   ;;  %v784_v43 = vsel %vm560_vm15, 1, %v5861_v63  ;;  %vm534_vm15 = vcmp.lt.s32.totalorder %v2303_v8, 16  ;;  %vm578_vm4 = vmand %vm5876_vm10, %vm546_vm14  ;;  %vm538_vm14 = vcmp.lt.s32.totalorder %v2327_v12, 16  ;;  %vm5884_vm10 = vcmp.ge.s32.totalorder %v2327_v12, 0 }
  0xbc   :  { %vm566_vm9 = vmand %vm5864_vm3, %vm534_vm15  ;;  %vm544_vm15 = vcmp.lt.s32.totalorder %v2363_v18, 16  ;;  %vm5872_vm3 = vcmp.ge.s32.totalorder %v2363_v18, 0 }
  0xbd   :  { %v2803_v2 = vpop.permute.xlu1 %238  ;;  %v2805_v61 = vpop.permute.xlu0 %235  ;;  %v790_v5 = vsel %vm566_vm9, 1, %v5861_v63  ;;  %vm576_vm9 = vmand %vm5872_vm3, %vm544_vm15  ;;  %vm550_vm15 = vcmp.lt.s32.totalorder %v2399_v24, 16 }
  0xbe   :  { %5859 = vst [vmem:[#allocation46_spill] sm:$0xff] %v2803_v2  ;;  %5860 = vst [vmem:[#allocation47_spill] sm:$0xff] %v2805_v61  ;;  %v785_v2 = vsel %vm561_vm1, 1, %v5861_v63  ;;  %vm535_vm1 = vcmp.lt.s32.totalorder %v2298_v7, 16  ;;  %v800_v9 = vsel %vm576_vm9, 1, %v5861_v63  ;;  %vm552_vm9 = vcmp.lt.s32.totalorder %v2411_v26, 16 }
  0xbf   :  { %715 = vperm.xlu1 %2160, %v622_v45   ;;  %718 = vperm.xlu0 %2159, %v623_v59   ;;  %v786_v45 = vsel %vm562_vm2, 1, %v5861_v63  ;;  %vm5865_vm2 = vcmp.ge.s32.totalorder %v2298_v7, 0  ;;  %v792_v7 = vsel %vm568_vm8, 1, %v5861_v63  ;;  %vm548_vm8 = vcmp.lt.s32.totalorder %v2387_v22, 16 }
  0xc0   :  { %vm567_vm0 = vmand %vm5865_vm2, %vm535_vm1  ;;  %vm545_vm1 = vcmp.lt.s32.totalorder %v2358_v17, 16  ;;  %vm5873_vm2 = vcmp.ge.s32.totalorder %v2358_v17, 0 }
  0xc1   :  { %v2814_v48 = vpop.permute.xlu1 %340  ;;  %v2816_v62 = vpop.permute.xlu0 %337  ;;  %v791_v46 = vsel %vm567_vm0, 1, %v5861_v63  ;;  %vm577_vm0 = vmand %vm5873_vm2, %vm545_vm1  ;;  %vm5882_vm1 = vcmp.ge.s32.totalorder %v2399_v24, 0  ;;  %vm5883_vm2 = vcmp.ge.s32.totalorder %v2411_v26, 0 }
  0xc2   :  { %vm582_vm3 = vmand %vm5882_vm1, %vm550_vm15  ;;  %vm5886_vm1 = vcmp.ge.s32.totalorder %v2370_v19, 0 }
  0xc3   :  { %817 = vperm.xlu1 %2160, %v784_v43   ;;  %820 = vperm.xlu0 %2159, %v785_v2  }
  0xc5   :  { %v2826_v59 = vpop.permute.xlu1 %346  ;;  %v2828_v61 = vpop.permute.xlu0 %343 }
  0xc7   :  { %823 = vperm.xlu1 %2160, %v786_v45   ;;  %826 = vperm.xlu0 %2159, %v787_v57  }
  0xc9   :  { %v2838_v2 = vpop.permute.xlu1 %352  ;;  %v2840_v43 = vpop.permute.xlu0 %349 }
  0xcb   :  { %829 = vperm.xlu1 %2160, %v788_v3   ;;  %832 = vperm.xlu0 %2159, %v789_v47   ;;  %v793_v3 = vsel %vm569_vm6, 1, %v5861_v63  ;;  %vm580_vm6 = vmand %vm5879_vm11, %vm548_vm8  ;;  %vm555_vm8 = vcmp.lt.s32.totalorder %v2418_v27, 16  ;;  %vm547_vm11 = vcmp.lt.s32.totalorder %v2370_v19, 16 }
  0xcd   :  { %v2850_v57 = vpop.permute.xlu1 %358  ;;  %v2852_v45 = vpop.permute.xlu0 %355 }
  0xce   :  { %5866 = vst [vmem:[#allocation48_spill] sm:$0xff] %v2850_v57  ;;  %5867 = vst [vmem:[#allocation49_spill] sm:$0xff] %v2852_v45  ;;  %v5935_v45 = vld [vmem:[#allocation5_spill] sm:$0xff] }
  0xcf   :  { %835 = vperm.xlu1 %2160, %v790_v5   ;;  %838 = vperm.xlu0 %2159, %v791_v46   ;;  %v801_v5 = vsel %vm577_vm0, 1, %v5861_v63  ;;  %vm584_vm0 = vmand %vm5883_vm2, %vm552_vm9  ;;  %vm540_vm9 = vcmp.lt.s32.totalorder %v2339_v14, 16  ;;  %vm5889_vm2 = vcmp.ge.s32.totalorder %v2339_v14, 0 }
  0xd1   :  { %v2862_v8 = vpop.permute.xlu1 %364  ;;  %v2864_v47 = vpop.permute.xlu0 %361 }
  0xd2   :  { %5870 = vst [vmem:[#allocation50_spill] sm:$0xff] %v2862_v8  ;;  %5871 = vst [vmem:[#allocation51_spill] sm:$0xff] %v2864_v47  ;;  %v802_v47 = vsel %vm578_vm4, 1, %v5861_v63 }
  0xd3   :  { %841 = vperm.xlu1 %2160, %v792_v7   ;;  %844 = vperm.xlu0 %2159, %v793_v3   ;;  %v1072_v7 = vadd.s32 80, %v2263_v1  ;;  %vm570_vm4 = vmand %vm5884_vm10, %vm538_vm14  ;;  %vm557_vm14 = vcmp.lt.s32.totalorder %v2430_v29, 16 }
  0xd4   :  { %vm589_vm10 = vmand %vm77_vm13, %vm557_vm14  ;;  %vm5919_vm14 = vcmp.ge.s32.totalorder %v2406_v25, 0 }
  0xd5   :  { %v2873_v10 = vpop.permute.xlu1 %370  ;;  %v2875_v46 = vpop.permute.xlu0 %367 }
  0xd6   :  { %5874 = vst [vmem:[#allocation52_spill] sm:$0xff] %v2873_v10  ;;  %5875 = vst [vmem:[#allocation53_spill] sm:$0xff] %v2875_v46  ;;  %v5636_v10 = vmov 2   ;;  %v1090_v46 = vadd.s32 80, %v2375_v20 }
  0xd7   :  { %865 = vperm.xlu1 %2160, %v800_v9   ;;  %868 = vperm.xlu0 %2159, %v801_v5   ;;  %v1088_v9 = vadd.s32 80, %v2363_v18  ;;  %v806_v18 = vsel %vm582_vm3, 1, %v5861_v63  ;;  %vm579_vm3 = vmand %vm5886_vm1, %vm547_vm11 }
  0xd9   :  { %v2882_v8 = vpop.permute.xlu1 %376  ;;  %v2884_v3 = vpop.permute.xlu0 %373 }
  0xda   :  { %5877 = vst [vmem:[#allocation54_spill] sm:$0xff] %v2882_v8  ;;  %5878 = vst [vmem:[#allocation55_spill] sm:$0xff] %v2884_v3  ;;  %v804_v8 = vsel %vm580_vm6, 1, %v5861_v63  ;;  %vm5885_vm6 = vcmp.ge.s32.totalorder %v2418_v27, 0  ;;  %v5890_v27 = vmov 1  }
  0xdb   :  { %2161 = vset.pattern.permute.xlu1 %v5636_v10  ;;  %871 = vperm.xlu0 %2159, %v802_v47   ;;  %v1089_v10 = vadd.s32 80, %v2358_v17  ;;  %vm587_vm15 = vmand %vm5885_vm6, %vm555_vm8  ;;  %vm5896_vm8 = vcmp.ge.s32.totalorder %v2351_v16, 0  ;;  %vm559_vm6 = vcmp.lt.s32.totalorder %v2446_v31, 16 }
  0xdc   :  { %1105 = vperm.xlu1 %2161, %v1072_v7   ;;  %vm591_vm13 = vmand %vm79_vm5, %vm559_vm6  ;;  %vm549_vm5 = vcmp.lt.s32.totalorder %v2382_v21, 16 }
  0xdd   :  { %v2892_v5 = vpop.permute.xlu1 %382  ;;  %v2894_v1 = vpop.permute.xlu0 %379 }
  0xde   :  { %5880 = vst [vmem:[#allocation56_spill] sm:$0xff] %v2892_v5  ;;  %5881 = vst [vmem:[#allocation57_spill] sm:$0xff] %v2894_v1  ;;  %v1074_v5 = vadd.s32 80, %v2258_v0 }
  0xdf   :  { %877 = vperm.xlu0 %2159, %v804_v8   ;;  %v808_v8 = vsel %vm584_vm0, 1, %v5861_v63  ;;  %vm572_vm0 = vmand %vm5889_vm2, %vm540_vm9  ;;  %vm5913_vm9 = vcmp.ge.s32.totalorder %v2394_v23, 0 }
  0xe0   :  { %1153 = vperm.xlu1 %2161, %v1088_v9   ;;  %v811_v9 = vsel %vm587_vm15, 1, %v5861_v63  ;;  %vm5901_vm15 = vcmp.ge.s32.totalorder %v2382_v21, 0 }
  0xe1   :  { %v2901_v3 = vpop.permute.xlu1 %388  ;;  %v2903_v47 = vpop.permute.xlu0 %385  ;;  %vm581_vm1 = vmand %vm5901_vm15, %vm549_vm5 }
  0xe3   :  { %883 = vperm.xlu0 %2159, %v806_v18   ;;  %v803_v18 = vsel %vm579_vm3, 1, %v5861_v63  ;;  %vm551_vm3 = vcmp.lt.s32.totalorder %v2394_v23, 16  ;;  %v2188_v23 = vld [vmem:[%s5558_s0 + $0x38] sm:$0xff] }
  0xe4   :  { %1156 = vperm.xlu1 %2161, %v1089_v10   ;;  %v794_v10 = vsel %vm570_vm4, 1, %v5861_v63  ;;  %vm542_vm4 = vcmp.lt.s32.totalorder %v2351_v16, 16  ;;  %vm583_vm2 = vmand %vm5913_vm9, %vm551_vm3 }
  0xe5   :  { %v2909_v24 = vpop.permute.xlu1 %394  ;;  %v2911_v7 = vpop.permute.xlu0 %391  ;;  %vm574_vm11 = vmand %vm5896_vm8, %vm542_vm4  ;;  %vm5927_vm8 = vcmp.ge.s32.totalorder %v2322_v11, 0 }
  0xe7   :  { %889 = vperm.xlu0 %2159, %v808_v8  }
  0xe8   :  { %1268 = vperm.xlu1 %2161, %v2464_v33  }
  0xe9   :  { %v2919_v17 = vpop.permute.xlu1 %400  ;;  %v2921_v26 = vpop.permute.xlu0 %397 }
  0xeb   :  { %847 = vperm.xlu0 %2159, %v794_v10   ;;  %v796_v10 = vsel %vm572_vm0, 1, %v5861_v63 }
  0xec   :  { %1316 = vperm.xlu1 %2161, %v2592_v49  }
  0xed   :  { %v2930_v12 = vpop.permute.xlu1 %406  ;;  %v2932_v33 = vpop.permute.xlu0 %403 }
  0xee   :  { %5887 = vst [vmem:[#allocation58_spill] sm:$0xff] %v2930_v12  ;;  %5888 = vst [vmem:[#allocation59_spill] sm:$0xff] %v2932_v33  ;;  %v6016_v33 = vmov 0 }
  0xef   :  { %898 = vperm.xlu0 %2159, %v811_v9   ;;  %v5894_v9 = vmov 2  }
  0xf0   :  { %2162 = vset.pattern.permute.xlu1 %v5890_v27 }
  0xf1   :  { %v2940_v8 = vpop.permute.xlu1 %412  ;;  %874 = vperm.xlu1 %2162, %v803_v18   ;;  %v2942_v49 = vpop.permute.xlu0 %409  ;;  %v813_v18 = vsel %vm589_vm10, 1, %v5861_v63 }
  0xf2   :  { %5891 = vst [vmem:[#allocation60_spill] sm:$0xff] %v2940_v8  ;;  %5892 = vst [vmem:[#allocation61_spill] sm:$0xff] %v2942_v49  ;;  %v5928_v8 = vld [vmem:[#allocation10_spill] sm:$0xff] }
  0xf3   :  { %853 = vperm.xlu0 %2159, %v796_v10   ;;  %v798_v10 = vsel %vm574_vm11, 1, %v5861_v63 }
  0xf5   :  { %v2949_v14 = vpop.permute.xlu1 %418  ;;  %2163 = vset.pattern.permute.xlu1 %v5894_v9  ;;  %v2952_v1 = vpop.permute.xlu0 %415 }
  0xf6   :  { %5893 = vst [vmem:[#allocation62_spill] sm:$0xff] %v2949_v14  ;;  %5895 = vst [vmem:[#allocation63_spill] sm:$0xff] %v2952_v1  ;;  %1111 = vperm.xlu1 %2163, %v1074_v5   ;;  %v1091_v14 = vadd.s32 80, %v2370_v19  ;;  %v815_v5 = vsel %vm591_vm13, 1, %v5861_v63  ;;  %v1073_v19 = vadd.s32 80, %v2277_v4  ;;  %vm5930_vm13 = vcmp.ge.s32.totalorder %v2423_v28, 0 }
  0xf7   :  { %904 = vperm.xlu0 %2159, %v813_v18   ;;  %v2177_v18 = vld [vmem:[%s5559_s1] sm:$0xff]  }
  0xf8   :  { %1802 = vmatpush1.bf16.msra.mxu0 %v2177_v18  ;;  %2140 = vmatpush1.bf16.msra.mxu1 %v2177_v18  ;;  %v2179_v18 = vld [vmem:[%s5559_s1 + $0x10] sm:$0xff]  }
  0xf9   :  { %v2959_v0 = vpop.permute.xlu1 %424  ;;  %v2961_v29 = vpop.permute.xlu0 %421  ;;  %1803 = vmatprep.subr.bf16.mxu0 %v5861_v63  ;;  %2132 = vmatprep.subr.bf16.mxu1 %v5861_v63 }
  0xfa   :  { %5897 = vst [vmem:[#allocation64_spill] sm:$0xff] %v2959_v0  ;;  %5898 = vst [vmem:[#allocation65_spill] sm:$0xff] %v2961_v29  ;;  %1159 = vperm.xlu1 %2163, %v1090_v46   ;;  %v2178_v46 = vld [vmem:[%s5559_s1 + $0x8] sm:$0xff]  }
  0xfb   :  { %859 = vperm.xlu0 %2159, %v798_v10   ;;  %v805_v10 = vsel %vm581_vm1, 1, %v5861_v63  ;;  %vm5936_vm1 = vcmp.ge.s32.totalorder %v2334_v13, 0  ;;  %v45_v13 = vlaneseq }
  0xfc   :  { %1804 = vmatpush1.bf16.msra.mxu0 %v2178_v46  ;;  %2141 = vmatpush1.bf16.msra.mxu1 %v2178_v46 }
  0xfd   :  { %v2967_v20 = vpop.permute.xlu1 %430  ;;  %v2969_v16 = vpop.permute.xlu0 %427  ;;  %1805 = vmatprep.subr.bf16.mxu0 %v5861_v63  ;;  %2133 = vmatprep.subr.bf16.mxu1 %v5861_v63 }
  0xfe   :  { %5899 = vst [vmem:[#allocation66_spill] sm:$0xff] %v2967_v20  ;;  %5900 = vst [vmem:[#allocation67_spill] sm:$0xff] %v2969_v16  ;;  %1162 = vperm.xlu1 %2163, %v1091_v14   ;;  %v2180_v16 = vld [vmem:[%s5559_s1 + $0x18] sm:$0xff]  }
  0xff   :  { %910 = vperm.xlu0 %2159, %v815_v5  }
 0x100   :  { %1806 = vmatpush1.bf16.msra.mxu0 %v2179_v18  ;;  %2142 = vmatpush1.bf16.msra.mxu1 %v2179_v18  ;;  %v2181_v18 = vld [vmem:[%s5559_s1 + $0x20] sm:$0xff]  }
 0x101   :  { %1807 = vmatprep.subr.bf16.mxu0 %v5861_v63  ;;  %2134 = vmatprep.subr.bf16.mxu1 %v5861_v63 }
 0x102   :  { %v2978_v31 = vpop.permute.xlu1 %628  ;;  %1274 = vperm.xlu1 %2163, %v2480_v35   ;;  %v2985_v14 = vpop.permute.xlu0 %625 }
 0x103   :  { %2175 = vset.pattern.permute.xlu0 %v5894_v9 }
 0x104   :  { %1108 = vperm.xlu0 %2175, %v1073_v19   ;;  %1808 = vmatpush1.bf16.msra.mxu0 %v2180_v16 }
 0x105   :  { %1809 = vmatprep.subr.bf16.mxu0 %v5861_v63  ;;  %2143 = vmatpush1.bf16.msra.mxu1 %v2180_v16  ;;  %v2182_v16 = vld [vmem:[%s5559_s1 + $0x28] sm:$0xff]  }
 0x106   :  { %v2991_v4 = vpop.permute.xlu1 %631  ;;  %1322 = vperm.xlu1 %2163, %v2608_v51   ;;  %v2994_v35 = vpop.permute.xlu0 %634  ;;  %v1076_v51 = vadd.s32 80, %v2291_v6  ;;  %2135 = vmatprep.subr.bf16.mxu1 %v5861_v63 }
 0x108   :  { %1265 = vperm.xlu0 %2175, %v2467_v34   ;;  %v2186_v34 = vld [vmem:[%s5558_s0 + $0x18] sm:$0xff]  ;;  %1810 = vmatpush1.bf16.msra.mxu0 %v2181_v18 }
 0x109   :  { %v1075_v46 = vadd.s32 80, %v2186_v34  ;;  %1811 = vmatprep.subr.bf16.mxu0 %v5861_v63  ;;  %2144 = vmatpush1.bf16.msra.mxu1 %v2181_v18  ;;  %v2183_v18 = vld [vmem:[%s5559_s1 + $0x30] sm:$0xff]  }
 0x10a   :  { %v2999_v5 = vpop.permute.xlu1 %637  ;;  %2164 = vset.pattern.permute.xlu1 %v5890_v27  ;;  %v3005_v19 = vpop.permute.xlu0 %640  ;;  %2136 = vmatprep.subr.bf16.mxu1 %v5861_v63 }
 0x10b   :  { %5902 = vst [vmem:[#allocation68_spill] sm:$0xff] %v2999_v5  ;;  %880 = vperm.xlu1 %2164, %v805_v10   ;;  %v6039_v5 = vmov 0 }
 0x10c   :  { %1313 = vperm.xlu0 %2175, %v2595_v50   ;;  %v1092_v50 = vadd.s32 80, %v2387_v22  ;;  %1812 = vmatpush1.bf16.msra.mxu0 %v2182_v16 }
 0x10d   :  { %1813 = vmatprep.subr.bf16.mxu0 %v5861_v63  ;;  %2145 = vmatpush1.bf16.msra.mxu1 %v2182_v16  ;;  %v807_v16 = vsel %vm583_vm2, 1, %v5861_v63 }
 0x10e   :  { %v3013_v20 = vpop.permute.xlu1 %643  ;;  %v3019_v6 = vpop.permute.xlu0 %646  ;;  %2137 = vmatprep.subr.bf16.mxu1 %v5861_v63 }
 0x10f   :  { %5903 = vst [vmem:[#allocation69_spill] sm:$0xff] %v3013_v20  ;;  %5904 = vst [vmem:[#allocation70_spill] sm:$0xff] %v3019_v6  ;;  %2165 = vset.pattern.permute.xlu1 %v5894_v9 }
 0x110   :  { %1117 = vperm.xlu1 %2165, %v1076_v51   ;;  %1114 = vperm.xlu0 %2175, %v1075_v46   ;;  %v1093_v51 = vadd.s32 80, %v2382_v21  ;;  %v2187_v21 = vld [vmem:[%s5558_s0 + $0x28] sm:$0xff] }
 0x111   :  { %1814 = vmatpush1.bf16.msra.mxu0 %v2183_v18  ;;  %2146 = vmatpush1.bf16.msra.mxu1 %v2183_v18 }
 0x112   :  { %v3024_v10 = vpop.permute.xlu1 %649  ;;  %v3029_v34 = vpop.permute.xlu0 %652  ;;  %1815 = vmatprep.subr.bf16.mxu0 %v5861_v63  ;;  %2138 = vmatprep.subr.bf16.mxu1 %v5861_v63 }
 0x113   :  { %5905 = vst [vmem:[#allocation71_spill] sm:$0xff] %v3024_v10  ;;  %5906 = vst [vmem:[#allocation72_spill] sm:$0xff] %v3029_v34  ;;  %v2200_v10 = vld [vmem:[%s5558_s0 + $0x50] sm:$0xff] }
 0x114   :  { %1165 = vperm.xlu1 %2165, %v1092_v50   ;;  %1271 = vperm.xlu0 %2175, %v2483_v36   ;;  %v1077_v36 = vadd.s32 80, %v2187_v21 }
 0x116   :  { %v3035_v22 = vpop.permute.xlu1 %655  ;;  %v3040_v46 = vpop.permute.xlu0 %658 }
 0x117   :  { %5907 = vst [vmem:[#allocation73_spill] sm:$0xff] %v3035_v22  ;;  %5908 = vst [vmem:[#allocation74_spill] sm:$0xff] %v3040_v46 }
 0x118   :  { %1168 = vperm.xlu1 %2165, %v1093_v51   ;;  %1319 = vperm.xlu0 %2175, %v2611_v52  }
 0x11a   :  { %v3048_v50 = vpop.permute.xlu1 %661  ;;  %v3053_v0 = vpop.permute.xlu0 %664 }
 0x11b   :  { %5909 = vst [vmem:[#allocation75_spill] sm:$0xff] %v3048_v50  ;;  %5910 = vst [vmem:[#allocation76_spill] sm:$0xff] %v3053_v0 }
 0x11c   :  { %1280 = vperm.xlu1 %2165, %v2496_v37   ;;  %1120 = vperm.xlu0 %2175, %v1077_v36   ;;  %v1079_v36 = vadd.s32 80, %v2188_v23 }
 0x11e   :  { %v3059_v52 = vpop.permute.xlu1 %667  ;;  %v3061_v51 = vpop.permute.xlu0 %670 }
 0x11f   :  { %5911 = vst [vmem:[#allocation77_spill] sm:$0xff] %v3059_v52  ;;  %5912 = vst [vmem:[#allocation78_spill] sm:$0xff] %v3061_v51  ;;  %v2184_v51 = vld [vmem:[%s5559_s1 + $0x38] sm:$0xff]  }
 0x120   :  { %1328 = vperm.xlu1 %2165, %v2624_v53   ;;  %1277 = vperm.xlu0 %2175, %v2499_v38   ;;  %v2189_v38 = vld [vmem:[%s5558_s0 + $0x30] sm:$0xff] }
 0x121   :  { %v1078_v53 = vadd.s32 80, %v2189_v38  ;;  %1816 = vmatpush1.bf16.msra.mxu0 %v2184_v51  ;;  %2147 = vmatpush1.bf16.msra.mxu1 %v2184_v51 }
 0x122   :  { %v3068_v37 = vpop.permute.xlu1 %673  ;;  %v3071_v21 = vpop.permute.xlu0 %676  ;;  %1817 = vmatprep.subr.bf16.mxu0 %v5861_v63  ;;  %2139 = vmatprep.subr.bf16.mxu1 %v5861_v63 }
 0x124   :  { %2166 = vset.pattern.permute.xlu1 %v5890_v27  ;;  %1325 = vperm.xlu0 %2175, %v2627_v54  }
 0x125   :  { %886 = vperm.xlu1 %2166, %v807_v16   ;;  %v2190_v16 = vld [vmem:[%s5558_s0 + $0xb0] sm:$0xff] }
 0x126   :  { %v3078_v18 = vpop.permute.xlu1 %679  ;;  %v3086_v52 = vpop.permute.xlu0 %682  ;;  %v1094_v23 = vadd.s32 80, %v2190_v16  ;;  %v2185_v16 = vld [vmem:[%s5559_s1 + $0x40] sm:$0xff]  }
 0x127   :  { %1818 = vmatpush1.bf16.msra.mxu0 %v2185_v16  ;;  %2148 = vmatpush1.bf16.msra.mxu1 %v2185_v16  ;;  %v2194_v16 = vld [vmem:[%s5558_s0 + $0x58] sm:$0xff] }
 0x128   :  { %1126 = vperm.xlu0 %2175, %v1079_v36   ;;  %v2191_v36 = vld [vmem:[%s5558_s0 + $0xb8] sm:$0xff]  ;;  %vm539_vm4 = vcmp.lt.s32.totalorder %v2194_v16, 16 }
 0x129   :  { %2167 = vset.pattern.permute.xlu1 %v5894_v9  ;;  %vm571_vm11 = vmand %vm5927_vm8, %vm539_vm4 }
 0x12a   :  { %v3089_v54 = vpop.permute.xlu1 %685  ;;  %1123 = vperm.xlu1 %2167, %v1078_v53   ;;  %v3095_v38 = vpop.permute.xlu0 %688  ;;  %v1095_v53 = vadd.s32 80, %v2191_v36  ;;  %v795_v11 = vsel %vm571_vm11, 1, %v5861_v63 }
 0x12c   :  { %1283 = vperm.xlu0 %2175, %v2515_v40   ;;  %v2192_v40 = vld [vmem:[%s5558_s0 + $0x48] sm:$0xff] }
 0x12d   :  { %v1081_v29 = vadd.s32 80, %v2192_v40  ;;  %v1083_v40 = vadd.s32 80, %v2194_v16 }
 0x12e   :  { %v3099_v51 = vpop.permute.xlu1 %691  ;;  %1171 = vperm.xlu1 %2167, %v1094_v23   ;;  %v3104_v0 = vpop.permute.xlu0 %694 }
 0x12f   :  { %5914 = vst [vmem:[#allocation79_spill] sm:$0xff] %v3099_v51  ;;  %5915 = vst [vmem:[#allocation80_spill] sm:$0xff] %v3104_v0 }
 0x130   :  { %1331 = vperm.xlu0 %2175, %v2643_v56   ;;  %v2193_v56 = vld [vmem:[%s5558_s0 + $0xc8] sm:$0xff] }
 0x131   :  { %vm553_vm0 = vcmp.lt.s32.totalorder %v2193_v56, 16 }
 0x132   :  { %v3113_v50 = vpop.permute.xlu1 %697  ;;  %1174 = vperm.xlu1 %2167, %v1095_v53   ;;  %v3115_v23 = vpop.permute.xlu0 %700  ;;  %vm585_vm10 = vmand %vm5919_vm14, %vm553_vm0 }
 0x133   :  { %5916 = vst [vmem:[#allocation81_spill] sm:$0xff] %v3113_v50  ;;  %5917 = vst [vmem:[#allocation82_spill] sm:$0xff] %v3115_v23 }
 0x134   :  { %1132 = vperm.xlu0 %2175, %v1081_v29  }
 0x136   :  { %v3117_v36 = vpop.permute.xlu1 %703  ;;  %1286 = vperm.xlu1 %2167, %v2512_v39   ;;  %v3123_v46 = vpop.permute.xlu0 %706  ;;  %v809_v39 = vsel %vm585_vm10, 1, %v5861_v63 }
 0x137   :  { %5918 = vst [vmem:[#allocation83_spill] sm:$0xff] %v3117_v36 }
 0x138   :  { %1289 = vperm.xlu0 %2175, %v2531_v42   ;;  %v2195_v42 = vld [vmem:[%s5558_s0 + $0x40] sm:$0xff] }
 0x13a   :  { %v3128_v53 = vpop.permute.xlu1 %709  ;;  %1334 = vperm.xlu1 %2167, %v2640_v55   ;;  %v3131_v29 = vpop.permute.xlu0 %712  ;;  %v1080_v55 = vadd.s32 80, %v2195_v42  ;;  %v2197_v42 = vld [vmem:[%s5558_s0 + $0x68] sm:$0xff] }
 0x13b   :  { %5920 = vst [vmem:[#allocation84_spill] sm:$0xff] %v3128_v53  ;;  %vm541_vm15 = vcmp.lt.s32.totalorder %v2197_v42, 16 }
 0x13c   :  { %1337 = vperm.xlu0 %2175, %v2659_v58   ;;  %vm573_vm3 = vmand %vm5936_vm1, %vm541_vm15 }
 0x13e   :  { %v3138_v36 = vpop.permute.xlu1 %715  ;;  %2168 = vset.pattern.permute.xlu1 %v5890_v27  ;;  %v3141_v25 = vpop.permute.xlu0 %718 }
 0x13f   :  { %5921 = vst [vmem:[#allocation85_spill] sm:$0xff] %v3138_v36  ;;  %892 = vperm.xlu1 %2168, %v809_v39   ;;  %v2196_v36 = vld [vmem:[%s5558_s0 + $0xc0] sm:$0xff] }
 0x140   :  { %1138 = vperm.xlu0 %2175, %v1083_v40   ;;  %v1096_v1 = vadd.s32 80, %v2196_v36  ;;  %v1097_v40 = vadd.s32 80, %v2193_v56 }
 0x142   :  { %v3146_v53 = vpop.permute.xlu1 %817  ;;  %v3148_v58 = vpop.permute.xlu0 %820 }
 0x143   :  { %2169 = vset.pattern.permute.xlu1 %v5894_v9 }
 0x144   :  { %1129 = vperm.xlu1 %2169, %v1080_v55   ;;  %1295 = vperm.xlu0 %2175, %v2547_v44   ;;  %v1085_v55 = vadd.s32 80, %v2197_v42 }
 0x146   :  { %v3155_v39 = vpop.permute.xlu1 %823  ;;  %v3157_v22 = vpop.permute.xlu0 %826 }
 0x148   :  { %1177 = vperm.xlu1 %2169, %v1096_v1   ;;  %1343 = vperm.xlu0 %2175, %v2675_v60   ;;  %v5924_v1 = vld [vmem:[#allocation7_spill] sm:$0xff] }
 0x14a   :  { %v3163_v23 = vpop.permute.xlu1 %829  ;;  %v3165_v50 = vpop.permute.xlu0 %832 }
 0x14c   :  { %1180 = vperm.xlu1 %2169, %v1097_v40   ;;  %1144 = vperm.xlu0 %2175, %v1085_v55   ;;  %v2198_v40 = vld [vmem:[%s5558_s0 + $0xd0] sm:$0xff]  ;;  %v5929_v55 = vld [vmem:[#allocation13_spill] sm:$0xff] }
 0x14d   :  { %vm554_vm6 = vcmp.lt.s32.totalorder %v2198_v40, 16 }
 0x14e   :  { %v3167_v44 = vpop.permute.xlu1 %835  ;;  %v3169_v36 = vpop.permute.xlu0 %838  ;;  %vm586_vm5 = vmand %vm5930_vm13, %vm554_vm6  ;;  %vm5948_vm13 = vcmp.ge.s32.totalorder %v2346_v15, 0 }
 0x14f   :  { %5922 = vst [vmem:[#allocation86_spill] sm:$0xff] %v3167_v44  ;;  %5923 = vst [vmem:[#allocation87_spill] sm:$0xff] %v3169_v36 }
 0x150   :  { %1292 = vperm.xlu1 %2169, %v2528_v41   ;;  %1301 = vperm.xlu0 %2175, %v5924_v1   ;;  %v3187_v41 = vld [vmem:[%s5558_s0 + $0x78] sm:$0xff] }
 0x151   :  { %v1087_v16 = vadd.s32 80, %v3187_v41  ;;  %vm543_vm8 = vcmp.lt.s32.totalorder %v3187_v41, 16 }
 0x152   :  { %v3173_v60 = vpop.permute.xlu1 %841  ;;  %v3175_v56 = vpop.permute.xlu0 %844 }
 0x153   :  { %5925 = vst [vmem:[#allocation7_spill] sm:$0xff] %v3173_v60  ;;  %5926 = vst [vmem:[#allocation88_spill] sm:$0xff] %v3175_v56  ;;  %v5931_v56 = vld [vmem:[#allocation9_spill] sm:$0xff]  ;;  %v1082_v60 = vadd.s32 80, %v2200_v10 }
 0x154   :  { %1340 = vperm.xlu1 %2169, %v5928_v8   ;;  %1349 = vperm.xlu0 %2175, %v5929_v55   ;;  %v810_v8 = vsel %vm586_vm5, 1, %v5861_v63  ;;  %vm575_vm5 = vmand %vm5948_vm13, %vm543_vm8  ;;  %vm5975_vm13 = vcmp.eq.s32.totalorder %v3146_v53, 1 }
 0x156   :  { %v3190_v1 = vpop.permute.xlu1 %865  ;;  %v3193_v34 = vpop.permute.xlu0 %868 }
 0x158   :  { %2170 = vset.pattern.permute.xlu1 %v5890_v27  ;;  %1150 = vperm.xlu0 %2175, %v1087_v16   ;;  %v5932_v16 = vld [vmem:[#allocation15_spill] sm:$0xff] }
 0x159   :  { %850 = vperm.xlu1 %2170, %v795_v11   ;;  %v1098_v11 = vadd.s32 80, %v2198_v40 }
 0x15a   :  { %v3199_v55 = vpop.permute.xlu0 %871 }
 0x15b   :  { %v3201_v49 = vpop.permute.xlu1 %1105 }
 0x15c   :  { %1307 = vperm.xlu0 %2175, %v5931_v56   ;;  %v2201_v56 = vld [vmem:[%s5558_s0 + $0xd8] sm:$0xff] }
 0x15d   :  { %895 = vperm.xlu1 %2170, %v810_v8   ;;  %v1099_v10 = vadd.s32 80, %v2201_v56  ;;  %v2202_v56 = vld [vmem:[%s5558_s0 + $0xe0] sm:$0xff] }
 0x15e   :  { %v3209_v0 = vpop.permute.xlu0 %877  ;;  %vm556_vm9 = vcmp.lt.s32.totalorder %v2202_v56, 16  ;;  %v1100_v6 = vadd.s32 80, %v2202_v56 }
 0x15f   :  { %v3207_v28 = vpop.permute.xlu1 %1153  ;;  %vm588_vm2 = vmand %vm76_vm12, %vm556_vm9 }
 0x160   :  { %1355 = vperm.xlu0 %2175, %v5932_v16   ;;  %v812_v42 = vsel %vm588_vm2, 1, %v5861_v63 }
 0x161   :  { %2171 = vset.pattern.permute.xlu1 %v5894_v9 }
 0x162   :  { %1135 = vperm.xlu1 %2171, %v1082_v60   ;;  %v3215_v12 = vpop.permute.xlu0 %883 }
 0x163   :  { %v3213_v51 = vpop.permute.xlu1 %1156  ;;  %5933 = vst [vmem:[#allocation10_spill] sm:$0xff] %v3215_v12  ;;  %v2203_v12 = vld [vmem:[%s5558_s0 + $0x60] sm:$0xff] }
 0x164   :  { %v1084_v57 = vadd.s32 80, %v2203_v12  ;;  %v5940_v12 = vmov 0 }
 0x166   :  { %1183 = vperm.xlu1 %2171, %v1098_v11   ;;  %v3224_v16 = vpop.permute.xlu0 %889  ;;  %v5938_v11 = vld [vmem:[#allocation11_spill] sm:$0xff] }
 0x167   :  { %v3220_v8 = vpop.permute.xlu1 %1268  ;;  %5934 = vst [vmem:[#allocation13_spill] sm:$0xff] %v3224_v16 }
 0x16a   :  { %1186 = vperm.xlu1 %2171, %v1099_v10   ;;  %v3231_v40 = vpop.permute.xlu0 %847  ;;  %v797_v10 = vsel %vm573_vm3, 1, %v5861_v63 }
 0x16b   :  { %v3222_v20 = vpop.permute.xlu1 %1316  ;;  %5937 = vst [vmem:[#allocation9_spill] sm:$0xff] %v3231_v40  ;;  %v3246_v40 = vand.u32 127, %v45_v13 }
 0x16d   :  { %vm774_vm0 = vcmp.eq.s32.totalorder %v3246_v40, %v3123_v46  ;;  %vm778_vm6 = vcmp.eq.s32.totalorder %v3246_v40, %v3131_v29  ;;  %vm782_vm2 = vcmp.eq.s32.totalorder %v3246_v40, %v3141_v25 }
 0x16e   :  { %1298 = vperm.xlu1 %2171, %v5935_v45   ;;  %v899_v45 = vpop.permute.xlu0 %898 }
 0x16f   :  { %vm939_vm12 = vcmp.eq.s32.totalorder %v899_v45, 1  ;;  %v5943_v45 = vmov 0 }
 0x170   :  { %v3227_v60 = vpop.permute.xlu1 %874  ;;  %vm3265_vm10 = vmand %vm774_vm0, %vm939_vm12 }
 0x171   :  { %v5941_v12 = vsel %vm3265_vm10, 4294967295, %v5940_v12  ;;  %vm5985_vm10 = vcmp.eq.s32.totalorder %v2814_v48, 1 }
 0x172   :  { %1346 = vperm.xlu1 %2171, %v5938_v11   ;;  %v3253_v30 = vpop.permute.xlu0 %853  ;;  %5942 = vst [vmem:[#allocation5_spill] sm:$0xff] %v5941_v12  ;;  %v5947_v12 = vld [vmem:[#allocation6_spill] sm:$0xff] }
 0x173   :  { %5939 = vst [vmem:[#allocation15_spill] sm:$0xff] %v3253_v30 }
 0x175   :  { %v3238_v16 = vpop.permute.xlu1 %1111 }
 0x176   :  { %2172 = vset.pattern.permute.xlu1 %v5890_v27 }
 0x177   :  { %856 = vperm.xlu1 %2172, %v797_v10   ;;  %v3257_v10 = vadd.s32 128, %v3246_v40 }
 0x179   :  { %v3244_v11 = vpop.permute.xlu1 %1159  ;;  %vm775_vm14 = vcmp.eq.s32.totalorder %v3257_v10, %v3123_v46  ;;  %vm779_vm15 = vcmp.eq.s32.totalorder %v3257_v10, %v3131_v29  ;;  %v5958_v29 = vmov 0 }
 0x17a   :  { %vm3269_vm4 = vmand %vm775_vm14, %vm939_vm12  ;;  %vm783_vm12 = vcmp.eq.s32.totalorder %v3257_v10, %v3141_v25  ;;  %v5967_v25 = vld [vmem:[#allocation32_spill] sm:$0xff] }
 0x17b   :  { %901 = vperm.xlu1 %2172, %v812_v42   ;;  %v5944_v45 = vsel %vm3269_vm4, 4294967295, %v5943_v45  ;;  %v905_v42 = vpop.permute.xlu0 %904 }
 0x17c   :  { %5945 = vst [vmem:[#allocation11_spill] sm:$0xff] %v5944_v45  ;;  %vm941_vm11 = vcmp.eq.s32.totalorder %v905_v42, 1  ;;  %v5956_v42 = vld [vmem:[#allocation12_spill] sm:$0xff] }
 0x17d   :  { %v3251_v36 = vpop.permute.xlu1 %1162  ;;  %vm3290_vm1 = vmand %vm778_vm6, %vm941_vm11  ;;  %vm449_vm6 = vcmp.eq.s32.totalorder %v2901_v3, 1 }
 0x17e   :  { %vm3294_vm3 = vmand %vm779_vm15, %vm941_vm11  ;;  %vm5687_vm11 = vcmp.eq.s32.totalorder %v2814_v48, 1 }
 0x17f   :  { %2173 = vset.pattern.permute.xlu1 %v5894_v9  ;;  %v3278_v44 = vpop.permute.xlu0 %859  ;;  %v6032_v9 = vmov 0 }
 0x180   :  { %1141 = vperm.xlu1 %2173, %v1084_v57   ;;  %v2204_v57 = vld [vmem:[%s5558_s0 + $0xe8] sm:$0xff]  ;;  %5946 = vst [vmem:[#allocation89_spill] sm:$0xff] %v3278_v44  ;;  %v5965_v44 = vld [vmem:[#allocation19_spill] sm:$0xff] }
 0x181   :  { %v3261_v13 = vpop.permute.xlu1 %1274  ;;  %v1101_v56 = vadd.s32 80, %v2204_v57  ;;  %v5952_v57 = vmov 0  ;;  %vm242_vm8 = vcmp.eq.s32.totalorder %v3246_v40, %v5965_v44  ;;  %vm243_vm15 = vcmp.eq.s32.totalorder %v3257_v10, %v5965_v44 }
 0x182   :  { %v5953_v57 = vsel %vm3294_vm3, 4294967295, %v5952_v57  ;;  %v5983_v44 = vmov 0  ;;  %vm3384_vm4 = vmand %vm243_vm15, %vm5985_vm10  ;;  %vm754_vm15 = vcmp.eq.s32.totalorder %v3246_v40, %v3071_v21  ;;  %vm753_vm10 = vcmp.eq.s32.totalorder %v3257_v10, %v3068_v37 }
 0x183   :  { %5954 = vst [vmem:[#allocation90_spill] sm:$0xff] %v5953_v57  ;;  %v5986_v57 = vmov 0 }
 0x184   :  { %1189 = vperm.xlu1 %2173, %v1100_v6   ;;  %v5949_v6 = vmov 0  ;;  %v5987_v57 = vsel %vm3384_vm4, 4294967295, %v5986_v57  ;;  %vm1235_vm4 = vcmp.eq.s32.totalorder %v3257_v10, %v3213_v51 }
 0x185   :  { %v3276_v30 = vpop.permute.xlu1 %1322  ;;  %v5950_v6 = vsel %vm3290_vm1, 4294967295, %v5949_v6 }
 0x186   :  { %5951 = vst [vmem:[#allocation6_spill] sm:$0xff] %v5950_v6  ;;  %v5976_v6 = vmov 0 }
 0x188   :  { %1192 = vperm.xlu1 %2173, %v1101_v56   ;;  %v799_v56 = vsel %vm575_vm5, 1, %v5861_v63  ;;  %vm720_vm5 = vcmp.eq.s32.totalorder %v3246_v40, %v2985_v14 }
 0x189   :  { %vm3357_vm7 = vmand %vm720_vm5, %vm5975_vm13  ;;  %vm755_vm13 = vcmp.eq.s32.totalorder %v3257_v10, %v3071_v21  ;;  %vm5982_vm5 = vcmp.eq.s32.totalorder %v3148_v58, 1  ;;  %v6003_v21 = vmov 0 }
 0x18a   :  { %v3280_v46 = vpop.permute.xlu1 %880  ;;  %v5977_v6 = vsel %vm3357_vm7, 4294967295, %v5976_v6 }
 0x18c   :  { %1304 = vperm.xlu1 %2173, %v5947_v12   ;;  %v911_v12 = vpop.permute.xlu0 %910 }
 0x18d   :  { %vm943_vm9 = vcmp.eq.s32.totalorder %v911_v12, 1 }
 0x18e   :  { %vm3309_vm0 = vmand %vm782_vm2, %vm943_vm9  ;;  %vm275_vm2 = vcmp.eq.s32.totalorder %v3257_v10, %v5967_v25 }
 0x18f   :  { %v3298_v41 = vpop.permute.xlu1 %1117  ;;  %v5959_v29 = vsel %vm3309_vm0, 4294967295, %v5958_v29  ;;  %vm3313_vm14 = vmand %vm783_vm12, %vm943_vm9  ;;  %vm274_vm9 = vcmp.eq.s32.totalorder %v3246_v40, %v5967_v25 }
 0x190   :  { %5955 = vst [vmem:[#allocation91_spill] sm:$0xff] %v3298_v41  ;;  %1352 = vperm.xlu1 %2173, %v5956_v42   ;;  %5960 = vst [vmem:[#allocation92_spill] sm:$0xff] %v5959_v29  ;;  %v5961_v42 = vmov 0  ;;  %v1109_v3 = vpop.permute.xlu0 %1108 }
 0x191   :  { %v5962_v42 = vsel %vm3313_vm14, 4294967295, %v5961_v42  ;;  %vm3334_vm12 = vmand %vm242_vm8, %vm5687_vm11  ;;  %vm721_vm8 = vcmp.eq.s32.totalorder %v3257_v10, %v2985_v14  ;;  %v5980_v14 = vmov 0 }
 0x192   :  { %5963 = vst [vmem:[#allocation93_spill] sm:$0xff] %v5962_v42  ;;  %vm3344_vm0 = vmand %vm274_vm9, %vm449_vm6  ;;  %v5971_v42 = vmov 0  ;;  %vm722_vm9 = vcmp.eq.s32.totalorder %v3246_v40, %v2978_v31 }
 0x193   :  { %v3302_v15 = vpop.permute.xlu1 %1165  ;;  %v5972_v42 = vsel %vm3344_vm0, 4294967295, %v5971_v42  ;;  %vm3348_vm14 = vmand %vm275_vm2, %vm449_vm6  ;;  %vm5978_vm2 = vcmp.eq.s32.totalorder %v2816_v62, 1  ;;  %vm6057_vm0 = vcmp.eq.s32.totalorder %v2903_v47, 1 }
 0x194   :  { %5957 = vst [vmem:[#allocation12_spill] sm:$0xff] %v3302_v15  ;;  %2174 = vset.pattern.permute.xlu1 %v5890_v27  ;;  %v5966_v27 = vld [vmem:[#allocation17_spill] sm:$0xff]  ;;  %vm3378_vm11 = vmand %vm722_vm9, %vm5982_vm5  ;;  %vm5991_vm5 = vcmp.eq.s32.totalorder %v3193_v34, 1  ;;  %vm6008_vm9 = vcmp.eq.s32.totalorder %v3222_v20, 1  ;;  %v6019_v20 = vmov 0 }
 0x195   :  { %862 = vperm.xlu1 %2174, %v799_v56   ;;  %v5968_v56 = vmov 0  ;;  %vm241_vm6 = vcmp.eq.s32.totalorder %v3257_v10, %v5966_v27  ;;  %vm5979_vm1 = vcmp.eq.s32.totalorder %v3246_v40, %v5966_v27  ;;  %v5984_v44 = vsel %vm3378_vm11, 4294967295, %v5983_v44  ;;  %vm3399_vm7 = vmand %vm755_vm13, %vm5991_vm5  ;;  %v5995_v15 = vld [vmem:[#allocation33_spill] sm:$0xff] }
 0x196   :  { %v5969_v56 = vsel %vm3334_vm12, 4294967295, %v5968_v56  ;;  %vm3370_vm3 = vmand %vm5979_vm1, %vm5978_vm2  ;;  %vm5988_vm1 = vcmp.eq.s32.totalorder %v3146_v53, 1  ;;  %v5989_v27 = vmov 0  ;;  %vm5999_vm13 = vcmp.eq.s32.totalorder %v2816_v62, 1  ;;  %v1266_v62 = vpop.permute.xlu0 %1265 }
 0x197   :  { %v3317_v12 = vpop.permute.xlu1 %1168  ;;  %v5981_v14 = vsel %vm3370_vm3, 4294967295, %v5980_v14  ;;  %vm3390_vm2 = vmand %vm721_vm8, %vm5988_vm1  ;;  %vm723_vm3 = vcmp.eq.s32.totalorder %v3257_v10, %v2978_v31  ;;  %vm5996_vm8 = vcmp.eq.s32.totalorder %v3148_v58, 1  ;;  %v5997_v31 = vmov 0 }
 0x198   :  { %5964 = vst [vmem:[#allocation94_spill] sm:$0xff] %v3317_v12  ;;  %v5990_v27 = vsel %vm3390_vm2, 4294967295, %v5989_v27  ;;  %vm3411_vm1 = vmand %vm723_vm3, %vm5996_vm8  ;;  %v6000_v53 = vmov 0  ;;  %vm6002_vm3 = vcmp.eq.s32.totalorder %v3193_v34, 1  ;;  %vm6005_vm2 = vcmp.eq.s32.totalorder %v3190_v1, 1  ;;  %v6022_v12 = vld [vmem:[#allocation34_spill] sm:$0xff] }
 0x199   :  { %v5998_v31 = vsel %vm3411_vm1, 4294967295, %v5997_v31  ;;  %vm3418_vm5 = vmand %vm241_vm6, %vm5999_vm13  ;;  %v6006_v58 = vmov 0  ;;  %v6009_v34 = vmov 0  ;;  %vm6014_vm12 = vcmp.eq.s32.totalorder %v2903_v47, 1 }
 0x19a   :  { %v6001_v53 = vsel %vm3418_vm5, 4294967295, %v6000_v53  ;;  %vm3429_vm8 = vmand %vm754_vm15, %vm6002_vm3  ;;  %vm1234_vm3 = vcmp.eq.s32.totalorder %v3246_v40, %v3213_v51  ;;  %vm6023_vm6 = vcmp.eq.s32.totalorder %v3157_v22, 1  ;;  %v1314_v45 = vpop.permute.xlu0 %1313  ;;  %v6066_v47 = vmov 0 }
 0x19b   :  { %v3340_v29 = vpop.permute.xlu1 %1280  ;;  %v6004_v21 = vsel %vm3429_vm8, 4294967295, %v6003_v21  ;;  %vm3441_vm5 = vmand %vm753_vm10, %vm6005_vm2  ;;  %vm759_vm2 = vcmp.eq.s32.totalorder %v3257_v10, %v3086_v52  ;;  %vm6015_vm10 = vcmp.eq.s32.totalorder %v3257_v10, %v5995_v15 }
 0x19c   :  { %5970 = vst [vmem:[#allocation19_spill] sm:$0xff] %v3340_v29  ;;  %v6007_v58 = vsel %vm3441_vm5, 4294967295, %v6006_v58  ;;  %vm3461_vm5 = vmand %vm1234_vm3, %vm6008_vm9  ;;  %vm279_vm3 = vcmp.eq.s32.totalorder %v3257_v10, %v6022_v12  ;;  %v6036_v29 = vmov 0 }
 0x19d   :  { %v6010_v34 = vsel %vm3461_vm5, 4294967295, %v6009_v34  ;;  %vm6011_vm15 = vmmov %vm6008_vm9  ;;  %vm1361_vm9 = vcmp.eq.s32.totalorder %v3220_v8, 1  ;;  %v6137_v8 = vmov 0 }
 0x19e   :  { %vm3467_vm11 = vmand %vm1235_vm4, %vm6011_vm15  ;;  %vm6018_vm4 = vcmp.eq.s32.totalorder %v3227_v60, 1  ;;  %v1115_v25 = vpop.permute.xlu0 %1114 }
 0x19f   :  { %v3403_v48 = vpop.permute.xlu1 %1328  ;;  %vm3478_vm1 = vmand %vm6015_vm10, %vm6014_vm12  ;;  %vm6024_vm12 = vcmp.eq.s32.totalorder %v3257_v10, %v2994_v35 }
 0x1a0   :  { %5994 = vst [vmem:[#allocation17_spill] sm:$0xff] %v3403_v48  ;;  %v6017_v33 = vsel %vm3478_vm1, 4294967295, %v6016_v33  ;;  %vm3485_vm15 = vmand %vm759_vm2, %vm6018_vm4  ;;  %v6025_v48 = vmov 0  ;;  %vm6027_vm4 = vcmp.eq.s32.totalorder %v3246_v40, %v1109_v3  ;;  %vm6034_vm2 = vcmp.eq.s32.totalorder %v3157_v22, 1 }
 0x1a1   :  { %v6020_v20 = vsel %vm3485_vm15, 4294967295, %v6019_v20  ;;  %vm3498_vm10 = vmand %vm6024_vm12, %vm6023_vm6  ;;  %vm6031_vm6 = vcmp.eq.s32.totalorder %v2909_v24, 1  ;;  %vm6041_vm15 = vcmp.eq.s32.totalorder %v3257_v10, %v1109_v3  ;;  %v6042_v22 = vmov 0 }
 0x1a2   :  { %v6026_v48 = vsel %vm3498_vm10, 4294967295, %v6025_v48  ;;  %vm3508_vm13 = vmand %vm6027_vm4, %vm1361_vm9  ;;  %vm752_vm10 = vcmp.eq.s32.totalorder %v3246_v40, %v3068_v37  ;;  %vm6035_vm4 = vcmp.eq.s32.totalorder %v3246_v40, %v2994_v35  ;;  %v6045_v35 = vmov 0  ;;  %v1272_v51 = vpop.permute.xlu0 %1271 }
 0x1a3   :  { %vm3516_vm12 = vmand %vm279_vm3, %vm6031_vm6  ;;  %v6048_v37 = vmov 0  ;;  %v6079_v3 = vmov 0 }
 0x1a4   :  { %v3489_v41 = vpop.permute.xlu1 %886  ;;  %v6033_v9 = vsel %vm3516_vm12, 4294967295, %v6032_v9  ;;  %vm3527_vm8 = vmand %vm6035_vm4, %vm6034_vm2  ;;  %vm6044_vm4 = vcmp.eq.s32.totalorder %v2826_v59, 1 }
 0x1a5   :  { %6021 = vst [vmem:[#allocation32_spill] sm:$0xff] %v3489_v41  ;;  %v6030_v41 = vld [vmem:[#allocation18_spill] sm:$0xff]  ;;  %v6037_v29 = vsel %vm3527_vm8, 4294967295, %v6036_v29  ;;  %vm6038_vm3 = vmor %vm3348_vm14, %vm3399_vm7  ;;  %vm6047_vm7 = vcmp.eq.s32.totalorder %v3190_v1, 1  ;;  %v6052_v1 = vmov 0 }
 0x1a6   :  { %vm247_vm5 = vcmp.eq.s32.totalorder %v3257_v10, %v6030_v41  ;;  %vm3538_vm6 = vmor %vm6038_vm3, %vm3467_vm11  ;;  %vm246_vm2 = vcmp.eq.s32.totalorder %v3246_v40, %v6030_v41  ;;  %vm6050_vm11 = vnez %v5977_v6  ;;  %vm1200_vm3 = vcmp.eq.s32.totalorder %v3246_v40, %v3201_v49  ;;  %v6074_v6 = vld [vmem:[#allocation35_spill] sm:$0xff] }
 0x1a7   :  { %v6040_v5 = vsel %vm3538_vm6, 4294967295, %v6039_v5  ;;  %vm3544_vm12 = vmand %vm6041_vm15, %vm1361_vm9  ;;  %vm6051_vm9 = vnez %v5981_v14  ;;  %vm1201_vm15 = vcmp.eq.s32.totalorder %v3257_v10, %v3201_v49  ;;  %v6058_v41 = vmov 0 }
 0x1a8   :  { %v6043_v22 = vsel %vm3544_vm12, 4294967295, %v6042_v22  ;;  %vm3552_vm8 = vmand %vm247_vm5, %vm6044_vm4  ;;  %vm272_vm5 = vcmp.eq.s32.totalorder %v3246_v40, %v5995_v15  ;;  %vm6056_vm12 = vcmp.eq.s32.totalorder %v1266_v62, 1  ;;  %v6070_v49 = vmov 0 }
 0x1a9   :  { %v6046_v35 = vsel %vm3552_vm8, 4294967295, %v6045_v35  ;;  %vm3558_vm14 = vmand %vm752_vm10, %vm6047_vm7  ;;  %v3590_v59 = vpop.permute.xlu1 %1123  ;;  %vm6062_vm10 = vnez %v6001_v53  ;;  %v6072_v15 = vmov 0  ;;  %v6101_v53 = vld [vmem:[#allocation16_spill] sm:$0xff] }
 0x1aa   :  { %v6049_v37 = vsel %vm3558_vm14, 4294967295, %v6048_v37  ;;  %vm3572_vm6 = vmand %vm246_vm2, %vm6044_vm4  ;;  %vm6061_vm14 = vnez %v5990_v27  ;;  %v6091_v27 = vmov 0 }
 0x1ab   :  { %v6053_v1 = vsel %vm3572_vm6, 4294967295, %v6052_v1  ;;  %vm1392_vm8 = vmand %vm1200_vm3, %vm6056_vm12 }
 0x1ac   :  { %vm3585_vm1 = vmand %vm272_vm5, %vm6057_vm0  ;;  %vm6063_vm0 = vnez %v5969_v56  ;;  %v6076_v56 = vmov 0 }
 0x1ad   :  { %v6059_v41 = vsel %vm3585_vm1, 4294967295, %v6058_v41  ;;  %vm6060_vm2 = vmmov %vm6056_vm12  ;;  %vm6064_vm12 = vnez %v5984_v44  ;;  %v3648_v14 = vpop.permute.xlu1 %1171  ;;  %v6206_v44 = vld [vmem:[#allocation37_spill] sm:$0xff] }
 0x1ae   :  { %vm1393_vm4 = vmand %vm1201_vm15, %vm6060_vm2 }
 0x1af   :  { %vm1009_vm7 = vmor %vm6062_vm10, %vm6061_vm14  ;;  %vm1232_vm14 = vcmp.eq.s32.totalorder %v3246_v40, %v3207_v28  ;;  %vm6089_vm10 = vcmp.eq.s32.totalorder %v1314_v45, 1 }
 0x1b0   :  { %vm6065_vm3 = vmor %vm6063_vm0, %vm6064_vm12  ;;  %vm1239_vm0 = vcmp.eq.s32.totalorder %v3257_v10, %v3251_v36 }
 0x1b1   :  { %vm3605_vm5 = vmor %vm6065_vm3, %vm3508_vm13  ;;  %vm757_vm13 = vcmp.eq.s32.totalorder %v3257_v10, %v3078_v18 }
 0x1b2   :  { %v6067_v47 = vsel %vm3605_vm5, 4294967295, %v6066_v47  ;;  %vm6068_vm15 = vmmov %vm6050_vm11 }
 0x1b3   :  { %vm6069_vm2 = vmor %vm6051_vm9, %vm6068_vm15  ;;  %vm6075_vm9 = vcmp.eq.s32.totalorder %v3199_v55, 1  ;;  %vm1233_vm15 = vcmp.eq.s32.totalorder %v3257_v10, %v3207_v28  ;;  %v6094_v28 = vmov 0 }
 0x1b4   :  { %vm3614_vm11 = vmor %vm6069_vm2, %vm1392_vm8  ;;  %vm277_vm8 = vcmp.eq.s32.totalorder %v3257_v10, %v6074_v6  ;;  %vm6078_vm2 = vcmp.eq.s32.totalorder %v3276_v30, 1 }
 0x1b5   :  { %v6071_v49 = vsel %vm3614_vm11, 4294967295, %v6070_v49  ;;  %vm3624_vm12 = vmor %vm1009_vm7, %vm1393_vm4  ;;  %vm6093_vm7 = vcmp.eq.s32.totalorder %v3155_v39, 1 }
 0x1b6   :  { %v6073_v15 = vsel %vm3624_vm12, 4294967295, %v6072_v15  ;;  %vm3632_vm3 = vmand %vm757_vm13, %vm6075_vm9  ;;  %vm725_vm9 = vcmp.eq.s32.totalorder %v3257_v10, %v2991_v4  ;;  %vm6090_vm13 = vcmp.eq.s32.totalorder %v2911_v7, 1  ;;  %vm758_vm12 = vcmp.eq.s32.totalorder %v3246_v40, %v3086_v52 }
 0x1b7   :  { %v6077_v56 = vsel %vm3632_vm3, 4294967295, %v6076_v56  ;;  %vm3640_vm6 = vmand %vm1239_vm0, %vm6078_vm2  ;;  %vm6083_vm0 = vnez %v6010_v34  ;;  %vm6084_vm2 = vnez %v5972_v42  ;;  %v6105_v52 = vmov 0  ;;  %v6208_v42 = vld [vmem:[#allocation21_spill] sm:$0xff] }
 0x1b8   :  { %v6080_v3 = vsel %vm3640_vm6, 4294967295, %v6079_v3  ;;  %vm6085_vm6 = vnez %v6004_v21  ;;  %vm1425_vm11 = vmand %vm1233_vm15, %vm6089_vm10  ;;  %v2235_v21 = vmov 0.0  }
 0x1b9   :  { %vm6086_vm3 = vmor %vm6084_vm2, %vm6085_vm6  ;;  %vm6104_vm2 = vcmp.eq.s32.totalorder %v3227_v60, 1  ;;  %v6112_v60 = vmov 0 }
 0x1ba   :  { %vm3662_vm5 = vmor %vm6086_vm3, %vm6083_vm0  ;;  %vm6110_vm3 = vnez %v6073_v15  ;;  %v6191_v15 = vmov 0 }
 0x1bb   :  { %vm3669_vm1 = vmand %vm277_vm8, %vm6090_vm13  ;;  %vm245_vm8 = vcmp.eq.s32.totalorder %v3257_v10, %v6101_v53  ;;  %v2011_v62 = vsel %vm6110_vm3, 1.0, %v2235_v21  ;;  %vm6111_vm13 = vcmp.eq.s32.totalorder %v2828_v61, 1  ;;  %vm6117_vm3 = vnez %v5987_v57 }
 0x1bc   :  { %v6092_v27 = vsel %vm3669_vm1, 4294967295, %v6091_v27  ;;  %vm3677_vm4 = vmand %vm725_vm9, %vm6093_vm7  ;;  %vm278_vm9 = vcmp.eq.s32.totalorder %v3246_v40, %v6022_v12 }
 0x1bd   :  { %v6095_v28 = vsel %vm3677_vm4, 4294967295, %v6094_v28  ;;  %vm6098_vm15 = vmmov %vm6089_vm10  ;;  %vm6107_vm10 = vnez %v6017_v33 }
 0x1be   :  { %vm3686_vm0 = vmand %vm1232_vm14, %vm6098_vm15  ;;  %vm6108_vm14 = vnez %v6007_v58  ;;  %v6122_v58 = vmov 0 }
 0x1bf   :  { %vm3698_vm4 = vmand %vm758_vm12, %vm6104_vm2  ;;  %vm724_vm2 = vcmp.eq.s32.totalorder %v3246_v40, %v2991_v4  ;;  %v3735_v4 = vpop.permute.xlu1 %1174 }
 0x1c0   :  { %v6106_v52 = vsel %vm3698_vm4, 4294967295, %v6105_v52  ;;  %vm6109_vm15 = vmor %vm6107_vm10, %vm6108_vm14  ;;  %vm6118_vm4 = vnez %v5998_v31  ;;  %vm6124_vm14 = vnez %v6049_v37  ;;  %vm6125_vm10 = vnez %v6059_v41  ;;  %v6182_v37 = vld [vmem:[#allocation36_spill] sm:$0xff] }
 0x1c1   :  { %vm1489_vm6 = vmor %vm6109_vm15, %vm1425_vm11  ;;  %vm6116_vm15 = vnez %v6043_v22  ;;  %v6127_v31 = vmov 0  ;;  %vm6158_vm11 = vnez %v6026_v48  ;;  %v6168_v48 = vmov 0 }
 0x1c2   :  { %vm3714_vm12 = vmand %vm245_vm8, %vm6111_vm13  ;;  %v2043_v33 = vsel %vm1489_vm6, 1.0, %v2235_v21  ;;  %vm6120_vm8 = vnez %v6040_v5  ;;  %vm6121_vm13 = vcmp.eq.s32.totalorder %v2909_v24, 1  ;;  %vm5727_vm6 = vcmask 130048  }
 0x1c3   :  { %v6113_v60 = vsel %vm3714_vm12, 4294967295, %v6112_v60  ;;  %vm6119_vm7 = vmor %vm6117_vm3, %vm6118_vm4  ;;  %v2045_v12 = vsel %vm6120_vm8, 1.0, %v2235_v21  ;;  %vm6131_vm8 = vnez %v6071_v49  ;;  %v2205_v49 = vld [vmem:[%s5558_s0 + $0xf0] sm:$0xff]  ;;  %v6361_v24 = vmov 0 }
 0x1c4   :  { %vm1459_vm1 = vmor %vm6119_vm7, %vm6116_vm15  ;;  %v1665_v5 = vpack.c.bf16 %v2045_v12, %v2043_v33  ;;  %vm6126_vm15 = vcmp.eq.s32.totalorder %v3155_v39, 1  ;;  %v6134_v39 = vmov 0  ;;  %v6237_v12 = vld [vmem:[#allocation19_spill] sm:$0xff] }
 0x1c5   :  { %vm3739_vm12 = vmand %vm278_vm9, %vm6121_vm13  ;;  %v2013_v57 = vsel %vm1459_vm1, 1.0, %v2235_v21  ;;  %vm244_vm1 = vcmp.eq.s32.totalorder %v3246_v40, %v6101_v53  ;;  %vm6132_vm13 = vnez %v6067_v47 }
 0x1c6   :  { %v6123_v58 = vsel %vm3739_vm12, 4294967295, %v6122_v58  ;;  %vm1040_vm4 = vmor %vm6125_vm10, %vm6124_vm14  ;;  %v1649_v34 = vpack.c.bf16 %v2013_v57, %v2011_v62  ;;  %vm756_vm14 = vcmp.eq.s32.totalorder %v3246_v40, %v3078_v18  ;;  %2107 = vmatprep.mubr.msk.bf16.mxu1 %vm5727_vm6, %v1665_v5  ;;  %vm6136_vm10 = vcmp.eq.s32.totalorder %v3199_v55, 1  ;;  %v6218_v62 = vld [vmem:[#allocation68_spill] sm:$0xff]  ;;  %v6247_v57 = vld [vmem:[#allocation17_spill] sm:$0xff] }
 0x1c7   :  { %vm3751_vm3 = vmand %vm724_vm2, %vm6126_vm15  ;;  %vm1363_vm2 = vcmp.eq.s32.totalorder %v3261_v13, 1  ;;  %v3791_v13 = vpop.permute.xlu1 %1286  ;;  %v6144_v55 = vmov 0 }
 0x1c8   :  { %v6128_v31 = vsel %vm3751_vm3, 4294967295, %v6127_v31  ;;  %vm3757_vm9 = vmor %vm1040_vm4, %vm3686_vm0  ;;  %vm6133_vm4 = vcmp.eq.s32.totalorder %v2828_v61, 1  ;;  %2083 = vmatprep.mubr.msk.bf16.mxu0 %vm5727_vm6, %v1649_v34  ;;  %vm6139_vm3 = vcmp.eq.s32.totalorder %v3246_v40, %v1115_v25  ;;  %v2236_v61 = vmov 1.0|1.0  }
 0x1c9   :  { %vm2084_vm0 = vmpackc.low %vm6132_vm13, %vm6131_vm8  ;;  %vm6143_vm8 = vcmp.eq.s32.totalorder %v2911_v7, 1  ;;  %v6152_v7 = vmov 0 }
 0x1ca   :  { %vm3774_vm15 = vmand %vm244_vm1, %vm6133_vm4  ;;  %vm276_vm1 = vcmp.eq.s32.totalorder %v3246_v40, %v6074_v6  ;;  %2085 = vmatmul.mubr.msk.bf16.vlgmr.msra.gmra.mrb[0].mxu0 %vm2084_vm0, %v2236_v61  ;;  %v6306_v6 = vld [vmem:[#allocation48_spill] sm:$0xff] }
 0x1cb   :  { %v6135_v39 = vsel %vm3774_vm15, 4294967295, %v6134_v39  ;;  %vm3780_vm7 = vmand %vm756_vm14, %vm6136_vm10  ;;  %vm6142_vm10 = vcmp.eq.s32.totalorder %v3257_v10, %v1115_v25  ;;  %v3847_v22 = vpop.permute.xlu1 %1334 }
 0x1cc   :  { %v6138_v8 = vsel %vm3780_vm7, 4294967295, %v6137_v8  ;;  %vm3787_vm12 = vmand %vm6139_vm3, %vm1363_vm2  ;;  %vm731_vm3 = vcmp.eq.s32.totalorder %v3257_v10, %v3005_v19  ;;  %vm6150_vm7 = vnez %v6020_v20  ;;  %v3845_v20 = vpop.permute.xlu0 %1319 }
 0x1cd   :  { %vm1399_vm14 = vmand %vm6142_vm10, %vm1363_vm2  ;;  %vm6154_vm10 = vcmp.eq.s32.totalorder %v3276_v30, 1  ;;  %vm6157_vm2 = vnez %v6046_v35  ;;  %v6163_v30 = vmov 0  ;;  %v6172_v35 = vld [vmem:[#allocation20_spill] sm:$0xff] }
 0x1ce   :  { %vm3800_vm13 = vmand %vm276_vm1, %vm6143_vm8  ;;  %vm1238_vm1 = vcmp.eq.s32.totalorder %v3246_v40, %v3251_v36  ;;  %vm6148_vm8 = vnez %v6080_v3  ;;  %v6155_v36 = vmov 0 }
 0x1cf   :  { %v6145_v55 = vsel %vm3800_vm13, 4294967295, %v6144_v55  ;;  %vm2108_vm6 = vmpackc.low %vm3662_vm5, %vm3757_vm9  ;;  %vm6149_vm13 = vnez %v6033_v9  ;;  %vm730_vm9 = vcmp.eq.s32.totalorder %v3246_v40, %v3005_v19  ;;  %v3914_v41 = vpop.permute.xlu1 %892  ;;  %v6277_v9 = vmov 0  ;;  %v6298_v19 = vld [vmem:[#allocation12_spill] sm:$0xff] }
 0x1d0   :  { %vm6151_vm4 = vmor %vm6149_vm13, %vm6150_vm7  ;;  %2109 = vmatmul.mubr.msk.bf16.vlgmr.msra.gmra.mrb[0].mxu1 %vm2108_vm6, %v2236_v61  ;;  %vm6162_vm6 = vcmp.eq.s32.totalorder %v3165_v50, 1 }
 0x1d1   :  { %vm3824_vm15 = vmor %vm6151_vm4, %vm6148_vm8  ;;  %vm6170_vm8 = vnez %v6095_v28 }
 0x1d2   :  { %v6153_v7 = vsel %vm3824_vm15, 4294967295, %v6152_v7  ;;  %vm3832_vm0 = vmand %vm1238_vm1, %vm6154_vm10  ;;  %vm1205_vm10 = vcmp.eq.s32.totalorder %v3257_v10, %v3238_v16 }
 0x1d3   :  { %v6156_v36 = vsel %vm3832_vm0, 4294967295, %v6155_v36  ;;  %vm6159_vm7 = vmor %vm6157_vm2, %vm6158_vm11  ;;  %vm6165_vm11 = vnez %v6053_v1  ;;  %vm6176_vm0 = vcmp.eq.s32.totalorder %v2838_v2, 1  ;;  %v4000_v53 = vpop.permute.xlu1 %1129 }
 0x1d4   :  { %vm3841_vm13 = vmor %vm6159_vm7, %vm1399_vm14  ;;  %vm6166_vm14 = vnez %v6037_v29  ;;  %v6177_v29 = vmov 0 }
 0x1d5   :  { %vm3851_vm4 = vmand %vm731_vm3, %vm6162_vm6  ;;  %vm6171_vm3 = vnez %v6113_v60  ;;  %vm251_vm6 = vcmp.eq.s32.totalorder %v3257_v10, %v6172_v35  ;;  %v2017_v45 = vsel %vm3841_vm13, 1.0, %v2235_v21  ;;  %v2206_v60 = vld [vmem:[%s5558_s0 + $0x70] sm:$0xff] }
 0x1d6   :  { %v6164_v30 = vsel %vm3851_vm4, 4294967295, %v6163_v30  ;;  %vm6167_vm2 = vmor %vm6165_vm11, %vm6166_vm14  ;;  %vm6175_vm14 = vcmp.eq.s32.totalorder %v1272_v51, 1  ;;  %vm5732_vm11 = vcmp.eq.s32.totalorder %v3845_v20, 1  ;;  %vm283_vm4 = vcmp.eq.s32.totalorder %v3257_v10, %v6182_v37  ;;  %v6368_v51 = vld [vmem:[#allocation32_spill] sm:$0xff] }
 0x1d7   :  { %vm3864_vm1 = vmor %vm6167_vm2, %vm3787_vm12  ;;  %vm1204_vm12 = vcmp.eq.s32.totalorder %v3246_v40, %v3238_v16  ;;  %v6184_v16 = vmov 0  ;;  %v1086_v33 = vadd.s32 80, %v2206_v60  ;;  %v4094_v34 = vpop.permute.xlu1 %1177  ;;  %v6332_v60 = vmov 0 }
 0x1d8   :  { %v6169_v48 = vsel %vm3864_vm1, 4294967295, %v6168_v48  ;;  %vm1013_vm7 = vmor %vm6171_vm3, %vm6170_vm8  ;;  %vm5731_vm8 = vcmp.eq.s32.totalorder %v2919_v17, 1 }
 0x1d9   :  { %vm1397_vm2 = vmand %vm1205_vm10, %vm6175_vm14  ;;  %vm6183_vm10 = vcmp.eq.s32.totalorder %v3165_v50, 1  ;;  %v6188_v50 = vmov 0 }
 0x1da   :  { %vm3885_vm1 = vmand %vm251_vm6, %vm6176_vm0  ;;  %vm1237_vm0 = vcmp.eq.s32.totalorder %v3257_v10, %v3244_v11  ;;  %vm6186_vm6 = vnez %v6128_v31  ;;  %v6252_v31 = vld [vmem:[#allocation94_spill] sm:$0xff] }
 0x1db   :  { %v6178_v29 = vsel %vm3885_vm1, 4294967295, %v6177_v29  ;;  %vm6179_vm3 = vmmov %vm6175_vm14 }
 0x1dc   :  { %vm3891_vm15 = vmand %vm1204_vm12, %vm6179_vm3 }
 0x1dd   :  { %vm1461_vm5 = vmor %vm1013_vm7, %vm1397_vm2  ;;  %vm6187_vm7 = vnez %v6135_v39  ;;  %v6260_v39 = vmov 0 }
 0x1de   :  { %vm3900_vm14 = vmand %vm730_vm9, %vm6183_vm10  ;;  %v2015_v1 = vsel %vm1461_vm5, 1.0, %v2235_v21  ;;  %vm250_vm9 = vcmp.eq.s32.totalorder %v3246_v40, %v6172_v35  ;;  %vm558_vm5 = vcmp.lt.s32.totalorder %v2205_v49, 16  ;;  %vm6190_vm10 = vcmp.eq.s32.totalorder %v2838_v2, 1 }
 0x1df   :  { %v6185_v16 = vsel %vm3900_vm14, 4294967295, %v6184_v16  ;;  %vm1012_vm12 = vmor %vm6187_vm7, %vm6186_vm6  ;;  %v1651_v47 = vpack.c.bf16 %v2017_v45, %v2015_v1  ;;  %vm6194_vm7 = vnez %v6145_v55  ;;  %v6202_v2 = vmov 0  ;;  %v6302_v1 = vld [vmem:[#allocation70_spill] sm:$0xff] }
 0x1e0   :  { %vm3920_vm2 = vmand %vm283_vm4, %vm5731_vm8  ;;  %vm6201_vm8 = vcmp.eq.s32.totalorder %v3209_v0, 1  ;;  %v6268_v55 = vmov 0  ;;  %v6295_v35 = vmov 0  ;;  %v6407_v45 = vmov 0 }
 0x1e1   :  { %v6189_v50 = vsel %vm3920_vm2, 4294967295, %v6188_v50  ;;  %vm1429_vm3 = vmand %vm1237_vm0, %vm5732_vm11  ;;  %vm761_vm11 = vcmp.eq.s32.totalorder %v3257_v10, %v3089_v54  ;;  %vm6200_vm2 = vcmask 130048   ;;  %vm6205_vm0 = vcmp.ge.s32.totalorder %v2451_v32, 0 }
 0x1e2   :  { %vm3932_vm6 = vmand %vm250_vm9, %vm6190_vm10  ;;  %vm6197_vm9 = vnez %v6092_v27  ;;  %vm6198_vm10 = vnez %v6077_v56  ;;  %2086 = vmatprep.mubr.msk.bf16.mxu0 %vm6200_vm2, %v1651_v47  ;;  %v1121_v56 = vpop.permute.xlu0 %1120  ;;  %vm281_vm2 = vcmp.eq.s32.totalorder %v3257_v10, %v6206_v44  ;;  %v6210_v32 = vmov 0 }
 0x1e3   :  { %v6192_v15 = vsel %vm3932_vm6, 4294967295, %v6191_v15  ;;  %vm3942_vm13 = vmor %vm1012_vm12, %vm3891_vm15  ;;  %vm6204_vm15 = vnez %v6153_v7  ;;  %vm6226_vm12 = vcmask 130048   ;;  %v6379_v7 = vmov 0 }
 0x1e4   :  { %vm6199_vm6 = vmor %vm6197_vm9, %vm6198_vm10  ;;  %v2049_v3 = vsel %vm6204_vm15, 1.0, %v2235_v21  ;;  %vm760_vm10 = vcmp.eq.s32.totalorder %v3246_v40, %v3089_v54  ;;  %vm6212_vm15 = vnez %v6156_v36  ;;  %v6221_v54 = vmov 0 }
 0x1e5   :  { %vm1493_vm14 = vmor %vm6199_vm6, %vm1429_vm3  ;;  %vm6209_vm6 = vcmp.eq.s32.totalorder %v2921_v26, 1 }
 0x1e6   :  { %vm3957_vm4 = vmand %vm761_vm11, %vm6201_vm8  ;;  %v2047_v25 = vsel %vm1493_vm14, 1.0, %v2235_v21  ;;  %vm6207_vm8 = vnez %v6169_v48  ;;  %vm282_vm11 = vcmp.eq.s32.totalorder %v3246_v40, %v6182_v37  ;;  %v1278_v5 = vpop.permute.xlu0 %1277  ;;  %v6291_v48 = vld [vmem:[#allocation59_spill] sm:$0xff] }
 0x1e7   :  { %v6203_v2 = vsel %vm3957_vm4, 4294967295, %v6202_v2  ;;  %vm590_vm9 = vmand %vm6205_vm0, %vm558_vm5  ;;  %v1667_v27 = vpack.c.bf16 %v2049_v3, %v2047_v25  ;;  %vm763_vm0 = vcmp.eq.s32.totalorder %v3257_v10, %v3095_v38  ;;  %v6307_v3 = vld [vmem:[#allocation49_spill] sm:$0xff] }
 0x1e8   :  { %v814_v28 = vsel %vm590_vm9, 1, %v5861_v63  ;;  %vm2087_vm3 = vmpackc.low %vm6207_vm8, %vm3942_vm13  ;;  %vm6213_vm9 = vnez %v6123_v58  ;;  %vm6214_vm13 = vnez %v6106_v52  ;;  %v6224_v52 = vmov 0  ;;  %v6308_v25 = vld [vmem:[#allocation69_spill] sm:$0xff]  ;;  %v6320_v63 = vld [vmem:[#allocation22_spill] sm:$0xff] }
 0x1e9   :  { %vm3980_vm5 = vmand %vm281_vm2, %vm6209_vm6  ;;  %907 = vperm.xlu1 %2174, %v814_v28   ;;  %2088 = vmatmul.mubr.msk.bf16.gmra.mrb[4].mxu0 %vm2087_vm3, %v2236_v61  ;;  %vm729_vm6 = vcmp.eq.s32.totalorder %v3257_v10, %v6218_v62  ;;  %vm1236_vm3 = vcmp.eq.s32.totalorder %v3246_v40, %v3244_v11  ;;  %vm6227_vm2 = vcmp.eq.s32.totalorder %v3163_v23, 1  ;;  %v6232_v11 = vmov 0 }
 0x1ea   :  { %v6211_v32 = vsel %vm3980_vm5, 4294967295, %v6210_v32  ;;  %vm6215_vm8 = vmor %vm6213_vm9, %vm6214_vm13  ;;  %vm6223_vm13 = vcmp.eq.s32.totalorder %v3280_v46, 1  ;;  %2110 = vmatprep.mubr.msk.bf16.mxu1 %vm6226_vm12, %v1667_v27  ;;  %vm6231_vm12 = vcmp.eq.s32.totalorder %v2921_v26, 1  ;;  %vm6234_vm5 = vcmp.eq.s32.totalorder %v3280_v46, 1  ;;  %v1326_v36 = vpop.permute.xlu0 %1325  ;;  %v6313_v27 = vld [vmem:[#allocation39_spill] sm:$0xff] }
 0x1eb   :  { %vm3995_vm14 = vmor %vm6215_vm8, %vm6212_vm15  ;;  %vm6220_vm15 = vcmp.eq.s32.totalorder %v3209_v0, 1  ;;  %v6228_v0 = vmov 0  ;;  %v6240_v26 = vmov 0  ;;  %v6243_v46 = vmov 0 }
 0x1ec   :  { %vm4011_vm9 = vmand %vm760_vm10, %vm6220_vm15  ;;  %vm280_vm10 = vcmp.eq.s32.totalorder %v3246_v40, %v6206_v44  ;;  %vm762_vm15 = vcmp.eq.s32.totalorder %v3246_v40, %v3095_v38  ;;  %v6235_v38 = vmov 0  ;;  %v6246_v58 = vmov 2   ;;  %v6312_v44 = vld [vmem:[#allocation8_spill] sm:$0xff] }
 0x1ed   :  { %v6222_v54 = vsel %vm4011_vm9, 4294967295, %v6221_v54  ;;  %vm4019_vm8 = vmand %vm763_vm0, %vm6223_vm13  ;;  %vm6230_vm0 = vcmp.eq.s32.totalorder %v3845_v20, 1  ;;  %2176 = vset.pattern.permute.xlu1 %v6246_v58  ;;  %v6282_v20 = vmov 0  ;;  %v6314_v28 = vmov 0  ;;  %v6343_v58 = vld [vmem:[#allocation58_spill] sm:$0xff] }
 0x1ee   :  { %v6225_v52 = vsel %vm4019_vm8, 4294967295, %v6224_v52  ;;  %vm4033_vm9 = vmand %vm729_vm6, %vm6227_vm2  ;;  %vm1211_vm6 = vcmp.eq.s32.totalorder %v3257_v10, %v1121_v56  ;;  %1147 = vperm.xlu1 %2176, %v1086_v33   ;;  %vm6253_vm2 = vcmp.eq.s32.totalorder %v6237_v12, 1  ;;  %v6336_v33 = vmov 0 }
 0x1ef   :  { %v6229_v0 = vsel %vm4033_vm9, 4294967295, %v6228_v0  ;;  %vm1428_vm13 = vmand %vm1236_vm3, %vm6230_vm0  ;;  %vm6238_vm3 = vcmp.eq.s32.totalorder %v2840_v43, 1  ;;  %vm6239_vm0 = vcmp.eq.s32.totalorder %v3257_v10, %v6208_v42 }
 0x1f0   :  { %vm4043_vm1 = vmand %vm280_vm10, %vm6231_vm12  ;;  %vm6242_vm10 = vcmp.eq.s32.totalorder %v2919_v17, 1  ;;  %v1102_v17 = vadd.s32 80, %v2205_v49  ;;  %v4213_v49 = vpop.permute.xlu0 %1126 }
 0x1f1   :  { %v6233_v11 = vsel %vm4043_vm1, 4294967295, %v6232_v11  ;;  %vm4049_vm4 = vmand %vm762_vm15, %vm6234_vm5  ;;  %vm1243_vm15 = vcmp.eq.s32.totalorder %v3257_v10, %v6252_v31  ;;  %vm6264_vm5 = vcmp.eq.s32.totalorder %v6237_v12, 1 }
 0x1f2   :  { %v6236_v38 = vsel %vm4049_vm4, 4294967295, %v6235_v38  ;;  %vm4060_vm9 = vmand %vm6239_vm0, %vm6238_vm3  ;;  %vm1210_vm4 = vcmp.eq.s32.totalorder %v3246_v40, %v1121_v56  ;;  %1195 = vperm.xlu1 %2176, %v1102_v17   ;;  %v6351_v17 = vld [vmem:[#allocation14_spill] sm:$0xff]  ;;  %v6438_v56 = vld [vmem:[#allocation72_spill] sm:$0xff] }
 0x1f3   :  { %v6241_v26 = vsel %vm4060_vm9, 4294967295, %v6240_v26  ;;  %vm4066_vm12 = vmand %vm282_vm11, %vm6242_vm10  ;;  %vm6250_vm11 = vnez %v6138_v8  ;;  %vm248_vm9 = vcmp.eq.s32.totalorder %v3246_v40, %v6208_v42  ;;  %v6370_v8 = vmov 0 }
 0x1f4   :  { %v6244_v46 = vsel %vm4066_vm12, 4294967295, %v6243_v46  ;;  %vm6251_vm10 = vmor %vm6194_vm7, %vm6250_vm11  ;;  %vm728_vm7 = vcmp.eq.s32.totalorder %v3246_v40, %v6218_v62  ;;  %v6322_v62 = vmov 0 }
 0x1f5   :  { %vm1492_vm12 = vmor %vm6251_vm10, %vm1428_vm13  ;;  %vm6256_vm13 = vcmp.eq.s32.totalorder %v6247_v57, 1  ;;  %vm6259_vm10 = vcmp.eq.s32.totalorder %v3163_v23, 1  ;;  %v2207_v23 = vld [vmem:[%s5558_s0 + $0xf8] sm:$0xff]  ;;  %s2237_s0 = smov [#allocation2]  }
 0x1f6   :  { %vm4090_vm1 = vmand %vm1211_vm6, %vm6253_vm2  ;;  %v1103_v18 = vadd.s32 80, %v2207_v23  ;;  %v6372_v23 = vld [vmem:[#allocation80_spill] sm:$0xff]  ;;  %s1999_s21 = sshll.u32 %s2237_s0, 4  ;;  %s2000_s21 = int_to_ptr.vmem [resolvable:$true] %s1999_s21 }
 0x1f7   :  { %vm4102_vm11 = vmand %vm1243_vm15, %vm6256_vm13  ;;  %vm6271_vm13 = vnez %v6164_v30  ;;  %v4171_v30 = vpop.permute.xlu1 %1180  ;;  %s2208_s22 = scalar_lea.vmem %s2000_s21, 4096  ;;  %p2213_p1 = scmp.lt.s32.totalorder %s2000_s21, %s2000_s21 }
 0x1f8   :  { %vm4108_vm2 = vmand %vm728_vm7, %vm6259_vm10  ;;  %vm6279_vm7 = vnez %v6189_v50  ;;  %1198 = vperm.xlu1 %2176, %v1103_v18   ;;  %v6303_v50 = vld [vmem:[#allocation87_spill] sm:$0xff]  ;;  %v6374_v18 = vmov 0  ;;  %p2209_p0 = scmp.ne.s32.totalorder %s2000_s21, %s2208_s22  ;;  %p2214_p2 = scmp.lt.s32.totalorder %s2208_s22, %s2208_s22 }
 0x1f9   :  { %v6261_v39 = vsel %vm4108_vm2, 4294967295, %v6260_v39  ;;  %vm2111_vm6 = vmpackc.low %vm3995_vm14, %vm1492_vm12  ;;  %vm6267_vm14 = vcmp.eq.s32.totalorder %v2840_v43, 1  ;;  %v6275_v43 = vld [vmem:[#allocation91_spill] sm:$0xff] }
 0x1fa   :  { %vm4120_vm15 = vmand %vm1210_vm4, %vm6264_vm5  ;;  %2112 = vmatmul.mubr.msk.bf16.gmra.mrb[4].mxu1 %vm2111_vm6, %v2236_v61  ;;  %vm1242_vm4 = vcmp.eq.s32.totalorder %v3246_v40, %v6252_v31  ;;  %vm6270_vm5 = vnez %v6178_v29  ;;  %vm1208_vm2 = vcmp.eq.s32.totalorder %v3246_v40, %v6275_v43  ;;  %v6297_v29 = vld [vmem:[#allocation86_spill] sm:$0xff]  ;;  %p2215_p3 = por %p2214_p2, %p2213_p1 }
 0x1fb   :  { %vm4130_vm12 = vmand %vm248_vm9, %vm6267_vm14  ;;  %vm1209_vm9 = vcmp.eq.s32.totalorder %v3257_v10, %v6275_v43  ;;  %vm6276_vm14 = vcmp.eq.s32.totalorder %v6247_v57, 1  ;;  %v4241_v42 = vpop.permute.xlu1 %1292  ;;  %v6345_v57 = vmov 0  ;;  %v6352_v31 = vld [vmem:[#allocation10_spill] sm:$0xff]  ;;  %v6385_v43 = vmov 0 }
 0x1fc   :  { %v6269_v55 = vsel %vm4130_vm12, 4294967295, %v6268_v55  ;;  %vm6272_vm10 = vmor %vm6270_vm5, %vm6271_vm13  ;;  %vm6280_vm5 = vnez %v6225_v52  ;;  %vm6285_vm12 = vnez %v6233_v11  ;;  %1310 = vperm.xlu1 %2176, %v6312_v44   ;;  %v6358_v11 = vld [vmem:[#allocation38_spill] sm:$0xff]  ;;  %p2216_p4 = pnand %p2215_p3, %p2209_p0 }
 0x1fd   :  { %vm4143_vm6 = vmor %vm6272_vm10, %vm4090_vm1 }
 0x1fe   :  { %vm4151_vm8 = vmand %vm1242_vm4, %vm6276_vm14  ;;  %vm6286_vm4 = vcmp.eq.s32.totalorder %v1278_v5, 1  ;;  %v2021_v37 = vsel %vm4143_vm6, 1.0, %v2235_v21 }
 0x1ff   :  { %v6278_v9 = vsel %vm4151_vm8, 4294967295, %v6277_v9  ;;  %vm6281_vm1 = vmor %vm6279_vm7, %vm6280_vm5  ;;  %vm6289_vm7 = vnez %v6229_v0  ;;  %v6461_v0 = vmov 0 }
 0x200   :  { %vm4162_vm13 = vmor %vm6281_vm1, %vm4102_vm11  ;;  %vm6290_vm11 = vnez %v6241_v26  ;;  %v6341_v26 = vmov 0  ;;  %1358 = vperm.xlu1 %2176, %v6351_v17  }
 0x201   :  { %v6283_v20 = vsel %vm4162_vm13, 4294967295, %v6282_v20  ;;  %vm1401_vm14 = vmand %vm1209_vm9, %vm6286_vm4  ;;  %vm6292_vm9 = vnez %v6192_v15  ;;  %vm6293_vm4 = vnez %v6185_v16  ;;  %vm6299_vm13 = vcmp.eq.s32.totalorder %v1278_v5, 1  ;;  %v6305_v15 = vld [vmem:[#allocation23_spill] sm:$0xff] }
 0x202   :  { %vm1017_vm5 = vmor %vm6290_vm11, %vm6289_vm7  ;;  %vm5744_vm7 = vcmp.eq.s32.totalorder %v6297_v29, 1  ;;  %vm1241_vm11 = vcmp.eq.s32.totalorder %v3257_v10, %v6298_v19 }
 0x203   :  { %vm6294_vm10 = vmor %vm6292_vm9, %vm6293_vm4 }
 0x204   :  { %vm4191_vm0 = vmor %vm6294_vm10, %vm4120_vm15  ;;  %vm255_vm10 = vcmp.eq.s32.totalorder %v3257_v10, %v6320_v63 }
 0x205   :  { %v6296_v35 = vsel %vm4191_vm0, 4294967295, %v6295_v35  ;;  %vm1465_vm8 = vmor %vm1017_vm5, %vm1401_vm14  ;;  %vm1240_vm14 = vcmp.eq.s32.totalorder %v3246_v40, %v6298_v19  ;;  %vm6304_vm5 = vcmp.eq.s32.totalorder %v1326_v36, 1  ;;  %vm6321_vm0 = vcmp.eq.s32.totalorder %v6291_v48, 1  ;;  %v6400_v19 = vld [vmem:[#allocation71_spill] sm:$0xff] }
 0x206   :  { %vm4202_vm1 = vmand %vm1208_vm2, %vm6299_vm13  ;;  %v2019_v16 = vsel %vm1465_vm8, 1.0, %v2235_v21  ;;  %vm732_vm13 = vcmp.eq.s32.totalorder %v3246_v40, %v6308_v25  ;;  %vm6316_vm2 = vnez %v6211_v32  ;;  %vm6317_vm8 = vnez %v6203_v2 }
 0x207   :  { %v1653_v47 = vpack.c.bf16 %v2021_v37, %v2019_v16  ;;  %vm1433_vm9 = vmand %vm1241_vm11, %vm6304_vm5  ;;  %vm285_vm11 = vcmp.eq.s32.totalorder %v3257_v10, %v6313_v27  ;;  %v6326_v2 = vmov 0  ;;  %v6382_v36 = vmov 0 }
 0x208   :  { %vm6309_vm4 = vmmov %vm6304_vm5 }
 0x209   :  { %vm4222_vm15 = vmand %vm1240_vm14, %vm6309_vm4  ;;  %vm6319_vm4 = vcmask 130048  }
 0x20a   :  { %vm4231_vm5 = vmand %vm732_vm13, %vm5744_vm7  ;;  %2089 = vmatprep.mubr.msk.bf16.mxu0 %vm6319_vm4, %v1653_v47  ;;  %vm6324_vm13 = vcmp.eq.s32.totalorder %v6303_v50, 1  ;;  %vm6325_vm7 = vcmp.eq.s32.totalorder %v3246_v40, %v6302_v1  ;;  %vm6331_vm4 = vcmp.eq.s32.totalorder %v6306_v6, 1  ;;  %v6428_v6 = vld [vmem:[#allocation50_spill] sm:$0xff] }
 0x20b   :  { %v6315_v28 = vsel %vm4231_vm5, 4294967295, %v6314_v28  ;;  %vm6318_vm6 = vmor %vm6316_vm2, %vm6317_vm8 }
 0x20c   :  { %vm1497_vm14 = vmor %vm6318_vm6, %vm1433_vm9  ;;  %vm6328_vm9 = vnez %v6283_v20  ;;  %vm6329_vm6 = vnez %v6261_v39  ;;  %v4358_v39 = vpop.permute.xlu1 %1340  ;;  %v6388_v20 = vmov 0 }
 0x20d   :  { %vm4247_vm3 = vmand %vm285_vm11, %vm6321_vm0  ;;  %v2053_v32 = vsel %vm6328_vm9, 1.0, %v2235_v21  ;;  %vm6330_vm0 = vnez %v6269_v55  ;;  %v2051_v52 = vsel %vm1497_vm14, 1.0, %v2235_v21  ;;  %vm254_vm11 = vcmp.eq.s32.totalorder %v3246_v40, %v6320_v63  ;;  %v6445_v63 = vld [vmem:[#allocation41_spill] sm:$0xff] }
 0x20e   :  { %v6323_v62 = vsel %vm4247_vm3, 4294967295, %v6322_v62  ;;  %vm4256_vm2 = vmand %vm6325_vm7, %vm6324_vm13  ;;  %vm6334_vm9 = vcmp.eq.s32.totalorder %v6307_v3, 1  ;;  %vm733_vm14 = vcmp.eq.s32.totalorder %v3257_v10, %v6308_v25  ;;  %v1669_v12 = vpack.c.bf16 %v2053_v32, %v2051_v52  ;;  %v6432_v25 = vld [vmem:[#allocation61_spill] sm:$0xff]  ;;  %v6450_v52 = vld [vmem:[#allocation24_spill] sm:$0xff] }
 0x20f   :  { %v6327_v2 = vsel %vm4256_vm2, 4294967295, %v6326_v2  ;;  %vm1016_vm8 = vmor %vm6330_vm0, %vm6329_vm6  ;;  %vm6335_vm2 = vcmp.eq.s32.totalorder %v3246_v40, %v6305_v15  ;;  %v6377_v55 = vmov 0 }
 0x210   :  { %vm4274_vm13 = vmand %vm255_vm10, %vm6331_vm4 }
 0x211   :  { %v6333_v60 = vsel %vm4274_vm13, 4294967295, %v6332_v60  ;;  %vm4283_vm6 = vmand %vm6335_vm2, %vm6334_vm9  ;;  %vm6344_vm9 = vcmp.eq.s32.totalorder %v6297_v29, 1  ;;  %vm1245_vm13 = vcmp.eq.s32.totalorder %v3257_v10, %v3648_v14  ;;  %v6399_v29 = vld [vmem:[#allocation51_spill] sm:$0xff] }
 0x212   :  { %v6337_v33 = vsel %vm4283_vm6, 4294967295, %v6336_v33  ;;  %vm4291_vm0 = vmor %vm1016_vm8, %vm4202_vm1  ;;  %vm6347_vm1 = vnez %v6222_v54  ;;  %v1284_v54 = vpop.permute.xlu0 %1283 }
 0x213   :  { %vm6340_vm10 = vmmov %vm6331_vm4 }
 0x214   :  { %vm4297_vm4 = vmand %vm254_vm11, %vm6340_vm10  ;;  %vm6354_vm10 = vnez %v6244_v46  ;;  %vm735_vm11 = vcmp.eq.s32.totalorder %v3257_v10, %v6302_v1  ;;  %v6367_v46 = vld [vmem:[#allocation79_spill] sm:$0xff]  ;;  %v6412_v1 = vld [vmem:[#allocation25_spill] sm:$0xff] }
 0x215   :  { %v6342_v26 = vsel %vm4297_vm4, 4294967295, %v6341_v26  ;;  %vm4304_vm7 = vmand %vm733_vm14, %vm6344_vm9  ;;  %vm6353_vm14 = vnez %v6278_v9  ;;  %vm6355_vm9 = vnez %v6236_v38  ;;  %vm6357_vm4 = vcmask 130048  }
 0x216   :  { %v6346_v57 = vsel %vm4304_vm7, 4294967295, %v6345_v57  ;;  %vm6348_vm8 = vmor %vm6285_vm12, %vm6347_vm1  ;;  %2113 = vmatprep.mubr.msk.bf16.mxu1 %vm6357_vm4, %v1669_v12  ;;  %vm287_vm12 = vcmp.eq.s32.totalorder %v3257_v10, %v6358_v11  ;;  %vm6360_vm1 = vcmp.eq.s32.totalorder %v3257_v10, %v6305_v15  ;;  %vm6363_vm4 = vnez %v6296_v35  ;;  %v4411_v9 = vpop.permute.xlu0 %1331  ;;  %v6393_v35 = vld [vmem:[#allocation7_spill] sm:$0xff]  ;;  %v6422_v15 = vld [vmem:[#allocation88_spill] sm:$0xff] }
 0x217   :  { %vm4315_vm6 = vmor %vm6348_vm8, %vm4222_vm15  ;;  %vm6359_vm15 = vcmp.eq.s32.totalorder %v6307_v3, 1  ;;  %v6365_v38 = vmov 0  ;;  %v6430_v3 = vmov 0  ;;  %v6463_v12 = vld [vmem:[#allocation60_spill] sm:$0xff] }
 0x218   :  { %vm6356_vm2 = vmor %vm6354_vm10, %vm6355_vm9  ;;  %vm765_vm9 = vcmp.eq.s32.totalorder %v3257_v10, %v6367_v46 }
 0x219   :  { %vm1498_vm7 = vmor %vm6356_vm2, %vm6353_vm14  ;;  %vm6364_vm14 = vcmp.eq.s32.totalorder %v6343_v58, 1 }
 0x21a   :  { %vm4336_vm8 = vmand %vm6360_vm1, %vm6359_vm15 }
 0x21b   :  { %v6362_v24 = vsel %vm4336_vm8, 4294967295, %v6361_v24  ;;  %vm2090_vm2 = vmpackc.low %vm6363_vm4, %vm4291_vm0  ;;  %vm6369_vm0 = vcmp.eq.s32.totalorder %v6352_v31, 1  ;;  %vm1366_vm8 = vcmp.eq.s32.totalorder %v1284_v54, 1  ;;  %v6473_v31 = vld [vmem:[#allocation40_spill] sm:$0xff]  ;;  %v6617_v54 = vmov 0 }
 0x21c   :  { %vm4348_vm10 = vmand %vm287_vm12, %vm6364_vm14  ;;  %2091 = vmatmul.mubr.msk.bf16.gmra.mrb[8].mxu0 %vm2090_vm2, %v2236_v61  ;;  %vm286_vm12 = vcmp.eq.s32.totalorder %v3246_v40, %v6358_v11  ;;  %vm766_vm14 = vcmp.eq.s32.totalorder %v3246_v40, %v6372_v23  ;;  %vm6373_vm2 = vcmp.eq.s32.totalorder %v6303_v50, 1  ;;  %v6414_v50 = vmov 0 }
 0x21d   :  { %v6366_v38 = vsel %vm4348_vm10, 4294967295, %v6365_v38  ;;  %vm2114_vm1 = vmpackc.low %vm1498_vm7, %vm4315_vm6  ;;  %vm764_vm7 = vcmp.eq.s32.totalorder %v3246_v40, %v6367_v46  ;;  %vm6376_vm6 = vcmp.eq.s32.totalorder %v6343_v58, 1  ;;  %v6471_v58 = vld [vmem:[#allocation13_spill] sm:$0xff]  ;;  %v6481_v11 = vmov 0 }
 0x21e   :  { %vm4362_vm4 = vmand %vm765_vm9, %vm6369_vm0  ;;  %2115 = vmatmul.mubr.msk.bf16.gmra.mrb[8].mxu1 %vm2114_vm1, %v2236_v61  ;;  %vm767_vm1 = vcmp.eq.s32.totalorder %v3257_v10, %v6372_v23  ;;  %v6499_v23 = vld [vmem:[#allocation82_spill] sm:$0xff] }
 0x21f   :  { %v6371_v8 = vsel %vm4362_vm4, 4294967295, %v6370_v8  ;;  %vm4373_vm15 = vmand %vm735_vm11, %vm6373_vm2  ;;  %vm6381_vm11 = vcmp.eq.s32.totalorder %v6368_v51, 1  ;;  %v6494_v51 = vmov 0 }
 0x220   :  { %v6375_v18 = vsel %vm4373_vm15, 4294967295, %v6374_v18  ;;  %vm4381_vm9 = vmand %vm286_vm12, %vm6376_vm6  ;;  %vm284_vm12 = vcmp.eq.s32.totalorder %v3246_v40, %v6313_v27  ;;  %vm1213_vm6 = vcmp.eq.s32.totalorder %v3257_v10, %v3590_v59  ;;  %vm6406_vm15 = vcmp.eq.s32.totalorder %v6393_v35, 1 }
 0x221   :  { %v6378_v55 = vsel %vm4381_vm9, 4294967295, %v6377_v55  ;;  %vm4389_vm10 = vmand %vm764_vm7, %vm6369_vm0  ;;  %vm1214_vm9 = vcmp.eq.s32.totalorder %v3246_v40, %v4213_v49 }
 0x222   :  { %v6380_v7 = vsel %vm4389_vm10, 4294967295, %v6379_v7  ;;  %vm4395_vm2 = vmand %vm766_vm14, %vm6381_vm11  ;;  %vm6387_vm14 = vcmp.eq.s32.totalorder %v6291_v48, 1  ;;  %v4435_v48 = vpop.permute.xlu1 %850 }
 0x223   :  { %v6383_v36 = vsel %vm4395_vm2, 4294967295, %v6382_v36  ;;  %vm6384_vm7 = vmmov %vm6381_vm11  ;;  %vm6395_vm2 = vnez %v6362_v24  ;;  %v6485_v24 = vmov 0 }
 0x224   :  { %vm4407_vm0 = vmand %vm767_vm1, %vm6384_vm7  ;;  %vm6390_vm1 = vnez %v6337_v33  ;;  %vm6394_vm7 = vnez %v6346_v57  ;;  %v6455_v33 = vmov 0 }
 0x225   :  { %v6386_v43 = vsel %vm4407_vm0, 4294967295, %v6385_v43  ;;  %vm4415_vm11 = vmand %vm284_vm12, %vm6387_vm14  ;;  %vm736_vm0 = vcmp.eq.s32.totalorder %v3246_v40, %v6400_v19  ;;  %vm6409_vm12 = vcmp.eq.s32.totalorder %v3791_v13, 1  ;;  %v6559_v13 = vmov 0 }
 0x226   :  { %v6389_v20 = vsel %vm4415_vm11, 4294967295, %v6388_v20  ;;  %vm1212_vm11 = vcmp.eq.s32.totalorder %v3246_v40, %v3590_v59  ;;  %vm1405_vm3 = vmand %vm1213_vm6, %vm1366_vm8  ;;  %v6397_v59 = vmov 0  ;;  %v4500_v47 = vpop.permute.xlu1 %895 }
 0x227   :  { %vm1404_vm10 = vmand %vm1212_vm11, %vm1366_vm8  ;;  %vm1215_vm8 = vcmp.eq.s32.totalorder %v3257_v10, %v4213_v49  ;;  %v6420_v49 = vmov 0 }
 0x228   :  { %vm1021_vm5 = vmor %vm6395_vm2, %vm6394_vm7  ;;  %vm737_vm2 = vcmp.eq.s32.totalorder %v3257_v10, %v6400_v19  ;;  %vm6401_vm7 = vnez %v6315_v28  ;;  %v6660_v19 = vmov 0 }
 0x229   :  { %vm4452_vm11 = vmor %vm1021_vm5, %vm1405_vm3  ;;  %vm6405_vm3 = vcmp.eq.s32.totalorder %v4411_v9, 1 }
 0x22a   :  { %v6398_v59 = vsel %vm4452_vm11, 4294967295, %v6397_v59  ;;  %vm6402_vm4 = vmor %vm6390_vm1, %vm6401_vm7 }
 0x22b   :  { %vm4466_vm14 = vmor %vm6402_vm4, %vm1404_vm10  ;;  %vm257_vm10 = vcmp.eq.s32.totalorder %v3257_v10, %v6412_v1 }
 0x22c   :  { %vm1437_vm5 = vmand %vm1245_vm13, %vm6405_vm3  ;;  %vm6419_vm3 = vcmp.eq.s32.totalorder %v6399_v29, 1  ;;  %v6543_v29 = vld [vmem:[#allocation27_spill] sm:$0xff] }
 0x22d   :  { %vm4476_vm6 = vmand %vm737_vm2, %vm6406_vm15  ;;  %vm6424_vm2 = vnez %v6371_v8  ;;  %v6497_v8 = vmov 0 }
 0x22e   :  { %v6408_v45 = vsel %vm4476_vm6, 4294967295, %v6407_v45  ;;  %vm4482_vm11 = vmand %vm1214_vm9, %vm6409_vm12 }
 0x22f   :  { %vm6413_vm13 = vmmov %vm6406_vm15 }
 0x230   :  { %vm4490_vm4 = vmand %vm736_vm0, %vm6413_vm13  ;;  %vm6423_vm13 = vnez %v6323_v62  ;;  %vm6441_vm0 = vnez %v6327_v2  ;;  %v6447_v62 = vmov 0  ;;  %v4569_v2 = vpop.permute.xlu0 %1132 }
 0x231   :  { %v6415_v50 = vsel %vm4490_vm4, 4294967295, %v6414_v50  ;;  %vm6418_vm7 = vmmov %vm6409_vm12  ;;  %vm256_vm12 = vcmp.eq.s32.totalorder %v3246_v40, %v6412_v1  ;;  %v6675_v1 = vld [vmem:[#allocation45_spill] sm:$0xff] }
 0x232   :  { %vm1407_vm9 = vmand %vm1215_vm8, %vm6418_vm7  ;;  %vm739_vm7 = vcmp.eq.s32.totalorder %v3257_v10, %v6438_v56 }
 0x233   :  { %vm4506_vm6 = vmand %vm257_vm10, %vm6419_vm3 }
 0x234   :  { %v6421_v49 = vsel %vm4506_vm6, 4294967295, %v6420_v49  ;;  %vm6425_vm4 = vmor %vm6423_vm13, %vm6424_vm2  ;;  %vm6436_vm13 = vnez %v6375_v18  ;;  %v6502_v18 = vmov 0 }
 0x235   :  { %vm4516_vm15 = vmor %vm6425_vm4, %vm1437_vm5  ;;  %vm6435_vm4 = vnez %v6333_v60  ;;  %vm6440_vm5 = vnez %v6342_v26  ;;  %v6452_v60 = vmov 0  ;;  %v6469_v26 = vmov 0 }
 0x236   :  { %vm6429_vm10 = vmmov %vm6419_vm3  ;;  %v2055_v57 = vsel %vm4516_vm15, 1.0, %v2235_v21 }
 0x237   :  { %vm4524_vm3 = vmand %vm256_vm12, %vm6429_vm10  ;;  %vm6439_vm12 = vnez %v6398_v59  ;;  %vm1247_vm10 = vcmp.eq.s32.totalorder %v3257_v10, %v3735_v4 }
 0x238   :  { %v6431_v3 = vsel %vm4524_vm3, 4294967295, %v6430_v3  ;;  %vm6437_vm8 = vmor %vm6435_vm4, %vm6436_vm13  ;;  %v2023_v44 = vsel %vm6439_vm12, 1.0, %v2235_v21  ;;  %vm6446_vm4 = vcmp.eq.s32.totalorder %v6422_v15, 1  ;;  %v6558_v15 = vld [vmem:[#allocation26_spill] sm:$0xff] }
 0x239   :  { %vm1471_vm1 = vmor %vm6437_vm8, %vm1407_vm9  ;;  %vm289_vm9 = vcmp.eq.s32.totalorder %v3257_v10, %v6445_v63  ;;  %vm738_vm8 = vcmp.eq.s32.totalorder %v3246_v40, %v6438_v56  ;;  %v6569_v56 = vld [vmem:[#allocation63_spill] sm:$0xff] }
 0x23a   :  { %vm6442_vm6 = vmor %vm6440_vm5, %vm6441_vm0  ;;  %v2025_v28 = vsel %vm1471_vm1, 1.0, %v2235_v21  ;;  %vm259_vm0 = vcmp.eq.s32.totalorder %v3257_v10, %v6450_v52  ;;  %vm6451_vm5 = vcmp.eq.s32.totalorder %v6432_v25, 1 }
 0x23b   :  { %vm4552_vm2 = vmor %vm6442_vm6, %vm4482_vm11  ;;  %vm1246_vm6 = vcmp.eq.s32.totalorder %v3246_v40, %v3735_v4  ;;  %v1655_v32 = vpack.c.bf16 %v2025_v28, %v2023_v44  ;;  %vm6449_vm11 = vcmp.eq.s32.totalorder %v3847_v22, 1  ;;  %v6458_v4 = vmov 0  ;;  %v4608_v22 = vpop.permute.xlu1 %1135 }
 0x23c   :  { %vm4563_vm13 = vmand %vm739_vm7, %vm6446_vm4  ;;  %v6570_v44 = vmov 0  ;;  %v6573_v28 = vmov 0 }
 0x23d   :  { %v6448_v62 = vsel %vm4563_vm13, 4294967295, %v6447_v62  ;;  %vm1439_vm1 = vmand %vm1247_vm10, %vm6449_vm11  ;;  %vm258_vm10 = vcmp.eq.s32.totalorder %v3246_v40, %v6450_v52  ;;  %v6585_v52 = vmov 0 }
 0x23e   :  { %vm4577_vm12 = vmand %vm289_vm9, %vm6451_vm5  ;;  %vm6460_vm9 = vcmp.eq.s32.totalorder %v6428_v6, 1  ;;  %vm6464_vm5 = vnez %v6366_v38  ;;  %v1290_v38 = vpop.permute.xlu0 %1289  ;;  %v6561_v6 = vld [vmem:[#allocation73_spill] sm:$0xff] }
 0x23f   :  { %v6453_v60 = vsel %vm4577_vm12, 4294967295, %v6452_v60  ;;  %vm6454_vm7 = vmmov %vm6446_vm4  ;;  %v4678_v46 = vpop.permute.xlu1 %1183 }
 0x240   :  { %vm4583_vm4 = vmand %vm738_vm8, %vm6454_vm7  ;;  %vm5767_vm8 = vcmp.eq.s32.totalorder %v6463_v12, 1  ;;  %vm6465_vm7 = vnez %v6386_v43 }
 0x241   :  { %v6456_v33 = vsel %vm4583_vm4, 4294967295, %v6455_v33  ;;  %vm6457_vm13 = vmmov %vm6449_vm11 }
 0x242   :  { %vm4589_vm3 = vmand %vm1246_vm6, %vm6457_vm13  ;;  %vm6467_vm6 = vcmask 130048  }
 0x243   :  { %v6459_v4 = vsel %vm4589_vm3, 4294967295, %v6458_v4  ;;  %vm4597_vm11 = vmand %vm259_vm0, %vm6460_vm9  ;;  %2092 = vmatprep.mubr.msk.bf16.mxu0 %vm6467_vm6, %v1655_v32  ;;  %vm5769_vm0 = vcmp.eq.s32.totalorder %v6471_v58, 1  ;;  %v6582_v32 = vmov 0 }
 0x244   :  { %v6462_v0 = vsel %vm4597_vm11, 4294967295, %v6461_v0  ;;  %vm6466_vm4 = vmor %vm6464_vm5, %vm6465_vm7  ;;  %vm6475_vm15 = vnez %v6459_v4  ;;  %vm6476_vm7 = vnez %v6378_v55  ;;  %v6506_v55 = vmov 0 }
 0x245   :  { %vm1503_vm13 = vmor %vm6466_vm4, %vm1439_vm1 }
 0x246   :  { %vm6468_vm12 = vmmov %vm6460_vm9  ;;  %vm1244_vm9 = vcmp.eq.s32.totalorder %v3246_v40, %v3648_v14  ;;  %v2057_v5 = vsel %vm1503_vm13, 1.0, %v2235_v21  ;;  %v6474_v14 = vld [vmem:[#allocation81_spill] sm:$0xff]  ;;  %vm6477_vm13 = vnez %v6383_v36  ;;  %v4740_v36 = vpop.permute.xlu1 %1186 }
 0x247   :  { %vm4612_vm3 = vmand %vm258_vm10, %vm6468_vm12  ;;  %vm6472_vm12 = vcmp.eq.s32.totalorder %v4411_v9, 1  ;;  %v1671_v17 = vpack.c.bf16 %v2057_v5, %v2055_v57  ;;  %vm291_vm10 = vcmp.eq.s32.totalorder %v3257_v10, %v6473_v31  ;;  %vm769_vm5 = vcmp.eq.s32.totalorder %v3257_v10, %v6474_v14  ;;  %v6537_v9 = vld [vmem:[#allocation53_spill] sm:$0xff] }
 0x248   :  { %v6470_v26 = vsel %vm4612_vm3, 4294967295, %v6469_v26  ;;  %vm2093_vm1 = vmpackc.low %vm4552_vm2, %vm4466_vm14  ;;  %v6599_v57 = vmov 0 }
 0x249   :  { %vm1436_vm4 = vmand %vm1244_vm9, %vm6472_vm12  ;;  %2094 = vmatmul.mubr.msk.bf16.gmra.mrb[12].mxu0 %vm2093_vm1, %v2236_v61 }
 0x24a   :  { %vm6478_vm6 = vmor %vm6476_vm7, %vm6477_vm13  ;;  %vm6493_vm13 = vcmp.eq.s32.totalorder %v6463_v12, 1  ;;  %v4786_v43 = vpop.permute.xlu1 %1298  ;;  %v6593_v12 = vmov 0 }
 0x24b   :  { %vm4641_vm14 = vmor %vm6478_vm6, %vm6475_vm15  ;;  %vm6487_vm15 = vcmask 130048   ;;  %vm6490_vm6 = vnez %v6389_v20 }
 0x24c   :  { %vm4647_vm2 = vmand %vm291_vm10, %vm5767_vm8  ;;  %2116 = vmatprep.mubr.msk.bf16.mxu1 %vm6487_vm15, %v1671_v17  ;;  %vm6491_vm8 = vnez %v6380_v7  ;;  %v6513_v7 = vmov 0  ;;  %vm6517_vm10 = vnez %v6408_v45  ;;  %v6602_v17 = vld [vmem:[#allocation11_spill] sm:$0xff] }
 0x24d   :  { %v6482_v11 = vsel %vm4647_vm2, 4294967295, %v6481_v11  ;;  %vm4657_vm3 = vmand %vm769_vm5, %vm5769_vm0  ;;  %vm290_vm5 = vcmp.eq.s32.totalorder %v3246_v40, %v6473_v31  ;;  %vm768_vm0 = vcmp.eq.s32.totalorder %v3246_v40, %v6474_v14  ;;  %v6608_v31 = vmov 0 }
 0x24e   :  { %v6486_v24 = vsel %vm4657_vm3, 4294967295, %v6485_v24  ;;  %vm6492_vm2 = vmor %vm6490_vm6, %vm6491_vm8  ;;  %vm6496_vm8 = vcmp.eq.s32.totalorder %v6471_v58, 1  ;;  %vm6516_vm6 = vnez %v6421_v49  ;;  %vm6520_vm3 = vnez %v6415_v50  ;;  %v4842_v49 = vpop.permute.xlu1 %1346  ;;  %v6597_v58 = vld [vmem:[#allocation83_spill] sm:$0xff] }
 0x24f   :  { %vm1500_vm12 = vmor %vm6492_vm2, %vm1436_vm4  ;;  %vm6512_vm2 = vcmp.eq.s32.totalorder %v3914_v41, 1  ;;  %v6613_v14 = vmov 0 }
 0x250   :  { %vm2117_vm15 = vmpackc.low %vm4641_vm14, %vm1500_vm12  ;;  %vm1217_vm14 = vcmp.eq.s32.totalorder %v3257_v10, %v4000_v53  ;;  %vm288_vm12 = vcmp.eq.s32.totalorder %v3246_v40, %v6445_v63  ;;  %v6575_v63 = vld [vmem:[#allocation62_spill] sm:$0xff] }
 0x251   :  { %vm4682_vm7 = vmand %vm290_vm5, %vm6493_vm13  ;;  %2118 = vmatmul.mubr.msk.bf16.gmra.mrb[12].mxu1 %vm2117_vm15, %v2236_v61  ;;  %vm771_vm13 = vcmp.eq.s32.totalorder %v3257_v10, %v6499_v23  ;;  %vm1216_vm5 = vcmp.eq.s32.totalorder %v3246_v40, %v4000_v53  ;;  %v1338_v53 = vpop.permute.xlu0 %1337 }
 0x252   :  { %v6495_v51 = vsel %vm4682_vm7, 4294967295, %v6494_v51  ;;  %vm4688_vm4 = vmand %vm768_vm0, %vm6496_vm8  ;;  %vm6501_vm8 = vcmp.eq.s32.totalorder %v6432_v25, 1  ;;  %vm6519_vm0 = vnez %v6431_v3  ;;  %v6567_v25 = vmov 0 }
 0x253   :  { %v6498_v8 = vsel %vm4688_vm4, 4294967295, %v6497_v8  ;;  %vm4707_vm15 = vmand %vm288_vm12, %vm6501_vm8  ;;  %vm6505_vm4 = vcmp.eq.s32.totalorder %v3914_v41, 1  ;;  %vm6510_vm12 = vcmp.eq.s32.totalorder %v1290_v38, 1  ;;  %v6522_v41 = vmov 0  ;;  %v6625_v38 = vld [vmem:[#allocation15_spill] sm:$0xff] }
 0x254   :  { %v6503_v18 = vsel %vm4707_vm15, 4294967295, %v6502_v18  ;;  %vm4717_vm7 = vmand %vm771_vm13, %vm6505_vm4  ;;  %vm770_vm15 = vcmp.eq.s32.totalorder %v3246_v40, %v6499_v23  ;;  %vm1249_vm4 = vcmp.eq.s32.totalorder %v3257_v10, %v4094_v34  ;;  %vm1218_vm13 = vcmp.eq.s32.totalorder %v3246_v40, %v4569_v2  ;;  %v6635_v23 = vld [vmem:[#allocation75_spill] sm:$0xff] }
 0x255   :  { %v6507_v55 = vsel %vm4717_vm7, 4294967295, %v6506_v55  ;;  %vm1409_vm8 = vmand %vm1217_vm14, %vm6510_vm12  ;;  %vm1369_vm14 = vcmp.eq.s32.totalorder %v4241_v42, 1  ;;  %v1139_v27 = vpop.permute.xlu0 %1138  ;;  %v6645_v42 = vld [vmem:[#allocation29_spill] sm:$0xff] }
 0x256   :  { %vm6511_vm1 = vmmov %vm6510_vm12  ;;  %vm1219_vm12 = vcmp.eq.s32.totalorder %v3257_v10, %v4569_v2  ;;  %v6580_v2 = vld [vmem:[#allocation42_spill] sm:$0xff] }
 0x257   :  { %vm1408_vm9 = vmand %vm1216_vm5, %vm6511_vm1  ;;  %vm6524_vm5 = vcmp.eq.s32.totalorder %v1338_v53, 1 }
 0x258   :  { %vm4735_vm11 = vmand %vm770_vm15, %vm6512_vm2 }
 0x259   :  { %v6514_v7 = vsel %vm4735_vm11, 4294967295, %v6513_v7  ;;  %vm6518_vm2 = vmor %vm6516_vm6, %vm6517_vm10  ;;  %v1296_v4 = vpop.permute.xlu0 %1295 }
 0x25a   :  { %vm1473_vm15 = vmor %vm6518_vm2, %vm1409_vm8  ;;  %vm6534_vm8 = vnez %v6462_v0  ;;  %v6591_v0 = vmov 0 }
 0x25b   :  { %vm6521_vm11 = vmor %vm6519_vm0, %vm6520_vm3  ;;  %vm6527_vm3 = vnez %v6453_v60  ;;  %v2027_v20 = vsel %vm1473_vm15, 1.0, %v2235_v21  ;;  %vm260_vm15 = vcmp.eq.s32.totalorder %v3246_v40, %v6543_v29  ;;  %v6588_v60 = vmov 0 }
 0x25c   :  { %vm4758_vm1 = vmor %vm6521_vm11, %vm1408_vm9  ;;  %vm6528_vm9 = vnez %v6486_v24 }
 0x25d   :  { %v6523_v41 = vsel %vm4758_vm1, 4294967295, %v6522_v41  ;;  %vm1441_vm7 = vmand %vm1249_vm4, %vm6524_vm5  ;;  %vm1385_vm4 = vcmp.eq.s32.totalorder %v4358_v39, 1 }
 0x25e   :  { %vm1410_vm6 = vmand %vm1218_vm13, %vm1369_vm14 }
 0x25f   :  { %vm1411_vm0 = vmand %vm1219_vm12, %vm1369_vm14  ;;  %vm6535_vm14 = vnez %v6448_v62  ;;  %v6579_v62 = vld [vmem:[#allocation43_spill] sm:$0xff] }
 0x260   :  { %vm6529_vm11 = vmor %vm6527_vm3, %vm6528_vm9  ;;  %vm1251_vm3 = vcmp.eq.s32.totalorder %v3257_v10, %v4171_v30  ;;  %vm6538_vm9 = vnez %v6470_v26  ;;  %v6595_v26 = vmov 0 }
 0x261   :  { %vm4772_vm1 = vmor %vm6529_vm11, %vm1441_vm7  ;;  %vm442_vm7 = vcmp.eq.s32.totalorder %v6537_v9, 1  ;;  %vm6539_vm11 = vnez %v6456_v33  ;;  %v4923_v33 = vpop.permute.xlu1 %856  ;;  %v6649_v9 = vmov 0 }
 0x262   :  { %vm6536_vm12 = vmor %vm6534_vm8, %vm6535_vm14  ;;  %vm1250_vm8 = vcmp.eq.s32.totalorder %v3246_v40, %v4171_v30  ;;  %vm1248_vm14 = vcmp.eq.s32.totalorder %v3246_v40, %v4094_v34  ;;  %v6552_v30 = vld [vmem:[#allocation52_spill] sm:$0xff]  ;;  %v6553_v34 = vld [vmem:[#allocation9_spill] sm:$0xff]  ;;  %v2059_v45 = vsel %vm4772_vm1, 1.0, %v2235_v21  ;;  %vm263_vm1 = vcmp.eq.s32.totalorder %v3257_v10, %v6558_v15 }
 0x263   :  { %vm1475_vm10 = vmor %vm6536_vm12, %vm1411_vm0  ;;  %vm443_vm13 = vcmp.eq.s32.totalorder %v6552_v30, 1  ;;  %v6666_v30 = vmov 0 }
 0x264   :  { %vm6540_vm2 = vmor %vm6538_vm9, %vm6539_vm11  ;;  %v2029_v35 = vsel %vm1475_vm10, 1.0, %v2235_v21  ;;  %vm6548_vm10 = vnez %v6482_v11  ;;  %vm6551_vm11 = vcmask 130048   ;;  %v6619_v11 = vld [vmem:[#allocation5_spill] sm:$0xff] }
 0x265   :  { %vm4797_vm5 = vmor %vm6540_vm2, %vm1410_vm6  ;;  %v1657_v59 = vpack.c.bf16 %v2029_v35, %v2027_v20  ;;  %vm6549_vm2 = vnez %v6507_v55  ;;  %v4974_v5 = vpop.permute.xlu1 %901  ;;  %v6755_v55 = vld [vmem:[#allocation77_spill] sm:$0xff] }
 0x266   :  { %vm1443_vm0 = vmand %vm1251_vm3, %vm1385_vm4 }
 0x267   :  { %vm4808_vm12 = vmand %vm1250_vm8, %vm1385_vm4  ;;  %2095 = vmatprep.mubr.msk.bf16.mxu0 %vm6551_vm11, %v1657_v59  ;;  %vm5777_vm4 = vcmp.eq.s32.totalorder %v6553_v34, 1  ;;  %vm6554_vm8 = vnez %v6523_v41 }
 0x268   :  { %vm4814_vm6 = vmand %vm260_vm15, %vm442_vm7 }
 0x269   :  { %vm6550_vm3 = vmor %vm6548_vm10, %vm6549_vm2  ;;  %vm6555_vm10 = vcmp.eq.s32.totalorder %v1338_v53, 1  ;;  %v5022_v24 = vpop.permute.xlu1 %1141 }
 0x26a   :  { %vm1507_vm9 = vmor %vm6550_vm3, %vm1443_vm0  ;;  %vm261_vm0 = vcmp.eq.s32.totalorder %v3257_v10, %v6543_v29  ;;  %v6658_v29 = vld [vmem:[#allocation28_spill] sm:$0xff] }
 0x26b   :  { %v2061_v16 = vsel %vm1507_vm9, 1.0, %v2235_v21  ;;  %vm2096_vm15 = vmpackc.low %vm4797_vm5, %vm6554_vm8  ;;  %vm740_vm5 = vcmp.eq.s32.totalorder %v3246_v40, %v6561_v6  ;;  %vm6563_vm9 = vnez %v6514_v7  ;;  %v6643_v7 = vmov 0 }
 0x26c   :  { %vm4837_vm2 = vmand %vm1248_vm14, %vm6555_vm10  ;;  %v1673_v50 = vpack.c.bf16 %v2061_v16, %v2059_v45  ;;  %2097 = vmatmul.mubr.msk.bf16.gmra.mrb[16].mxu0 %vm2096_vm15, %v2236_v61  ;;  %vm6562_vm14 = vnez %v6495_v51  ;;  %v6672_v45 = vmov 0  ;;  %v6674_v16 = vld [vmem:[#allocation64_spill] sm:$0xff]  ;;  %v6748_v51 = vmov 0 }
 0x26d   :  { %vm4848_vm3 = vmand %vm261_vm0, %vm442_vm7  ;;  %vm262_vm7 = vcmp.eq.s32.totalorder %v3246_v40, %v6558_v15  ;;  %vm293_vm0 = vcmp.eq.s32.totalorder %v3257_v10, %v6579_v62  ;;  %v6678_v15 = vmov 0 }
 0x26e   :  { %v6560_v13 = vsel %vm4848_vm3, 4294967295, %v6559_v13  ;;  %vm6564_vm11 = vmor %vm6562_vm14, %vm6563_vm9  ;;  %vm6576_vm9 = vnez %v6503_v18 }
 0x26f   :  { %vm4861_vm8 = vmor %vm6564_vm11, %vm4808_vm12  ;;  %vm6572_vm12 = vcmask 130048  }
 0x270   :  { %vm4869_vm15 = vmand %vm263_vm1, %vm443_vm13  ;;  %2119 = vmatprep.mubr.msk.bf16.mxu1 %vm6572_vm12, %v1673_v50 }
 0x271   :  { %v6568_v25 = vsel %vm4869_vm15, 4294967295, %v6567_v25  ;;  %vm4876_vm10 = vmand %vm740_vm5, %vm5777_vm4  ;;  %vm6577_vm5 = vnez %v6498_v8  ;;  %vm1222_vm15 = vcmp.eq.s32.totalorder %v3246_v40, %v1139_v27  ;;  %v6631_v8 = vld [vmem:[#allocation55_spill] sm:$0xff] }
 0x272   :  { %v6571_v44 = vsel %vm4876_vm10, 4294967295, %v6570_v44  ;;  %vm4883_vm14 = vmand %vm262_vm7, %vm443_vm13  ;;  %vm295_vm13 = vcmp.eq.s32.totalorder %v3257_v10, %v6580_v2  ;;  %vm6581_vm7 = vcmp.eq.s32.totalorder %v6569_v56, 1  ;;  %vm1221_vm10 = vcmp.eq.s32.totalorder %v3257_v10, %v4608_v22 }
 0x273   :  { %v6574_v28 = vsel %vm4883_vm14, 4294967295, %v6573_v28  ;;  %vm6578_vm11 = vmor %vm6576_vm9, %vm6577_vm5  ;;  %vm741_vm14 = vcmp.eq.s32.totalorder %v3257_v10, %v6561_v6  ;;  %vm6584_vm9 = vcmp.eq.s32.totalorder %v6575_v63, 1  ;;  %v6683_v6 = vmov 0 }
 0x274   :  { %vm1504_vm4 = vmor %vm6578_vm11, %vm4837_vm2  ;;  %vm923_vm2 = vcmp.eq.s32.totalorder %v4435_v48, 1  ;;  %v6590_v48 = vld [vmem:[#allocation74_spill] sm:$0xff] }
 0x275   :  { %vm2120_vm12 = vmpackc.low %vm4861_vm8, %vm1504_vm4  ;;  %vm6587_vm4 = vcmp.eq.s32.totalorder %v6553_v34, 1  ;;  %vm743_vm11 = vcmp.eq.s32.totalorder %v3257_v10, %v6590_v48  ;;  %v6668_v34 = vld [vmem:[#allocation65_spill] sm:$0xff] }
 0x276   :  { %vm4903_vm1 = vmand %vm293_vm0, %vm6581_vm7  ;;  %2121 = vmatmul.mubr.msk.bf16.gmra.mrb[16].mxu1 %vm2120_vm12, %v2236_v61  ;;  %vm294_vm12 = vcmp.eq.s32.totalorder %v3246_v40, %v6580_v2  ;;  %vm773_vm7 = vcmp.eq.s32.totalorder %v3257_v10, %v6597_v58 }
 0x277   :  { %v6583_v32 = vsel %vm4903_vm1, 4294967295, %v6582_v32  ;;  %vm4913_vm5 = vmand %vm295_vm13, %vm6584_vm9  ;;  %vm6611_vm1 = vnez %v6571_v44  ;;  %v6690_v44 = vmov 0 }
 0x278   :  { %v6586_v52 = vsel %vm4913_vm5, 4294967295, %v6585_v52  ;;  %vm4919_vm8 = vmand %vm741_vm14, %vm6587_vm4  ;;  %vm742_vm14 = vcmp.eq.s32.totalorder %v3246_v40, %v6590_v48  ;;  %vm1253_vm5 = vcmp.eq.s32.totalorder %v3257_v10, %v4678_v46  ;;  %v6713_v48 = vmov 0 }
 0x279   :  { %v6589_v60 = vsel %vm4919_vm8, 4294967295, %v6588_v60  ;;  %vm4935_vm13 = vmand %vm743_vm11, %vm923_vm2 }
 0x27a   :  { %v6592_v0 = vsel %vm4935_vm13, 4294967295, %v6591_v0  ;;  %vm4942_vm4 = vmand %vm294_vm12, %vm6584_vm9  ;;  %vm1220_vm12 = vcmp.eq.s32.totalorder %v3246_v40, %v4608_v22  ;;  %vm1370_vm9 = vcmp.eq.s32.totalorder %v1296_v4, 1  ;;  %v1344_v22 = vpop.permute.xlu0 %1343  ;;  %v6715_v4 = vld [vmem:[#allocation6_spill] sm:$0xff] }
 0x27b   :  { %v6594_v12 = vsel %vm4942_vm4, 4294967295, %v6593_v12  ;;  %vm4946_vm0 = vmand %vm742_vm14, %vm923_vm2  ;;  %vm6598_vm14 = vcmp.eq.s32.totalorder %v4500_v47, 1  ;;  %vm6615_vm2 = vcmp.eq.s32.totalorder %v1344_v22, 1 }
 0x27c   :  { %v6596_v26 = vsel %vm4946_vm0, 4294967295, %v6595_v26  ;;  %vm4966_vm4 = vmand %vm773_vm7, %vm6598_vm14  ;;  %vm1371_vm14 = vcmp.eq.s32.totalorder %v4786_v43, 1  ;;  %vm6605_vm0 = vnez %v6560_v13  ;;  %vm772_vm7 = vcmp.eq.s32.totalorder %v3246_v40, %v6597_v58 }
 0x27d   :  { %v6600_v57 = vsel %vm4966_vm4, 4294967295, %v6599_v57  ;;  %vm1413_vm8 = vmand %vm1221_vm10, %vm1370_vm9  ;;  %v6680_v13 = vmov 0  ;;  %v6760_v43 = vmov 0 }
 0x27e   :  { %vm1412_vm3 = vmand %vm1220_vm12, %vm1370_vm9  ;;  %vm6606_vm12 = vnez %v6589_v60  ;;  %v1145_v35 = vpop.permute.xlu0 %1144  ;;  %v6709_v60 = vmov 0 }
 0x27f   :  { %vm6607_vm9 = vmor %vm6605_vm0, %vm6606_vm12  ;;  %vm6616_vm12 = vcmp.eq.s32.totalorder %v4500_v47, 1  ;;  %v6623_v47 = vmov 0 }
 0x280   :  { %vm4992_vm11 = vmor %vm6607_vm9, %vm1413_vm8  ;;  %vm1223_vm8 = vcmp.eq.s32.totalorder %v3257_v10, %v1139_v27  ;;  %v6692_v27 = vmov 0 }
 0x281   :  { %v6609_v31 = vsel %vm4992_vm11, 4294967295, %v6608_v31  ;;  %vm6610_vm4 = vmmov %vm4814_vm6  ;;  %vm292_vm11 = vcmp.eq.s32.totalorder %v3246_v40, %v6579_v62  ;;  %v6696_v62 = vmov 0 }
 0x282   :  { %vm6612_vm6 = vmor %vm6610_vm4, %vm6611_vm1  ;;  %v1302_v3 = vpop.permute.xlu0 %1301 }
 0x283   :  { %vm5004_vm10 = vmor %vm6612_vm6, %vm1412_vm3  ;;  %vm6621_vm6 = vnez %v6594_v12 }
 0x284   :  { %v6614_v14 = vsel %vm5004_vm10, 4294967295, %v6613_v14  ;;  %vm1445_vm0 = vmand %vm1253_vm5, %vm6615_vm2  ;;  %vm6622_vm5 = vcmp.eq.s32.totalorder %v6569_v56, 1  ;;  %v6687_v56 = vmov 0 }
 0x285   :  { %vm5012_vm9 = vmand %vm772_vm7, %vm6616_vm12  ;;  %vm6627_vm12 = vnez %v6600_v57  ;;  %vm744_vm7 = vcmp.eq.s32.totalorder %v3246_v40, %v6635_v23 }
 0x286   :  { %v6618_v54 = vsel %vm5012_vm9, 4294967295, %v6617_v54  ;;  %vm1414_vm13 = vmand %vm1222_vm15, %vm1371_vm14  ;;  %vm6626_vm15 = vnez %v6583_v32  ;;  %v1350_v2 = vpop.permute.xlu0 %1349  ;;  %v6698_v32 = vld [vmem:[#allocation90_spill] sm:$0xff] }
 0x287   :  { %vm1415_vm4 = vmand %vm1223_vm8, %vm1371_vm14  ;;  %vm1387_vm14 = vcmp.eq.s32.totalorder %v4842_v49, 1  ;;  %v6676_v49 = vld [vmem:[#allocation44_spill] sm:$0xff] }
 0x288   :  { %vm5026_vm2 = vmand %vm292_vm11, %vm6622_vm5  ;;  %vm6632_vm11 = vnez %v6568_v25  ;;  %vm6633_vm5 = vnez %v6592_v0  ;;  %v6686_v25 = vld [vmem:[#allocation76_spill] sm:$0xff]  ;;  %v6719_v0 = vmov 0 }
 0x289   :  { %v6624_v47 = vsel %vm5026_vm2, 4294967295, %v6623_v47  ;;  %vm6628_vm9 = vmor %vm6626_vm15, %vm6627_vm12  ;;  %vm6636_vm15 = vnez %v6609_v31  ;;  %vm6638_vm12 = vnez %v6596_v26  ;;  %v6743_v31 = vld [vmem:[#allocation57_spill] sm:$0xff] }
 0x28a   :  { %vm5036_vm10 = vmor %vm6628_vm9, %vm1445_vm0  ;;  %v2031_v18 = vsel %vm6636_vm15, 1.0, %v2235_v21  ;;  %vm1255_vm0 = vcmp.eq.s32.totalorder %v3257_v10, %v4740_v36  ;;  %vm6637_vm9 = vnez %v6574_v28  ;;  %vm264_vm15 = vcmp.eq.s32.totalorder %v3246_v40, %v6645_v42  ;;  %v6694_v28 = vld [vmem:[#allocation84_spill] sm:$0xff] }
 0x28b   :  { %vm6634_vm3 = vmor %vm6632_vm11, %vm6633_vm5  ;;  %vm1254_vm11 = vcmp.eq.s32.totalorder %v3246_v40, %v4740_v36  ;;  %v5092_v36 = vpop.permute.xlu1 %1189  ;;  %v2063_v20 = vsel %vm5036_vm10, 1.0, %v2235_v21  ;;  %vm6659_vm10 = vcmp.eq.s32.totalorder %v6631_v8, 1 }
 0x28c   :  { %vm1479_vm2 = vmor %vm6634_vm3, %vm1415_vm4  ;;  %vm6642_vm3 = vcmp.eq.s32.totalorder %v6625_v38, 1 }
 0x28d   :  { %vm6639_vm8 = vmor %vm6637_vm9, %vm6638_vm12  ;;  %v2033_v53 = vsel %vm1479_vm2, 1.0, %v2235_v21  ;;  %vm6648_vm2 = vcmp.eq.s32.totalorder %v6631_v8, 1  ;;  %vm6651_vm9 = vnez %v6586_v52  ;;  %v6704_v52 = vmov 0  ;;  %v6750_v8 = vld [vmem:[#allocation67_spill] sm:$0xff] }
 0x28e   :  { %vm5059_vm1 = vmor %vm6639_vm8, %vm1414_vm13  ;;  %v1659_v41 = vpack.c.bf16 %v2033_v53, %v2031_v18  ;;  %vm1252_vm13 = vcmp.eq.s32.totalorder %v3246_v40, %v4678_v46  ;;  %v6655_v46 = vld [vmem:[#allocation54_spill] sm:$0xff]  ;;  %v6753_v18 = vmov 0  ;;  %v6756_v53 = vld [vmem:[#allocation47_spill] sm:$0xff] }
 0x28f   :  { %vm5066_vm4 = vmand %vm744_vm7, %vm6642_vm3  ;;  %v1193_v50 = vpop.permute.xlu1 %1192 }
 0x290   :  { %v6644_v7 = vsel %vm5066_vm4, 4294967295, %v6643_v7  ;;  %vm1447_vm5 = vmand %vm1255_vm0, %vm1387_vm14  ;;  %vm6652_vm0 = vnez %v6602_v17  ;;  %vm6654_vm4 = vcmask 130048  }
 0x291   :  { %vm5076_vm8 = vmand %vm1254_vm11, %vm1387_vm14  ;;  %2098 = vmatprep.mubr.msk.bf16.mxu0 %vm6654_vm4, %v1659_v41  ;;  %vm445_vm14 = vcmp.eq.s32.totalorder %v6655_v46, 1  ;;  %vm6656_vm11 = vnez %v6614_v14  ;;  %vm6657_vm4 = vcmp.eq.s32.totalorder %v1344_v22, 1  ;;  %v5322_v14 = vpop.permute.xlu0 %1150  ;;  %v6758_v41 = vmov 0 }
 0x292   :  { %vm5082_vm7 = vmand %vm264_vm15, %vm6648_vm2  ;;  %v6763_v46 = vmov 0 }
 0x293   :  { %v6650_v9 = vsel %vm5082_vm7, 4294967295, %v6649_v9  ;;  %vm6653_vm12 = vmor %vm6651_vm9, %vm6652_vm0  ;;  %vm267_vm9 = vcmp.eq.s32.totalorder %v3257_v10, %v6658_v29  ;;  %v1305_v63 = vpop.permute.xlu1 %1304 }
 0x294   :  { %vm1511_vm3 = vmor %vm6653_vm12, %vm1447_vm5  ;;  %vm265_vm5 = vcmp.eq.s32.totalorder %v3257_v10, %v6645_v42 }
 0x295   :  { %v2065_v39 = vsel %vm1511_vm3, 1.0, %v2235_v21  ;;  %vm2099_vm15 = vmpackc.low %vm5059_vm1, %vm6656_vm11  ;;  %vm6662_vm1 = vnez %v6619_v11  ;;  %vm266_vm3 = vcmp.eq.s32.totalorder %v3246_v40, %v6658_v29  ;;  %v6744_v11 = vld [vmem:[#allocation56_spill] sm:$0xff]  ;;  %v6773_v29 = vmov 0 }
 0x296   :  { %vm1444_vm2 = vmand %vm1252_vm13, %vm6657_vm4  ;;  %v1675_v59 = vpack.c.bf16 %v2065_v39, %v2063_v20  ;;  %2100 = vmatmul.mubr.msk.bf16.gmra.mrb[20].mxu0 %vm2099_vm15, %v2236_v61  ;;  %vm6670_vm4 = vnez %v6624_v47  ;;  %v6746_v47 = vld [vmem:[#allocation89_spill] sm:$0xff]  ;;  %v6765_v20 = vmov 0  ;;  %v6767_v39 = vmov 0 }
 0x297   :  { %vm5111_vm0 = vmand %vm265_vm5, %vm6659_vm10  ;;  %vm6669_vm5 = vnez %v6618_v54 }
 0x298   :  { %v6661_v19 = vsel %vm5111_vm0, 4294967295, %v6660_v19  ;;  %vm6663_vm12 = vmor %vm6621_vm6, %vm6662_vm1  ;;  %vm1257_vm0 = vcmp.eq.s32.totalorder %v3257_v10, %v5092_v36 }
 0x299   :  { %vm5122_vm13 = vmor %vm6663_vm12, %vm5076_vm8  ;;  %vm6671_vm8 = vcmask 130048   ;;  %vm297_vm12 = vcmp.eq.s32.totalorder %v3257_v10, %v6675_v1 }
 0x29a   :  { %vm5130_vm11 = vmand %vm267_vm9, %vm445_vm14  ;;  %2122 = vmatprep.mubr.msk.bf16.mxu1 %vm6671_vm8, %v1675_v59  ;;  %vm5791_vm9 = vcmp.eq.s32.totalorder %v6674_v16, 1  ;;  %v6770_v59 = vmov 0 }
 0x29b   :  { %v6667_v30 = vsel %vm5130_vm11, 4294967295, %v6666_v30  ;;  %vm1060_vm6 = vmor %vm6670_vm4, %vm6669_vm5  ;;  %vm299_vm5 = vcmp.eq.s32.totalorder %v3257_v10, %v6676_v49  ;;  %vm6677_vm4 = vcmp.eq.s32.totalorder %v6668_v34, 1 }
 0x29c   :  { %vm5142_vm10 = vmand %vm266_vm3, %vm445_vm14  ;;  %vm745_vm14 = vcmp.eq.s32.totalorder %v3257_v10, %v6635_v23  ;;  %vm6682_vm3 = vcmp.eq.s32.totalorder %v6625_v38, 1  ;;  %v6747_v38 = vld [vmem:[#allocation30_spill] sm:$0xff]  ;;  %v6751_v23 = vmov 0 }
 0x29d   :  { %v6673_v45 = vsel %vm5142_vm10, 4294967295, %v6672_v45  ;;  %vm1508_vm1 = vmor %vm1060_vm6, %vm1444_vm2  ;;  %vm925_vm2 = vcmp.eq.s32.totalorder %v4923_v33, 1  ;;  %v1353_v33 = vpop.permute.xlu1 %1352 }
 0x29e   :  { %vm2123_vm15 = vmpackc.low %vm5122_vm13, %vm1508_vm1  ;;  %vm1225_vm1 = vcmp.eq.s32.totalorder %v3257_v10, %v5022_v24 }
 0x29f   :  { %vm5155_vm8 = vmand %vm297_vm12, %vm6677_vm4  ;;  %2124 = vmatmul.mubr.msk.bf16.gmra.mrb[20].mxu1 %vm2123_vm15, %v2236_v61  ;;  %vm747_vm15 = vcmp.eq.s32.totalorder %v3257_v10, %v6686_v25  ;;  %vm746_vm4 = vcmp.eq.s32.totalorder %v3246_v40, %v6686_v25  ;;  %v6805_v25 = vmov 0 }
 0x2a0   :  { %v6679_v15 = vsel %vm5155_vm8, 4294967295, %v6678_v15  ;;  %vm5165_vm13 = vmand %vm299_vm5, %vm5791_vm9  ;;  %vm298_vm5 = vcmp.eq.s32.totalorder %v3246_v40, %v6676_v49  ;;  %vm6707_vm8 = vnez %v6644_v7  ;;  %v6757_v7 = vld [vmem:[#allocation66_spill] sm:$0xff]  ;;  %v6789_v49 = vld [vmem:[#allocation93_spill] sm:$0xff] }
 0x2a1   :  { %v6681_v13 = vsel %vm5165_vm13, 4294967295, %v6680_v13  ;;  %vm5171_vm6 = vmand %vm745_vm14, %vm6682_vm3  ;;  %vm6689_vm3 = vcmp.eq.s32.totalorder %v6674_v16, 1  ;;  %vm777_vm14 = vcmp.eq.s32.totalorder %v3257_v10, %v6694_v28  ;;  %v863_v17 = vpop.permute.xlu1 %862 }
 0x2a2   :  { %v6684_v6 = vsel %vm5171_vm6, 4294967295, %v6683_v6  ;;  %vm5185_vm9 = vmand %vm747_vm15, %vm925_vm2  ;;  %vm1226_vm15 = vcmp.eq.s32.totalorder %v3246_v40, %v1145_v35 }
 0x2a3   :  { %v6688_v56 = vsel %vm5185_vm9, 4294967295, %v6687_v56  ;;  %vm5192_vm13 = vmand %vm298_vm5, %vm6689_vm3  ;;  %vm1224_vm5 = vcmp.eq.s32.totalorder %v3246_v40, %v5022_v24  ;;  %vm1372_vm3 = vcmp.eq.s32.totalorder %v1302_v3, 1  ;;  %v6745_v24 = vld [vmem:[#allocation31_spill] sm:$0xff]  ;;  %v6800_v3 = vmov 0 }
 0x2a4   :  { %v6691_v44 = vsel %vm5192_vm13, 4294967295, %v6690_v44  ;;  %vm5196_vm12 = vmand %vm746_vm4, %vm925_vm2  ;;  %vm6695_vm4 = vcmp.eq.s32.totalorder %v4974_v5, 1  ;;  %vm776_vm2 = vcmp.eq.s32.totalorder %v3246_v40, %v6694_v28 }
 0x2a5   :  { %v6693_v27 = vsel %vm5196_vm12, 4294967295, %v6692_v27  ;;  %vm5216_vm13 = vmand %vm777_vm14, %vm6695_vm4  ;;  %vm1373_vm14 = vcmp.eq.s32.totalorder %v1305_v63, 1  ;;  %vm6701_vm12 = vnez %v6661_v19  ;;  %vm6711_vm4 = vcmp.eq.s32.totalorder %v1350_v2, 1  ;;  %v908_v54 = vpop.permute.xlu1 %907  ;;  %v6775_v19 = vld [vmem:[#allocation85_spill] sm:$0xff] }
 0x2a6   :  { %v6697_v62 = vsel %vm5216_vm13, 4294967295, %v6696_v62  ;;  %vm1417_vm7 = vmand %vm1225_vm1, %vm1372_vm3  ;;  %vm6702_vm1 = vnez %v6684_v6  ;;  %vm6706_vm13 = vnez %v6650_v9  ;;  %v1308_v9 = vpop.permute.xlu0 %1307  ;;  %v6797_v6 = vld [vmem:[#allocation92_spill] sm:$0xff] }
 0x2a7   :  { %vm1416_vm6 = vmand %vm1224_vm5, %vm1372_vm3 }
 0x2a8   :  { %vm6703_vm5 = vmor %vm6701_vm12, %vm6702_vm1  ;;  %vm6712_vm1 = vcmp.eq.s32.totalorder %v4974_v5, 1 }
 0x2a9   :  { %vm5239_vm3 = vmor %vm6703_vm5, %vm1417_vm7  ;;  %vm1227_vm7 = vcmp.eq.s32.totalorder %v3257_v10, %v1145_v35  ;;  %v1148_v42 = vpop.permute.xlu1 %1147  ;;  %v6769_v35 = vld [vmem:[#allocation78_spill] sm:$0xff] }
 0x2aa   :  { %v6705_v52 = vsel %vm5239_vm3, 4294967295, %v6704_v52  ;;  %vm6708_vm11 = vmor %vm6706_vm13, %vm6707_vm8  ;;  %vm296_vm3 = vcmp.eq.s32.totalorder %v3246_v40, %v6675_v1  ;;  %vm6724_vm8 = vnez %v6667_v30  ;;  %v6777_v30 = vmov 0  ;;  %v1356_v16 = vpop.permute.xlu0 %1355 }
 0x2ab   :  { %vm5251_vm10 = vmor %vm6708_vm11, %vm1416_vm6  ;;  %vm6725_vm11 = vnez %v6688_v56  ;;  %v6786_v1 = vmov 0  ;;  %v6810_v56 = vmov 0 }
 0x2ac   :  { %v6710_v60 = vsel %vm5251_vm10, 4294967295, %v6709_v60  ;;  %vm1449_vm12 = vmand %vm1257_vm0, %vm6711_vm4  ;;  %vm6718_vm0 = vcmp.eq.s32.totalorder %v6668_v34, 1  ;;  %vm1389_vm10 = vcmp.eq.s32.totalorder %v1353_v33, 1  ;;  %v6780_v34 = vmov 0 }
 0x2ad   :  { %vm5259_vm5 = vmand %vm776_vm2, %vm6712_vm1  ;;  %vm6721_vm2 = vnez %v6679_v15  ;;  %vm6722_vm1 = vnez %v6697_v62  ;;  %v1196_v37 = vpop.permute.xlu1 %1195 }
 0x2ae   :  { %v6714_v48 = vsel %vm5259_vm5, 4294967295, %v6713_v48  ;;  %vm1418_vm9 = vmand %vm1226_vm15, %vm1373_vm14 }
 0x2af   :  { %vm1419_vm6 = vmand %vm1227_vm7, %vm1373_vm14  ;;  %vm6727_vm14 = vnez %v6705_v52  ;;  %v1899_v52 = vpop.f32.mrb[0].mxu1 }
 0x2b0   :  { %vm5271_vm4 = vmand %vm296_vm3, %vm6718_vm0  ;;  %v2035_v12 = vsel %vm6727_vm14, 1.0, %v2235_v21  ;;  %vm1259_vm3 = vcmp.eq.s32.totalorder %v3257_v10, %v1193_v50  ;;  %vm6728_vm0 = vnez %v6673_v45  ;;  %v6783_v45 = vmov 0  ;;  %1978 = vst [vmem:[#allocation2 + $0x80] sm:$0xff] %v1899_v52  ;;  %v1901_v33 = vpop.f32.mrb[1].mxu1 }
 0x2b1   :  { %v6720_v0 = vsel %vm5271_vm4, 4294967295, %v6719_v0  ;;  %vm6723_vm15 = vmor %vm6721_vm2, %vm6722_vm1  ;;  %vm6729_vm4 = vnez %v6693_v27 }
 0x2b2   :  { %vm1513_vm5 = vmor %vm6723_vm15, %vm1449_vm12  ;;  %vm1258_vm12 = vcmp.eq.s32.totalorder %v3246_v40, %v1193_v50  ;;  %v1199_v50 = vpop.permute.xlu1 %1198 }
 0x2b3   :  { %vm6726_vm13 = vmor %vm6724_vm8, %vm6725_vm11  ;;  %vm1256_vm11 = vcmp.eq.s32.totalorder %v3246_v40, %v5092_v36  ;;  %v2067_v57 = vsel %vm1513_vm5, 1.0, %v2235_v21  ;;  %vm6741_vm5 = vnez %v6720_v0  ;;  %v6762_v36 = vld [vmem:[#allocation46_spill] sm:$0xff] }
 0x2b4   :  { %vm1483_vm7 = vmor %vm6726_vm13, %vm1419_vm6  ;;  %vm6731_vm13 = vnez %v6681_v13  ;;  %vm6732_vm6 = vnez %v6698_v32 }
 0x2b5   :  { %vm6730_vm1 = vmor %vm6728_vm0, %vm6729_vm4  ;;  %v2037_v26 = vsel %vm1483_vm7, 1.0, %v2235_v21  ;;  %vm6734_vm4 = vcmask 130048  }
 0x2b6   :  { %vm1482_vm2 = vmor %vm6730_vm1, %vm1418_vm9  ;;  %v1661_v58 = vpack.c.bf16 %v2037_v26, %v2035_v12  ;;  %vm6735_vm9 = vnez %v6710_v60  ;;  %v1311_v13 = vpop.permute.xlu1 %1310 }
 0x2b7   :  { %vm1451_vm15 = vmand %vm1259_vm3, %vm1389_vm10  ;;  %vm6736_vm3 = vcmp.eq.s32.totalorder %v1350_v2, 1 }
 0x2b8   :  { %vm1450_vm8 = vmand %vm1258_vm12, %vm1389_vm10  ;;  %2101 = vmatprep.mubr.msk.bf16.mxu0 %vm6734_vm4, %v1661_v58  ;;  %vm6737_vm10 = vnez %v6691_v44  ;;  %vm6738_vm12 = vnez %v6715_v4 }
 0x2b9   :  { %vm6733_vm14 = vmor %vm6731_vm13, %vm6732_vm6  ;;  %vm6740_vm6 = vnez %v6714_v48  ;;  %v1902_v48 = vpop.f32.mrb[2].mxu1 }
 0x2ba   :  { %vm1515_vm0 = vmor %vm6733_vm14, %vm1451_vm15  ;;  %v1359_v44 = vpop.permute.xlu1 %1358  ;;  %1979 = vst [vmem:[#allocation2 + $0x88] sm:$0xff] %v1902_v48  ;;  %v1904_v4 = vpop.f32.mrb[3].mxu1 }
 0x2bb   :  { %v2069_v5 = vsel %vm1515_vm0, 1.0, %v2235_v21  ;;  %vm2102_vm7 = vmpackc.low %vm1482_vm2, %vm6735_vm9  ;;  %vm447_vm9 = vcmp.eq.s32.totalorder %v6744_v11, 1 }
 0x2bc   :  { %vm1448_vm1 = vmand %vm1256_vm11, %vm6736_vm3  ;;  %v1677_v22 = vpack.c.bf16 %v2069_v5, %v2067_v57  ;;  %2103 = vmatmul.mubr.msk.bf16.gmra.mrb[24].mxu0 %vm2102_vm7, %v2236_v61  ;;  %vm446_vm11 = vcmp.eq.s32.totalorder %v6743_v31, 1  ;;  %vm926_vm7 = vcmp.eq.s32.totalorder %v6746_v47, 1  ;;  %vm271_vm3 = vcmp.eq.s32.totalorder %v3257_v10, %v6747_v38 }
 0x2bd   :  { %vm6739_vm13 = vmor %vm6737_vm10, %vm6738_vm12  ;;  %vm5803_vm12 = vcmp.eq.s32.totalorder %v6750_v8, 1 }
 0x2be   :  { %vm1514_vm15 = vmor %vm6739_vm13, %vm1450_vm8  ;;  %vm268_vm8 = vcmp.eq.s32.totalorder %v3246_v40, %v6745_v24 }
 0x2bf   :  { %vm1064_vm14 = vmor %vm6741_vm5, %vm6740_vm6  ;;  %vm749_vm6 = vcmp.eq.s32.totalorder %v3257_v10, %v6755_v55  ;;  %vm301_vm5 = vcmp.eq.s32.totalorder %v3257_v10, %v6756_v53 }
 0x2c0   :  { %vm6742_vm0 = vmmov %vm6734_vm4 }
 0x2c1   :  { %2125 = vmatprep.mubr.msk.bf16.mxu1 %vm6742_vm0, %v1677_v22  ;;  %vm1512_vm4 = vmor %vm1064_vm14, %vm1448_vm1  ;;  %vm269_vm1 = vcmp.eq.s32.totalorder %v3257_v10, %v6745_v24  ;;  %vm463_vm14 = vcmp.eq.s32.totalorder %v6757_v7, 1 }
 0x2c2   :  { %vm2126_vm2 = vmpackc.low %vm1514_vm15, %vm1512_vm4  ;;  %vm270_vm4 = vcmp.eq.s32.totalorder %v3246_v40, %v6747_v38 }
 0x2c3   :  { %2127 = vmatmul.mubr.msk.bf16.gmra.mrb[24].mxu1 %vm2126_vm2, %v2236_v61  ;;  %vm5332_vm10 = vmand %vm268_vm8, %vm446_vm11 }
 0x2c4   :  { %v6749_v51 = vsel %vm5332_vm10, 4294967295, %v6748_v51  ;;  %vm5339_vm13 = vmand %vm271_vm3, %vm447_vm9  ;;  %vm303_vm3 = vcmp.eq.s32.totalorder %v3257_v10, %v6762_v36 }
 0x2c5   :  { %v6752_v23 = vsel %vm5339_vm13, 4294967295, %v6751_v23  ;;  %vm5343_vm15 = vmand %vm269_vm1, %vm446_vm11  ;;  %vm748_vm11 = vcmp.eq.s32.totalorder %v3246_v40, %v6755_v55  ;;  %vm1231_vm13 = vcmp.eq.s32.totalorder %v3257_v10, %v5322_v14 }
 0x2c6   :  { %v6754_v18 = vsel %vm5343_vm15, 4294967295, %v6753_v18  ;;  %vm5354_vm0 = vmand %vm749_vm6, %vm926_vm7 }
 0x2c7   :  { %v6759_v41 = vsel %vm5354_vm0, 4294967295, %v6758_v41  ;;  %vm5362_vm2 = vmand %vm301_vm5, %vm5803_vm12  ;;  %vm302_vm12 = vcmp.eq.s32.totalorder %v3246_v40, %v6762_v36  ;;  %vm6782_vm0 = vcmp.eq.s32.totalorder %v863_v17, 1 }
 0x2c8   :  { %v6761_v43 = vsel %vm5362_vm2, 4294967295, %v6760_v43  ;;  %vm5372_vm1 = vmand %vm270_vm4, %vm447_vm9  ;;  %vm751_vm9 = vcmp.eq.s32.totalorder %v3257_v10, %v6769_v35 }
 0x2c9   :  { %v6764_v46 = vsel %vm5372_vm1, 4294967295, %v6763_v46  ;;  %vm5378_vm6 = vmand %vm748_vm11, %vm926_vm7  ;;  %vm6772_vm11 = vcmp.eq.s32.totalorder %v863_v17, 1  ;;  %vm750_vm7 = vcmp.eq.s32.totalorder %v3246_v40, %v6769_v35  ;;  %vm780_vm1 = vcmp.eq.s32.totalorder %v3246_v40, %v6775_v19 }
 0x2ca   :  { %v6766_v20 = vsel %vm5378_vm6, 4294967295, %v6765_v20  ;;  %vm5386_vm8 = vmand %vm303_vm3, %vm463_vm14  ;;  %vm781_vm3 = vcmp.eq.s32.totalorder %v3257_v10, %v6775_v19  ;;  %vm6807_vm2 = vnez %v6761_v43 }
 0x2cb   :  { %v6768_v39 = vsel %vm5386_vm8, 4294967295, %v6767_v39  ;;  %vm5398_vm4 = vmand %vm302_vm12, %vm463_vm14  ;;  %vm300_vm8 = vcmp.eq.s32.totalorder %v3246_v40, %v6756_v53  ;;  %vm6776_vm14 = vcmp.eq.s32.totalorder %v908_v54, 1  ;;  %vm1229_vm12 = vcmp.eq.s32.totalorder %v3257_v10, %v1148_v42 }
 0x2cc   :  { %v6771_v59 = vsel %vm5398_vm4, 4294967295, %v6770_v59  ;;  %vm5403_vm5 = vmand %vm751_vm9, %vm6772_vm11  ;;  %vm6779_vm11 = vcmp.eq.s32.totalorder %v6750_v8, 1 }
 0x2cd   :  { %v6774_v29 = vsel %vm5403_vm5, 4294967295, %v6773_v29  ;;  %vm5418_vm9 = vmand %vm781_vm3, %vm6776_vm14  ;;  %v1907_v57 = vpop.f32.mrb[4].mxu1 }
 0x2ce   :  { %v6778_v30 = vsel %vm5418_vm9, 4294967295, %v6777_v30  ;;  %vm5424_vm4 = vmand %vm300_vm8, %vm6779_vm11  ;;  %vm1228_vm8 = vcmp.eq.s32.totalorder %v3246_v40, %v1148_v42  ;;  %vm1374_vm11 = vcmp.eq.s32.totalorder %v1308_v9, 1  ;;  %vm6792_vm9 = vnez %v6754_v18  ;;  %1980 = vst [vmem:[#allocation2 + $0x90] sm:$0xff] %v1907_v57 }
 0x2cf   :  { %v6781_v34 = vsel %vm5424_vm4, 4294967295, %v6780_v34  ;;  %vm5429_vm15 = vmand %vm750_vm7, %vm6782_vm0  ;;  %vm1261_vm4 = vcmp.eq.s32.totalorder %v3257_v10, %v1196_v37  ;;  %vm1375_vm7 = vcmp.eq.s32.totalorder %v1311_v13, 1 }
 0x2d0   :  { %v6784_v45 = vsel %vm5429_vm15, 4294967295, %v6783_v45  ;;  %vm6785_vm3 = vmmov %vm6776_vm14  ;;  %vm6815_vm15 = vnez %v6774_v29 }
 0x2d1   :  { %vm5437_vm14 = vmand %vm780_vm1, %vm6785_vm3  ;;  %vm1390_vm3 = vcmp.eq.s32.totalorder %v1356_v16, 1  ;;  %vm6818_vm0 = vnez %v6784_v45 }
 0x2d2   :  { %v6787_v1 = vsel %vm5437_vm14, 4294967295, %v6786_v1  ;;  %vm1421_vm1 = vmand %vm1229_vm12, %vm1374_vm11  ;;  %vm1260_vm14 = vcmp.eq.s32.totalorder %v3246_v40, %v1196_v37  ;;  %vm6793_vm12 = vnez %v6759_v41 }
 0x2d3   :  { %vm1420_vm6 = vmand %vm1228_vm8, %vm1374_vm11 }
 0x2d4   :  { %vm1453_vm5 = vmand %vm1261_vm4, %vm1390_vm3 }
 0x2d5   :  { %vm6794_vm8 = vmor %vm6792_vm9, %vm6793_vm12  ;;  %vm6802_vm9 = vnez %v6749_v51 }
 0x2d6   :  { %vm5465_vm11 = vmor %vm6794_vm8, %vm1421_vm1  ;;  %vm6803_vm1 = vnez %v6766_v20 }
 0x2d7   :  { %vm5473_vm10 = vmand %vm1260_vm14, %vm1390_vm3  ;;  %vm6808_vm14 = vnez %v6778_v30  ;;  %v2039_v27 = vsel %vm5465_vm11, 1.0, %v2235_v21  ;;  %vm6823_vm11 = vcmask 130048  }
 0x2d8   :  { %v6801_v3 = vsel %vm5473_vm10, 4294967295, %v6800_v3  ;;  %vm6804_vm12 = vmor %vm6802_vm9, %vm6803_vm1  ;;  %vm1230_vm10 = vcmp.eq.s32.totalorder %v3246_v40, %v5322_v14 }
 0x2d9   :  { %vm5484_vm8 = vmor %vm6804_vm12, %vm1420_vm6  ;;  %vm1263_vm6 = vcmp.eq.s32.totalorder %v3257_v10, %v1199_v50 }
 0x2da   :  { %v6806_v25 = vsel %vm5484_vm8, 4294967295, %v6805_v25  ;;  %vm6809_vm3 = vmor %vm6807_vm2, %vm6808_vm14  ;;  %vm6814_vm8 = vnez %v6752_v23  ;;  %vm1262_vm14 = vcmp.eq.s32.totalorder %v3246_v40, %v1199_v50 }
 0x2db   :  { %vm5493_vm4 = vmor %vm6809_vm3, %vm1453_vm5  ;;  %vm1391_vm3 = vcmp.eq.s32.totalorder %v1359_v44, 1 }
 0x2dc   :  { %v6811_v56 = vsel %vm5493_vm4, 4294967295, %v6810_v56  ;;  %vm1423_vm1 = vmand %vm1231_vm13, %vm1375_vm7 }
 0x2dd   :  { %vm1422_vm12 = vmand %vm1230_vm10, %vm1375_vm7  ;;  %vm6817_vm7 = vnez %v6764_v46 }
 0x2de   :  { %vm6816_vm2 = vmor %vm6814_vm8, %vm6815_vm15 }
 0x2df   :  { %vm1487_vm5 = vmor %vm6816_vm2, %vm1423_vm1  ;;  %vm6820_vm1 = vnez %v6768_v39  ;;  %vm6821_vm2 = vnez %v6789_v49 }
 0x2e0   :  { %v2041_v28 = vsel %vm1487_vm5, 1.0, %v2235_v21  ;;  %vm1454_vm13 = vmand %vm1262_vm14, %vm1391_vm3  ;;  %vm6824_vm5 = vnez %v6771_v59  ;;  %vm6825_vm14 = vnez %v6797_v6 }
 0x2e1   :  { %v1663_v63 = vpack.c.bf16 %v2041_v28, %v2039_v27  ;;  %vm1455_vm10 = vmand %vm1263_vm6, %vm1391_vm3 }
 0x2e2   :  { %vm6819_vm15 = vmor %vm6817_vm7, %vm6818_vm0  ;;  %vm6827_vm0 = vnez %v6811_v56 }
 0x2e3   :  { %vm1486_vm8 = vmor %vm6819_vm15, %vm1422_vm12  ;;  %2104 = vmatprep.mubr.msk.bf16.mxu0 %vm6823_vm11, %v1663_v63  ;;  %v2071_v40 = vsel %vm6827_vm0, 1.0, %v2235_v21  ;;  %vm6828_vm12 = vnez %v6806_v25  ;;  %vm6831_vm15 = vnez %v6787_v1 }
 0x2e4   :  { %vm6822_vm9 = vmor %vm6820_vm1, %vm6821_vm2 }
 0x2e5   :  { %vm1519_vm4 = vmor %vm6822_vm9, %vm1455_vm10  ;;  %vm6829_vm9 = vnez %v6801_v3  ;;  %vm6830_vm10 = vnez %v6781_v34 }
 0x2e6   :  { %vm6826_vm3 = vmor %vm6824_vm5, %vm6825_vm14  ;;  %v2073_v10 = vsel %vm1519_vm4, 1.0, %v2235_v21  ;;  %v1835_v21 = vpop.f32.mrb[0].mxu0 }
 0x2e7   :  { %vm1518_vm6 = vmor %vm6826_vm3, %vm1454_vm13  ;;  %v1679_v62 = vpack.c.bf16 %v2073_v10, %v2071_v40  ;;  %1962 = vst [vmem:[#allocation2] sm:$0xff] %v1835_v21  ;;  %v1837_v2 = vpop.f32.mrb[1].mxu0 }
 0x2e8   :  { %vm2105_vm7 = vmpackc.low %vm1486_vm8, %vm6828_vm12  ;;  %v1838_v32 = vpop.f32.mrb[2].mxu0 }
 0x2e9   :  { %vm6832_vm1 = vmor %vm6830_vm10, %vm6831_vm15  ;;  %2106 = vmatmul.mubr.msk.bf16.gmra.mrb[28].mxu0 %vm2105_vm7, %v2236_v61  ;;  %2128 = vmatprep.mubr.msk.bf16.mxu1 %vm6823_vm11, %v1679_v62  ;;  %1963 = vst [vmem:[#allocation2 + $0x8] sm:$0xff] %v1838_v32  ;;  %v1840_v60 = vpop.f32.mrb[3].mxu0 }
 0x2ea   :  { %vm1516_vm2 = vmor %vm6832_vm1, %vm6829_vm9  ;;  %v1843_v0 = vpop.f32.mrb[4].mxu0 }
 0x2eb   :  { %vm2129_vm13 = vmpackc.low %vm1518_vm6, %vm1516_vm2  ;;  %1964 = vst [vmem:[#allocation2 + $0x10] sm:$0xff] %v1843_v0  ;;  %v1845_v12 = vpop.f32.mrb[5].mxu0 }
 0x2ec   :  { %2130 = vmatmul.mubr.msk.bf16.gmra.mrb[28].mxu1 %vm2129_vm13, %v2236_v61  ;;  %v1846_v26 = vpop.f32.mrb[6].mxu0  ;;  %v1909_v61 = vpop.f32.mrb[5].mxu1 }
 0x2ed   :  { %1965 = vst [vmem:[#allocation2 + $0x18] sm:$0xff] %v1846_v26  ;;  %v1848_v58 = vpop.f32.mrb[7].mxu0  ;;  %v1910_v5 = vpop.f32.mrb[6].mxu1 }
 0x2ee   :  { %1981 = vst [vmem:[#allocation2 + $0x98] sm:$0xff] %v1910_v5  ;;  %v1912_v22 = vpop.f32.mrb[7].mxu1 }
 0x2ef   :  { %v1851_v17 = vpop.f32.mrb[8].mxu0 }
 0x2f0   :  { %1966 = vst [vmem:[#allocation2 + $0x20] sm:$0xff] %v1851_v17  ;;  %v1853_v31 = vpop.f32.mrb[9].mxu0 }
 0x2f1   :  { %v1915_v14 = vpop.f32.mrb[8].mxu1  ;;  %v1854_v54 = vpop.f32.mrb[10].mxu0 }
 0x2f2   :  { %1982 = vst [vmem:[#allocation2 + $0xa0] sm:$0xff] %v1915_v14  ;;  %v1917_v11 = vpop.f32.mrb[9].mxu1  ;;  %1967 = vst [vmem:[#allocation2 + $0x28] sm:$0xff] %v1854_v54  ;;  %v1856_v24 = vpop.f32.mrb[11].mxu0 }
 0x2f3   :  { %v1918_v47 = vpop.f32.mrb[10].mxu1 }
 0x2f4   :  { %1983 = vst [vmem:[#allocation2 + $0xa8] sm:$0xff] %v1918_v47  ;;  %v1920_v38 = vpop.f32.mrb[11].mxu1 }
 0x31c   :  { %v1859_v51 = vpop.f32.mrb[12].mxu0 }
 0x31d   :  { %1968 = vst [vmem:[#allocation2 + $0x30] sm:$0xff] %v1859_v51  ;;  %v1861_v8 = vpop.f32.mrb[13].mxu0 }
 0x31e   :  { %v1862_v23 = vpop.f32.mrb[14].mxu0 }
 0x31f   :  { %1969 = vst [vmem:[#allocation2 + $0x38] sm:$0xff] %v1862_v23  ;;  %v1864_v18 = vpop.f32.mrb[15].mxu0 }
 0x324   :  { %v1923_v55 = vpop.f32.mrb[12].mxu1 }
 0x325   :  { %1984 = vst [vmem:[#allocation2 + $0xb0] sm:$0xff] %v1923_v55  ;;  %v1925_v53 = vpop.f32.mrb[13].mxu1 }
 0x326   :  { %v1926_v7 = vpop.f32.mrb[14].mxu1 }
 0x327   :  { %1985 = vst [vmem:[#allocation2 + $0xb8] sm:$0xff] %v1926_v7  ;;  %v1928_v41 = vpop.f32.mrb[15].mxu1 }
 0x33f   :  { %v1867_v42 = vpop.f32.mrb[16].mxu0 }
 0x340   :  { %1970 = vst [vmem:[#allocation2 + $0x40] sm:$0xff] %v1867_v42  ;;  %v1869_v43 = vpop.f32.mrb[17].mxu0 }
 0x341   :  { %v1870_v9 = vpop.f32.mrb[18].mxu0 }
 0x342   :  { %1971 = vst [vmem:[#allocation2 + $0x48] sm:$0xff] %v1870_v9  ;;  %v1872_v36 = vpop.f32.mrb[19].mxu0 }
 0x349   :  { %v1931_v46 = vpop.f32.mrb[16].mxu1 }
 0x34a   :  { %1986 = vst [vmem:[#allocation2 + $0xc0] sm:$0xff] %v1931_v46  ;;  %v1933_v20 = vpop.f32.mrb[17].mxu1 }
 0x34b   :  { %v1934_v39 = vpop.f32.mrb[18].mxu1 }
 0x34c   :  { %1987 = vst [vmem:[#allocation2 + $0xc8] sm:$0xff] %v1934_v39  ;;  %v1936_v35 = vpop.f32.mrb[19].mxu1 }
 0x369   :  { %v1875_v59 = vpop.f32.mrb[20].mxu0 }
 0x36a   :  { %1972 = vst [vmem:[#allocation2 + $0x50] sm:$0xff] %v1875_v59  ;;  %v1877_v29 = vpop.f32.mrb[21].mxu0 }
 0x36b   :  { %v1878_v19 = vpop.f32.mrb[22].mxu0 }
 0x36c   :  { %1973 = vst [vmem:[#allocation2 + $0x58] sm:$0xff] %v1878_v19  ;;  %v1880_v37 = vpop.f32.mrb[23].mxu0 }
 0x372   :  { %v1939_v30 = vpop.f32.mrb[20].mxu1 }
 0x373   :  { %1988 = vst [vmem:[#allocation2 + $0xd0] sm:$0xff] %v1939_v30  ;;  %v1941_v34 = vpop.f32.mrb[21].mxu1 }
 0x374   :  { %v1942_v45 = vpop.f32.mrb[22].mxu1 }
 0x375   :  { %1989 = vst [vmem:[#allocation2 + $0xd8] sm:$0xff] %v1942_v45  ;;  %v1944_v16 = vpop.f32.mrb[23].mxu1 }
 0x38f   :  { %v1883_v1 = vpop.f32.mrb[24].mxu0 }
 0x390   :  { %1974 = vst [vmem:[#allocation2 + $0x60] sm:$0xff] %v1883_v1  ;;  %v1885_v50 = vpop.f32.mrb[25].mxu0 }
 0x391   :  { %v1886_v49 = vpop.f32.mrb[26].mxu0 }
 0x392   :  { %1975 = vst [vmem:[#allocation2 + $0x68] sm:$0xff] %v1886_v49  ;;  %v1888_v15 = vpop.f32.mrb[27].mxu0 }
 0x396   :  { %v1947_v13 = vpop.f32.mrb[24].mxu1 }
 0x397   :  { %1990 = vst [vmem:[#allocation2 + $0xe0] sm:$0xff] %v1947_v13  ;;  %v1949_v6 = vpop.f32.mrb[25].mxu1 }
 0x398   :  { %v1950_v3 = vpop.f32.mrb[26].mxu1 }
 0x399   :  { %1991 = vst [vmem:[#allocation2 + $0xe8] sm:$0xff] %v1950_v3  ;;  %v1952_v25 = vpop.f32.mrb[27].mxu1 }
 0x3bc   :  { %v1891_v56 = vpop.f32.mrb[28].mxu0 }
 0x3bd   :  { %1976 = vst [vmem:[#allocation2 + $0x70] sm:$0xff] %v1891_v56  ;;  %v1893_v44 = vpop.f32.mrb[29].mxu0 }
 0x3be   :  { %v1894_v27 = vpop.f32.mrb[30].mxu0 }
 0x3bf   :  { %v1955_v28 = vpop.f32.mrb[28].mxu1  ;;  %1977 = vst [vmem:[#allocation2 + $0x78] sm:$0xff] %v1894_v27  ;;  %v1896_v63 = vpop.f32.mrb[31].mxu0 }
 0x3c0   :  { %1992 = vst [vmem:[#allocation2 + $0xf0] sm:$0xff] %v1955_v28  ;;  %v1957_v40 = vpop.f32.mrb[29].mxu1 }
 0x3c1   :  { %v1958_v10 = vpop.f32.mrb[30].mxu1 }
 0x3c2   :  { %1993 = vst [vmem:[#allocation2 + $0xf8] sm:$0xff] %v1958_v10  ;;  %v1960_v62 = vpop.f32.mrb[31].mxu1 }
 0x3c3   :  { %2219 = shalt.err (!%p2216_p4)
}
 0x3c4   :  { %s2220_s25 = scalar_lea.hbm %s5560_s2, 4096 }
 0x3c5   :  { %p2221_p5 = scmp.ne.s32.totalorder %s5560_s2, %s2220_s25  ;;  %p2224_p6 = scmp.lt.u32.totalorder %s2220_s25, %s5560_s2 }
 0x3c7   :  { %p2226_p7 = pnand %p2224_p6, %p2221_p5 }
 0x3c9   :  { %2229 = shalt.err (!%p2226_p7)
}
 0x3ca   :  { %s2238_s30 = smov 128   ;;  %s2239_s3 = smov 8  }
 0x3cb   :  { %2005 = dma.vmem_to_hbm [thread:$0]  %s2000_s21, 4096, %s5560_s2, [#allocation3], %s2238_s30, %s2238_s30, %s2239_s3  }
 0x3cc   :  { %2230 = dma.done.wait [#allocation3], 4096  }
 0x3cd   :  { %2231 = vsyncadd [#allocation3], 4294963200 }
 0x3ce   :  { %2009 = vsyncpa [#allocation3], 1 }

</bundles_post_ra>
